<compile_context>
chip_gen: v6e
topology: v6e:2x2x1
jax: 0.10.0
libtpu: 0.0.40
codegen_flags: <defaults>
</compile_context>

<pallas_src>
import math

import jax
import jax.numpy as jnp
from jax import lax
from jax.experimental import pallas as pl
from jax.experimental.pallas import tpu as pltpu


# ----------------------------- scaled-down BERT config ----------------------
BATCH = 2
SEQ = 8
HIDDEN = 128          # bert-base: 768
NUM_HEADS = 4         # bert-base: 12
HEAD_DIM = HIDDEN // NUM_HEADS
NUM_LAYERS = 2        # bert-base: 12
INTERMEDIATE = 512    # bert-base: 3072
VOCAB = 384           # fc output size (vocab_size arg of Net)
MAX_POS = 64
TYPE_VOCAB = 2
LN_EPS = 1e-12

_WEIGHT_ORDER = (
    "emb_ln_g", "emb_ln_b",
    "wqkv", "bqkv", "wo", "bo", "ln1_g", "ln1_b",
    "w1", "b1", "w2", "b2", "ln2_g", "ln2_b",
    "fc_w", "fc_b",
)


# ----------------------------- fused forward kernel -------------------------
def _bert_kernel(ids_ref, word_ref, pt_ref,
                 embg_ref, embb_ref,
                 wqkv_ref, bqkv_ref, wo_ref, bo_ref,
                 ln1g_ref, ln1b_ref,
                 w1_ref, b1_ref, w2_ref, b2_ref,
                 ln2g_ref, ln2b_ref,
                 fcw_ref, fcb_ref,
                 out_ref):
    H, DH, NH, S = HIDDEN, HEAD_DIM, NUM_HEADS, SEQ
    rows = out_ref.shape[0]           # SEQ (per-batch grid) or B*SEQ (merged)
    n_b = rows // S                   # batches packed into this block
    scale = 1.0 / math.sqrt(DH)
    bf16 = jnp.bfloat16

    def layer_norm(x, g, b):
        # f32 stats (eps=1e-12 is meaningless in bf16)
        mean = jnp.mean(x, axis=-1, keepdims=True)
        xc = x - mean
        var = jnp.mean(xc * xc, axis=-1, keepdims=True)
        return xc * lax.rsqrt(var + LN_EPS) * g + b

    def mm(x, w, b, gelu=False):
        # bf16 MXU operands, f32 accumulation, f32 epilogue.
        y = jnp.dot(x.astype(bf16), w, preferred_element_type=jnp.float32) + b
        if gelu:
            # tanh-approximate GELU: tanh goes to the (otherwise idle) EUP slot
            # instead of the long erf VALU polynomial over the (rows, I) tensor.
            y = 0.5 * y * (1.0 + jnp.tanh(
                0.7978845608028654 * (y + 0.044715 * y * y * y)))
        return y

    # ---- fused embedding lookup: one-hot @ word table (MXU gather) ---------
    ids = ids_ref[...]                                        # (rows, 1) int32
    vocab_iota = lax.broadcasted_iota(jnp.int32, (rows, VOCAB), 1)
    one_hot = (vocab_iota == ids).astype(jnp.float32)         # (rows, VOCAB)
    we = jnp.dot(one_hot, word_ref[...],
                 preferred_element_type=jnp.float32)          # (rows, H)
    pt = pt_ref[...]                                          # (SEQ, H) pos+type
    if n_b > 1:
        pt = jnp.concatenate([pt] * n_b, axis=0)              # (rows, H)
    h = layer_norm(we + pt, embg_ref[...], embb_ref[...])

    for l in range(NUM_LAYERS):
        # fused Q/K/V projection: one (rows, H) @ (H, 3H) matmul
        qkv = mm(h, wqkv_ref[l], bqkv_ref[l])                 # (rows, 3H) f32
        qkv_b = qkv.astype(bf16)                              # bf16 MXU operands

        # per-batch / per-head attention; head contexts stay in vregs and are
        # concatenated into one lane-dense (rows, H) operand for Wo.
        ctx_batches = []
        for bb in range(n_b):
            r0 = bb * S
            head_ctx = []
            for hh in range(NH):
                lo = hh * DH
                q = qkv_b[r0:r0 + S, lo:lo + DH]              # (S, DH) bf16
                k = qkv_b[r0:r0 + S, H + lo:H + lo + DH]
                v = qkv_b[r0:r0 + S, 2 * H + lo:2 * H + lo + DH]
                # q @ k^T natively (contract dim 1 of both) -- no XLU transpose.
                s = lax.dot_general(
                    q, k, (((1,), (1,)), ((), ())),
                    preferred_element_type=jnp.float32) * scale
                s = s - jnp.max(s, axis=-1, keepdims=True)
                p = jnp.exp(s)
                p = p * pl.reciprocal(jnp.sum(p, axis=-1, keepdims=True),
                                      approx=True)
                head_ctx.append(jnp.dot(p.astype(bf16), v,
                                        preferred_element_type=jnp.float32))
            ctx_batches.append(jnp.concatenate(head_ctx, axis=-1))   # (S, H)
        ctx = ctx_batches[0] if n_b == 1 else jnp.concatenate(ctx_batches,
                                                              axis=0)

        attn_out = mm(ctx, wo_ref[l], bo_ref[l])
        h = layer_norm(h + attn_out, ln1g_ref[l], ln1b_ref[l])  # fused add+LN

        ffn = mm(h, w1_ref[l], b1_ref[l], gelu=True)            # (rows, I)
        ffn = mm(ffn, w2_ref[l], b2_ref[l])                     # (rows, H)
        h = layer_norm(h + ffn, ln2g_ref[l], ln2b_ref[l])       # fused add+LN

    # logits = fc(last hidden state); lane-dense (rows, VOCAB=384) store
    out_ref[...] = mm(h, fcw_ref[...], fcb_ref[...]).astype(out_ref.dtype)


# ----------------------------- grid gating ----------------------------------
def _tensorcores_per_chip():
    """Best-effort TensorCore count (2 on v7x megacore, else 1). Never raises."""
    try:
        info = pltpu.get_tpu_info()
        for attr in ("num_tensorcores", "tensorcores_per_chip", "num_cores",
                     "core_count"):
            v = getattr(info, attr, None)
            if isinstance(v, int) and v > 0:
                return v
        ver = str(getattr(info, "chip_version", "")).lower()
        if "7" in ver:
            return 2
    except Exception:
        pass
    return 1


def bert_forward_fused(token_ids_flat, params):
    """token_ids_flat: (B*S, 1) int32 -> logits (B*S, VOCAB) f32."""
    M = token_ids_flat.shape[0]
    assert M % SEQ == 0
    B = M // SEQ

    # v7x: one batch per grid step so both TensorCores get work ("parallel").
    # v5e/v6e (single TC): the grid is just a serial loop -> merge all batches
    # into one block (halves per-step overhead, doubles MXU LHS rows).
    if _tensorcores_per_chip() >= 2 and B > 1:
        grid = (B,)
        rows = SEQ
    else:
        grid = (1,)
        rows = M

    # position + token_type(=0) embeddings, combined outside (param-only, tiny)
    pt_emb = params["pos_emb"][:SEQ] + params["type_emb"][0][None, :]  # (S, H)
    weights = [params[name] for name in _WEIGHT_ORDER]

    def const_spec(arr):
        nd = arr.ndim
        # Grid-invariant block (never re-fetched).  Default double-buffering
        # wastes ~1 MB VMEM here; pl.Buffered(1) skipped for compile safety.
        return pl.BlockSpec(arr.shape, lambda b, _nd=nd: (0,) * _nd)

    in_specs = [pl.BlockSpec((rows, 1), lambda b: (b, 0)),     # token ids
                const_spec(params["word_emb"]),
                const_spec(pt_emb)]
    in_specs += [const_spec(w) for w in weights]

    return pl.pallas_call(
        _bert_kernel,
        out_shape=jax.ShapeDtypeStruct((M, VOCAB), jnp.float32),
        grid_spec=pltpu.PrefetchScalarGridSpec(
            num_scalar_prefetch=0,
            grid=grid,
            in_specs=in_specs,
            out_specs=pl.BlockSpec((rows, VOCAB), lambda b: (b, 0)),
        ),
        compiler_params=pltpu.CompilerParams(
            dimension_semantics=("parallel",)),
    )(token_ids_flat, params["word_emb"], pt_emb, *weights)


# ----------------------------- parameter init -------------------------------
def init_params(key):
    std = 0.02
    ks = jax.random.split(key, 8)

    def nrm(k, shape):
        return std * jax.random.normal(k, shape, dtype=jnp.float32)

    H, I, L, V = HIDDEN, INTERMEDIATE, NUM_LAYERS, VOCAB
    return {
        # embeddings (f32; word table gathered in-kernel via one-hot matmul)
        "word_emb": nrm(ks[0], (V, H)),
        "pos_emb": nrm(ks[1], (MAX_POS, H)),
        "type_emb": nrm(ks[2], (TYPE_VOCAB, H)),
        "emb_ln_g": jnp.ones((1, H), jnp.float32),
        "emb_ln_b": jnp.zeros((1, H), jnp.float32),
        # per-layer weights stacked on a leading layer axis; matmul weights are
        # (in, out) (transposed vs torch nn.Linear) and stored bf16 for the MXU
        # (f32 accumulation in-kernel); biases / LN params stay f32.
        "wqkv": nrm(ks[3], (L, H, 3 * H)).astype(jnp.bfloat16),   # Wq|Wk|Wv
        "bqkv": jnp.zeros((L, 1, 3 * H), jnp.float32),
        "wo": nrm(ks[4], (L, H, H)).astype(jnp.bfloat16),
        "bo": jnp.zeros((L, 1, H), jnp.float32),
        "ln1_g": jnp.ones((L, 1, H), jnp.float32),
        "ln1_b": jnp.zeros((L, 1, H), jnp.float32),
        "w1": nrm(ks[5], (L, H, I)).astype(jnp.bfloat16),
        "b1": jnp.zeros((L, 1, I), jnp.float32),
        "w2": nrm(ks[6], (L, I, H)).astype(jnp.bfloat16),
        "b2": jnp.zeros((L, 1, H), jnp.float32),
        "ln2_g": jnp.ones((L, 1, H), jnp.float32),
        "ln2_b": jnp.zeros((L, 1, H), jnp.float32),
        # final nn.Linear(hidden, vocab_size)
        "fc_w": nrm(ks[7], (H, V)).astype(jnp.bfloat16),
        "fc_b": jnp.zeros((1, V), jnp.float32),
    }


# ----------------------------- model forward --------------------------------
def net_forward(params, token_ids):
    """token_ids: (B, S) int32 -> logits (B, S, VOCAB)."""
    B, S = token_ids.shape
    ids_flat = token_ids.reshape(B * S, 1).astype(jnp.int32)
    logits = bert_forward_fused(ids_flat, params)                 # (B*S, V)
    return logits.reshape(B, S, VOCAB)


# ----------------------------- main ------------------------------------------
if __name__ == "__main__":
    key = jax.random.PRNGKey(0)
    pkey, xkey = jax.random.split(key)
    params = init_params(pkey)

    # x: (batch_size, sentence_length) token ids
    x = jax.random.randint(xkey, (BATCH, SEQ), minval=0, maxval=VOCAB,
                           dtype=jnp.int32)

    logits = jax.jit(net_forward)(params, x)
    jax.block_until_ready(logits)

    assert logits.shape == (BATCH, SEQ, VOCAB)
    assert logits.dtype == jnp.float32
    assert bool(jnp.all(jnp.isfinite(logits)))
    print("KERNEL_OK")
</pallas_src>

<mosaic_0001>
module attributes {stable_mosaic.version = 11 : i64} {
  func.func @_bert_kernel(%arg0: i32, %arg1: memref<16x1xi32, #tpu.memory_space<vmem>>, %arg2: memref<384x128xf32, #tpu.memory_space<vmem>>, %arg3: memref<8x128xf32, #tpu.memory_space<vmem>>, %arg4: memref<1x128xf32, #tpu.memory_space<vmem>>, %arg5: memref<1x128xf32, #tpu.memory_space<vmem>>, %arg6: memref<2x128x384xbf16, #tpu.memory_space<vmem>>, %arg7: memref<2x1x384xf32, #tpu.memory_space<vmem>>, %arg8: memref<2x128x128xbf16, #tpu.memory_space<vmem>>, %arg9: memref<2x1x128xf32, #tpu.memory_space<vmem>>, %arg10: memref<2x1x128xf32, #tpu.memory_space<vmem>>, %arg11: memref<2x1x128xf32, #tpu.memory_space<vmem>>, %arg12: memref<2x128x512xbf16, #tpu.memory_space<vmem>>, %arg13: memref<2x1x512xf32, #tpu.memory_space<vmem>>, %arg14: memref<2x512x128xbf16, #tpu.memory_space<vmem>>, %arg15: memref<2x1x128xf32, #tpu.memory_space<vmem>>, %arg16: memref<2x1x128xf32, #tpu.memory_space<vmem>>, %arg17: memref<2x1x128xf32, #tpu.memory_space<vmem>>, %arg18: memref<128x384xbf16, #tpu.memory_space<vmem>>, %arg19: memref<1x384xf32, #tpu.memory_space<vmem>>, %arg20: memref<16x384xf32, #tpu.memory_space<vmem>>) attributes {dimension_semantics = [#tpu.dimension_semantics<parallel>], iteration_bounds = array<i64: 1>, scalar_prefetch = 0 : i64, scratch_operands = 0 : i64, tpu.core_type = #tpu.core_type<tc>, window_params = [{transform_indices = @transform_0, window_bounds = array<i64: 16, 1>}, {pipeline_mode = #tpu.pipeline_mode<synchronous>, transform_indices = @transform_1, window_bounds = array<i64: 384, 128>}, {pipeline_mode = #tpu.pipeline_mode<synchronous>, transform_indices = @transform_2, window_bounds = array<i64: 8, 128>}, {pipeline_mode = #tpu.pipeline_mode<synchronous>, transform_indices = @transform_3, window_bounds = array<i64: 1, 128>}, {pipeline_mode = #tpu.pipeline_mode<synchronous>, transform_indices = @transform_4, window_bounds = array<i64: 1, 128>}, {pipeline_mode = #tpu.pipeline_mode<synchronous>, transform_indices = @transform_5, window_bounds = array<i64: 2, 128, 384>}, {pipeline_mode = #tpu.pipeline_mode<synchronous>, transform_indices = @transform_6, window_bounds = array<i64: 2, 1, 384>}, {pipeline_mode = #tpu.pipeline_mode<synchronous>, transform_indices = @transform_7, window_bounds = array<i64: 2, 128, 128>}, {pipeline_mode = #tpu.pipeline_mode<synchronous>, transform_indices = @transform_8, window_bounds = array<i64: 2, 1, 128>}, {pipeline_mode = #tpu.pipeline_mode<synchronous>, transform_indices = @transform_9, window_bounds = array<i64: 2, 1, 128>}, {pipeline_mode = #tpu.pipeline_mode<synchronous>, transform_indices = @transform_10, window_bounds = array<i64: 2, 1, 128>}, {pipeline_mode = #tpu.pipeline_mode<synchronous>, transform_indices = @transform_11, window_bounds = array<i64: 2, 128, 512>}, {pipeline_mode = #tpu.pipeline_mode<synchronous>, transform_indices = @transform_12, window_bounds = array<i64: 2, 1, 512>}, {pipeline_mode = #tpu.pipeline_mode<synchronous>, transform_indices = @transform_13, window_bounds = array<i64: 2, 512, 128>}, {pipeline_mode = #tpu.pipeline_mode<synchronous>, transform_indices = @transform_14, window_bounds = array<i64: 2, 1, 128>}, {pipeline_mode = #tpu.pipeline_mode<synchronous>, transform_indices = @transform_15, window_bounds = array<i64: 2, 1, 128>}, {pipeline_mode = #tpu.pipeline_mode<synchronous>, transform_indices = @transform_16, window_bounds = array<i64: 2, 1, 128>}, {pipeline_mode = #tpu.pipeline_mode<synchronous>, transform_indices = @transform_17, window_bounds = array<i64: 128, 384>}, {pipeline_mode = #tpu.pipeline_mode<synchronous>, transform_indices = @transform_18, window_bounds = array<i64: 1, 384>}, {transform_indices = @transform_19, window_bounds = array<i64: 16, 384>}]} {
    %c0 = arith.constant 0 : index
    %c0_0 = arith.constant 0 : index
    %0 = vector.load %arg1[%c0, %c0_0] : memref<16x1xi32, #tpu.memory_space<vmem>>, vector<16x1xi32>
    %1 = tpu.iota {dimensions = array<i32: 1>} : vector<16x384xi32>
    %2 = vector.broadcast %0 : vector<16x1xi32> to vector<16x384xi32>
    %3 = arith.cmpi eq, %1, %2 : vector<16x384xi32>
    %4 = arith.extui %3 : vector<16x384xi1> to vector<16x384xi32>
    %5 = arith.sitofp %4 : vector<16x384xi32> to vector<16x384xf32>
    %c0_1 = arith.constant 0 : index
    %c0_2 = arith.constant 0 : index
    %6 = vector.load %arg2[%c0_1, %c0_2] : memref<384x128xf32, #tpu.memory_space<vmem>>, vector<384x128xf32>
    %cst = arith.constant dense<0.000000e+00> : vector<16x128xf32>
    %7 = tpu.matmul %5, %6, %cst {dimension_numbers = #tpu.dot_dimension_numbers<[1], [0], [0], [1], [0, 0, 1, 1], [], []>} : vector<16x384xf32>, vector<384x128xf32>, vector<16x128xf32> -> vector<16x128xf32>
    %c0_3 = arith.constant 0 : index
    %c0_4 = arith.constant 0 : index
    %8 = vector.load %arg3[%c0_3, %c0_4] : memref<8x128xf32, #tpu.memory_space<vmem>>, vector<8x128xf32>
    %9 = tpu.concatenate %8, %8 in 0 : vector<8x128xf32>, vector<8x128xf32> -> vector<16x128xf32>
    %10 = arith.addf %7, %9 : vector<16x128xf32>
    %c0_5 = arith.constant 0 : index
    %c0_6 = arith.constant 0 : index
    %11 = vector.load %arg4[%c0_5, %c0_6] : memref<1x128xf32, #tpu.memory_space<vmem>>, vector<1x128xf32>
    %c0_7 = arith.constant 0 : index
    %c0_8 = arith.constant 0 : index
    %12 = vector.load %arg5[%c0_7, %c0_8] : memref<1x128xf32, #tpu.memory_space<vmem>>, vector<1x128xf32>
    %cst_9 = arith.constant dense<0.000000e+00> : vector<16xf32>
    %13 = vector.multi_reduction <add>, %10, %cst_9 [1] : vector<16x128xf32> to vector<16xf32>
    %14 = vector.shape_cast %13 : vector<16xf32> to vector<16x1xf32>
    %cst_10 = arith.constant 1.280000e+02 : f32
    %15 = vector.broadcast %cst_10 : f32 to vector<16x1xf32>
    %16 = arith.divf %14, %15 : vector<16x1xf32>
    %17 = vector.broadcast %16 : vector<16x1xf32> to vector<16x128xf32>
    %18 = arith.subf %10, %17 : vector<16x128xf32>
    %19 = arith.mulf %18, %18 : vector<16x128xf32>
    %cst_11 = arith.constant dense<0.000000e+00> : vector<16xf32>
    %20 = vector.multi_reduction <add>, %19, %cst_11 [1] : vector<16x128xf32> to vector<16xf32>
    %21 = vector.shape_cast %20 : vector<16xf32> to vector<16x1xf32>
    %cst_12 = arith.constant 1.280000e+02 : f32
    %22 = vector.broadcast %cst_12 : f32 to vector<16x1xf32>
    %23 = arith.divf %21, %22 : vector<16x1xf32>
    %cst_13 = arith.constant 9.99999996E-13 : f32
    %24 = vector.broadcast %cst_13 : f32 to vector<16x1xf32>
    %25 = arith.addf %23, %24 : vector<16x1xf32>
    %26 = math.rsqrt %25 : vector<16x1xf32>
    %27 = vector.broadcast %26 : vector<16x1xf32> to vector<16x128xf32>
    %28 = arith.mulf %18, %27 : vector<16x128xf32>
    %29 = vector.broadcast %11 : vector<1x128xf32> to vector<16x128xf32>
    %30 = arith.mulf %28, %29 : vector<16x128xf32>
    %31 = vector.broadcast %12 : vector<1x128xf32> to vector<16x128xf32>
    %32 = arith.addf %30, %31 : vector<16x128xf32>
    %c0_14 = arith.constant 0 : index
    %c0_15 = arith.constant 0 : index
    %c0_16 = arith.constant 0 : index
    %33 = vector.load %arg6[%c0_14, %c0_15, %c0_16] : memref<2x128x384xbf16, #tpu.memory_space<vmem>>, vector<1x128x384xbf16>
    %34 = vector.shape_cast %33 : vector<1x128x384xbf16> to vector<128x384xbf16>
    %c0_17 = arith.constant 0 : index
    %c0_18 = arith.constant 0 : index
    %c0_19 = arith.constant 0 : index
    %35 = vector.load %arg7[%c0_17, %c0_18, %c0_19] : memref<2x1x384xf32, #tpu.memory_space<vmem>>, vector<1x1x384xf32>
    %36 = vector.shape_cast %35 : vector<1x1x384xf32> to vector<1x384xf32>
    %37 = arith.truncf %32 : vector<16x128xf32> to vector<16x128xbf16>
    %cst_20 = arith.constant dense<0.000000e+00> : vector<16x384xf32>
    %38 = tpu.matmul %37, %34, %cst_20 {dimension_numbers = #tpu.dot_dimension_numbers<[1], [0], [0], [1], [0, 0, 1, 1], [], []>} : vector<16x128xbf16>, vector<128x384xbf16>, vector<16x384xf32> -> vector<16x384xf32>
    %39 = vector.broadcast %36 : vector<1x384xf32> to vector<16x384xf32>
    %40 = arith.addf %38, %39 : vector<16x384xf32>
    %41 = arith.truncf %40 : vector<16x384xf32> to vector<16x384xbf16>
    %42 = vector.extract_strided_slice %41 {offsets = [0, 0], sizes = [8, 32], strides = [1, 1]} : vector<16x384xbf16> to vector<8x32xbf16>
    %43 = vector.extract_strided_slice %41 {offsets = [0, 128], sizes = [8, 32], strides = [1, 1]} : vector<16x384xbf16> to vector<8x32xbf16>
    %44 = vector.extract_strided_slice %41 {offsets = [0, 256], sizes = [8, 32], strides = [1, 1]} : vector<16x384xbf16> to vector<8x32xbf16>
    %cst_21 = arith.constant dense<0.000000e+00> : vector<8x8xf32>
    %45 = tpu.matmul %42, %43, %cst_21 {dimension_numbers = #tpu.dot_dimension_numbers<[1], [1], [0], [0], [0, 0, 1, 0], [], []>} : vector<8x32xbf16>, vector<8x32xbf16>, vector<8x8xf32> -> vector<8x8xf32>
    %cst_22 = arith.constant 0.176776692 : f32
    %46 = vector.broadcast %cst_22 : f32 to vector<8x8xf32>
    %47 = arith.mulf %45, %46 : vector<8x8xf32>
    %cst_23 = arith.constant dense<0xFF800000> : vector<8xf32>
    %48 = vector.multi_reduction <maximumf>, %47, %cst_23 [1] : vector<8x8xf32> to vector<8xf32>
    %49 = vector.shape_cast %48 : vector<8xf32> to vector<8x1xf32>
    %50 = vector.broadcast %49 : vector<8x1xf32> to vector<8x8xf32>
    %51 = arith.subf %47, %50 : vector<8x8xf32>
    %52 = math.exp %51 : vector<8x8xf32>
    %cst_24 = arith.constant dense<0.000000e+00> : vector<8xf32>
    %53 = vector.multi_reduction <add>, %52, %cst_24 [1] : vector<8x8xf32> to vector<8xf32>
    %54 = vector.shape_cast %53 : vector<8xf32> to vector<8x1xf32>
    %55 = tpu.reciprocal %54 {approx = true} : vector<8x1xf32> -> vector<8x1xf32>
    %56 = vector.broadcast %55 : vector<8x1xf32> to vector<8x8xf32>
    %57 = arith.mulf %52, %56 : vector<8x8xf32>
    %58 = arith.truncf %57 : vector<8x8xf32> to vector<8x8xbf16>
    %cst_25 = arith.constant dense<0.000000e+00> : vector<8x32xf32>
    %59 = tpu.matmul %58, %44, %cst_25 {dimension_numbers = #tpu.dot_dimension_numbers<[1], [0], [0], [1], [0, 0, 1, 1], [], []>} : vector<8x8xbf16>, vector<8x32xbf16>, vector<8x32xf32> -> vector<8x32xf32>
    %60 = vector.extract_strided_slice %41 {offsets = [0, 32], sizes = [8, 32], strides = [1, 1]} : vector<16x384xbf16> to vector<8x32xbf16>
    %61 = vector.extract_strided_slice %41 {offsets = [0, 160], sizes = [8, 32], strides = [1, 1]} : vector<16x384xbf16> to vector<8x32xbf16>
    %62 = vector.extract_strided_slice %41 {offsets = [0, 288], sizes = [8, 32], strides = [1, 1]} : vector<16x384xbf16> to vector<8x32xbf16>
    %cst_26 = arith.constant dense<0.000000e+00> : vector<8x8xf32>
    %63 = tpu.matmul %60, %61, %cst_26 {dimension_numbers = #tpu.dot_dimension_numbers<[1], [1], [0], [0], [0, 0, 1, 0], [], []>} : vector<8x32xbf16>, vector<8x32xbf16>, vector<8x8xf32> -> vector<8x8xf32>
    %cst_27 = arith.constant 0.176776692 : f32
    %64 = vector.broadcast %cst_27 : f32 to vector<8x8xf32>
    %65 = arith.mulf %63, %64 : vector<8x8xf32>
    %cst_28 = arith.constant dense<0xFF800000> : vector<8xf32>
    %66 = vector.multi_reduction <maximumf>, %65, %cst_28 [1] : vector<8x8xf32> to vector<8xf32>
    %67 = vector.shape_cast %66 : vector<8xf32> to vector<8x1xf32>
    %68 = vector.broadcast %67 : vector<8x1xf32> to vector<8x8xf32>
    %69 = arith.subf %65, %68 : vector<8x8xf32>
    %70 = math.exp %69 : vector<8x8xf32>
    %cst_29 = arith.constant dense<0.000000e+00> : vector<8xf32>
    %71 = vector.multi_reduction <add>, %70, %cst_29 [1] : vector<8x8xf32> to vector<8xf32>
    %72 = vector.shape_cast %71 : vector<8xf32> to vector<8x1xf32>
    %73 = tpu.reciprocal %72 {approx = true} : vector<8x1xf32> -> vector<8x1xf32>
    %74 = vector.broadcast %73 : vector<8x1xf32> to vector<8x8xf32>
    %75 = arith.mulf %70, %74 : vector<8x8xf32>
    %76 = arith.truncf %75 : vector<8x8xf32> to vector<8x8xbf16>
    %cst_30 = arith.constant dense<0.000000e+00> : vector<8x32xf32>
    %77 = tpu.matmul %76, %62, %cst_30 {dimension_numbers = #tpu.dot_dimension_numbers<[1], [0], [0], [1], [0, 0, 1, 1], [], []>} : vector<8x8xbf16>, vector<8x32xbf16>, vector<8x32xf32> -> vector<8x32xf32>
    %78 = vector.extract_strided_slice %41 {offsets = [0, 64], sizes = [8, 32], strides = [1, 1]} : vector<16x384xbf16> to vector<8x32xbf16>
    %79 = vector.extract_strided_slice %41 {offsets = [0, 192], sizes = [8, 32], strides = [1, 1]} : vector<16x384xbf16> to vector<8x32xbf16>
    %80 = vector.extract_strided_slice %41 {offsets = [0, 320], sizes = [8, 32], strides = [1, 1]} : vector<16x384xbf16> to vector<8x32xbf16>
    %cst_31 = arith.constant dense<0.000000e+00> : vector<8x8xf32>
    %81 = tpu.matmul %78, %79, %cst_31 {dimension_numbers = #tpu.dot_dimension_numbers<[1], [1], [0], [0], [0, 0, 1, 0], [], []>} : vector<8x32xbf16>, vector<8x32xbf16>, vector<8x8xf32> -> vector<8x8xf32>
    %cst_32 = arith.constant 0.176776692 : f32
    %82 = vector.broadcast %cst_32 : f32 to vector<8x8xf32>
    %83 = arith.mulf %81, %82 : vector<8x8xf32>
    %cst_33 = arith.constant dense<0xFF800000> : vector<8xf32>
    %84 = vector.multi_reduction <maximumf>, %83, %cst_33 [1] : vector<8x8xf32> to vector<8xf32>
    %85 = vector.shape_cast %84 : vector<8xf32> to vector<8x1xf32>
    %86 = vector.broadcast %85 : vector<8x1xf32> to vector<8x8xf32>
    %87 = arith.subf %83, %86 : vector<8x8xf32>
    %88 = math.exp %87 : vector<8x8xf32>
    %cst_34 = arith.constant dense<0.000000e+00> : vector<8xf32>
    %89 = vector.multi_reduction <add>, %88, %cst_34 [1] : vector<8x8xf32> to vector<8xf32>
    %90 = vector.shape_cast %89 : vector<8xf32> to vector<8x1xf32>
    %91 = tpu.reciprocal %90 {approx = true} : vector<8x1xf32> -> vector<8x1xf32>
    %92 = vector.broadcast %91 : vector<8x1xf32> to vector<8x8xf32>
    %93 = arith.mulf %88, %92 : vector<8x8xf32>
    %94 = arith.truncf %93 : vector<8x8xf32> to vector<8x8xbf16>
    %cst_35 = arith.constant dense<0.000000e+00> : vector<8x32xf32>
    %95 = tpu.matmul %94, %80, %cst_35 {dimension_numbers = #tpu.dot_dimension_numbers<[1], [0], [0], [1], [0, 0, 1, 1], [], []>} : vector<8x8xbf16>, vector<8x32xbf16>, vector<8x32xf32> -> vector<8x32xf32>
    %96 = vector.extract_strided_slice %41 {offsets = [0, 96], sizes = [8, 32], strides = [1, 1]} : vector<16x384xbf16> to vector<8x32xbf16>
    %97 = vector.extract_strided_slice %41 {offsets = [0, 224], sizes = [8, 32], strides = [1, 1]} : vector<16x384xbf16> to vector<8x32xbf16>
    %98 = vector.extract_strided_slice %41 {offsets = [0, 352], sizes = [8, 32], strides = [1, 1]} : vector<16x384xbf16> to vector<8x32xbf16>
    %cst_36 = arith.constant dense<0.000000e+00> : vector<8x8xf32>
    %99 = tpu.matmul %96, %97, %cst_36 {dimension_numbers = #tpu.dot_dimension_numbers<[1], [1], [0], [0], [0, 0, 1, 0], [], []>} : vector<8x32xbf16>, vector<8x32xbf16>, vector<8x8xf32> -> vector<8x8xf32>
    %cst_37 = arith.constant 0.176776692 : f32
    %100 = vector.broadcast %cst_37 : f32 to vector<8x8xf32>
    %101 = arith.mulf %99, %100 : vector<8x8xf32>
    %cst_38 = arith.constant dense<0xFF800000> : vector<8xf32>
    %102 = vector.multi_reduction <maximumf>, %101, %cst_38 [1] : vector<8x8xf32> to vector<8xf32>
    %103 = vector.shape_cast %102 : vector<8xf32> to vector<8x1xf32>
    %104 = vector.broadcast %103 : vector<8x1xf32> to vector<8x8xf32>
    %105 = arith.subf %101, %104 : vector<8x8xf32>
    %106 = math.exp %105 : vector<8x8xf32>
    %cst_39 = arith.constant dense<0.000000e+00> : vector<8xf32>
    %107 = vector.multi_reduction <add>, %106, %cst_39 [1] : vector<8x8xf32> to vector<8xf32>
    %108 = vector.shape_cast %107 : vector<8xf32> to vector<8x1xf32>
    %109 = tpu.reciprocal %108 {approx = true} : vector<8x1xf32> -> vector<8x1xf32>
    %110 = vector.broadcast %109 : vector<8x1xf32> to vector<8x8xf32>
    %111 = arith.mulf %106, %110 : vector<8x8xf32>
    %112 = arith.truncf %111 : vector<8x8xf32> to vector<8x8xbf16>
    %cst_40 = arith.constant dense<0.000000e+00> : vector<8x32xf32>
    %113 = tpu.matmul %112, %98, %cst_40 {dimension_numbers = #tpu.dot_dimension_numbers<[1], [0], [0], [1], [0, 0, 1, 1], [], []>} : vector<8x8xbf16>, vector<8x32xbf16>, vector<8x32xf32> -> vector<8x32xf32>
    %114 = tpu.concatenate %59, %77, %95, %113 in 1 : vector<8x32xf32>, vector<8x32xf32>, vector<8x32xf32>, vector<8x32xf32> -> vector<8x128xf32>
    %115 = vector.extract_strided_slice %41 {offsets = [8, 0], sizes = [8, 32], strides = [1, 1]} : vector<16x384xbf16> to vector<8x32xbf16>
    %116 = vector.extract_strided_slice %41 {offsets = [8, 128], sizes = [8, 32], strides = [1, 1]} : vector<16x384xbf16> to vector<8x32xbf16>
    %117 = vector.extract_strided_slice %41 {offsets = [8, 256], sizes = [8, 32], strides = [1, 1]} : vector<16x384xbf16> to vector<8x32xbf16>
    %cst_41 = arith.constant dense<0.000000e+00> : vector<8x8xf32>
    %118 = tpu.matmul %115, %116, %cst_41 {dimension_numbers = #tpu.dot_dimension_numbers<[1], [1], [0], [0], [0, 0, 1, 0], [], []>} : vector<8x32xbf16>, vector<8x32xbf16>, vector<8x8xf32> -> vector<8x8xf32>
    %cst_42 = arith.constant 0.176776692 : f32
    %119 = vector.broadcast %cst_42 : f32 to vector<8x8xf32>
    %120 = arith.mulf %118, %119 : vector<8x8xf32>
    %cst_43 = arith.constant dense<0xFF800000> : vector<8xf32>
    %121 = vector.multi_reduction <maximumf>, %120, %cst_43 [1] : vector<8x8xf32> to vector<8xf32>
    %122 = vector.shape_cast %121 : vector<8xf32> to vector<8x1xf32>
    %123 = vector.broadcast %122 : vector<8x1xf32> to vector<8x8xf32>
    %124 = arith.subf %120, %123 : vector<8x8xf32>
    %125 = math.exp %124 : vector<8x8xf32>
    %cst_44 = arith.constant dense<0.000000e+00> : vector<8xf32>
    %126 = vector.multi_reduction <add>, %125, %cst_44 [1] : vector<8x8xf32> to vector<8xf32>
    %127 = vector.shape_cast %126 : vector<8xf32> to vector<8x1xf32>
    %128 = tpu.reciprocal %127 {approx = true} : vector<8x1xf32> -> vector<8x1xf32>
    %129 = vector.broadcast %128 : vector<8x1xf32> to vector<8x8xf32>
    %130 = arith.mulf %125, %129 : vector<8x8xf32>
    %131 = arith.truncf %130 : vector<8x8xf32> to vector<8x8xbf16>
    %cst_45 = arith.constant dense<0.000000e+00> : vector<8x32xf32>
    %132 = tpu.matmul %131, %117, %cst_45 {dimension_numbers = #tpu.dot_dimension_numbers<[1], [0], [0], [1], [0, 0, 1, 1], [], []>} : vector<8x8xbf16>, vector<8x32xbf16>, vector<8x32xf32> -> vector<8x32xf32>
    %133 = vector.extract_strided_slice %41 {offsets = [8, 32], sizes = [8, 32], strides = [1, 1]} : vector<16x384xbf16> to vector<8x32xbf16>
    %134 = vector.extract_strided_slice %41 {offsets = [8, 160], sizes = [8, 32], strides = [1, 1]} : vector<16x384xbf16> to vector<8x32xbf16>
    %135 = vector.extract_strided_slice %41 {offsets = [8, 288], sizes = [8, 32], strides = [1, 1]} : vector<16x384xbf16> to vector<8x32xbf16>
    %cst_46 = arith.constant dense<0.000000e+00> : vector<8x8xf32>
    %136 = tpu.matmul %133, %134, %cst_46 {dimension_numbers = #tpu.dot_dimension_numbers<[1], [1], [0], [0], [0, 0, 1, 0], [], []>} : vector<8x32xbf16>, vector<8x32xbf16>, vector<8x8xf32> -> vector<8x8xf32>
    %cst_47 = arith.constant 0.176776692 : f32
    %137 = vector.broadcast %cst_47 : f32 to vector<8x8xf32>
    %138 = arith.mulf %136, %137 : vector<8x8xf32>
    %cst_48 = arith.constant dense<0xFF800000> : vector<8xf32>
    %139 = vector.multi_reduction <maximumf>, %138, %cst_48 [1] : vector<8x8xf32> to vector<8xf32>
    %140 = vector.shape_cast %139 : vector<8xf32> to vector<8x1xf32>
    %141 = vector.broadcast %140 : vector<8x1xf32> to vector<8x8xf32>
    %142 = arith.subf %138, %141 : vector<8x8xf32>
    %143 = math.exp %142 : vector<8x8xf32>
    %cst_49 = arith.constant dense<0.000000e+00> : vector<8xf32>
    %144 = vector.multi_reduction <add>, %143, %cst_49 [1] : vector<8x8xf32> to vector<8xf32>
    %145 = vector.shape_cast %144 : vector<8xf32> to vector<8x1xf32>
    %146 = tpu.reciprocal %145 {approx = true} : vector<8x1xf32> -> vector<8x1xf32>
    %147 = vector.broadcast %146 : vector<8x1xf32> to vector<8x8xf32>
    %148 = arith.mulf %143, %147 : vector<8x8xf32>
    %149 = arith.truncf %148 : vector<8x8xf32> to vector<8x8xbf16>
    %cst_50 = arith.constant dense<0.000000e+00> : vector<8x32xf32>
    %150 = tpu.matmul %149, %135, %cst_50 {dimension_numbers = #tpu.dot_dimension_numbers<[1], [0], [0], [1], [0, 0, 1, 1], [], []>} : vector<8x8xbf16>, vector<8x32xbf16>, vector<8x32xf32> -> vector<8x32xf32>
    %151 = vector.extract_strided_slice %41 {offsets = [8, 64], sizes = [8, 32], strides = [1, 1]} : vector<16x384xbf16> to vector<8x32xbf16>
    %152 = vector.extract_strided_slice %41 {offsets = [8, 192], sizes = [8, 32], strides = [1, 1]} : vector<16x384xbf16> to vector<8x32xbf16>
    %153 = vector.extract_strided_slice %41 {offsets = [8, 320], sizes = [8, 32], strides = [1, 1]} : vector<16x384xbf16> to vector<8x32xbf16>
    %cst_51 = arith.constant dense<0.000000e+00> : vector<8x8xf32>
    %154 = tpu.matmul %151, %152, %cst_51 {dimension_numbers = #tpu.dot_dimension_numbers<[1], [1], [0], [0], [0, 0, 1, 0], [], []>} : vector<8x32xbf16>, vector<8x32xbf16>, vector<8x8xf32> -> vector<8x8xf32>
    %cst_52 = arith.constant 0.176776692 : f32
    %155 = vector.broadcast %cst_52 : f32 to vector<8x8xf32>
    %156 = arith.mulf %154, %155 : vector<8x8xf32>
    %cst_53 = arith.constant dense<0xFF800000> : vector<8xf32>
    %157 = vector.multi_reduction <maximumf>, %156, %cst_53 [1] : vector<8x8xf32> to vector<8xf32>
    %158 = vector.shape_cast %157 : vector<8xf32> to vector<8x1xf32>
    %159 = vector.broadcast %158 : vector<8x1xf32> to vector<8x8xf32>
    %160 = arith.subf %156, %159 : vector<8x8xf32>
    %161 = math.exp %160 : vector<8x8xf32>
    %cst_54 = arith.constant dense<0.000000e+00> : vector<8xf32>
    %162 = vector.multi_reduction <add>, %161, %cst_54 [1] : vector<8x8xf32> to vector<8xf32>
    %163 = vector.shape_cast %162 : vector<8xf32> to vector<8x1xf32>
    %164 = tpu.reciprocal %163 {approx = true} : vector<8x1xf32> -> vector<8x1xf32>
    %165 = vector.broadcast %164 : vector<8x1xf32> to vector<8x8xf32>
    %166 = arith.mulf %161, %165 : vector<8x8xf32>
    %167 = arith.truncf %166 : vector<8x8xf32> to vector<8x8xbf16>
    %cst_55 = arith.constant dense<0.000000e+00> : vector<8x32xf32>
    %168 = tpu.matmul %167, %153, %cst_55 {dimension_numbers = #tpu.dot_dimension_numbers<[1], [0], [0], [1], [0, 0, 1, 1], [], []>} : vector<8x8xbf16>, vector<8x32xbf16>, vector<8x32xf32> -> vector<8x32xf32>
    %169 = vector.extract_strided_slice %41 {offsets = [8, 96], sizes = [8, 32], strides = [1, 1]} : vector<16x384xbf16> to vector<8x32xbf16>
    %170 = vector.extract_strided_slice %41 {offsets = [8, 224], sizes = [8, 32], strides = [1, 1]} : vector<16x384xbf16> to vector<8x32xbf16>
    %171 = vector.extract_strided_slice %41 {offsets = [8, 352], sizes = [8, 32], strides = [1, 1]} : vector<16x384xbf16> to vector<8x32xbf16>
    %cst_56 = arith.constant dense<0.000000e+00> : vector<8x8xf32>
    %172 = tpu.matmul %169, %170, %cst_56 {dimension_numbers = #tpu.dot_dimension_numbers<[1], [1], [0], [0], [0, 0, 1, 0], [], []>} : vector<8x32xbf16>, vector<8x32xbf16>, vector<8x8xf32> -> vector<8x8xf32>
    %cst_57 = arith.constant 0.176776692 : f32
    %173 = vector.broadcast %cst_57 : f32 to vector<8x8xf32>
    %174 = arith.mulf %172, %173 : vector<8x8xf32>
    %cst_58 = arith.constant dense<0xFF800000> : vector<8xf32>
    %175 = vector.multi_reduction <maximumf>, %174, %cst_58 [1] : vector<8x8xf32> to vector<8xf32>
    %176 = vector.shape_cast %175 : vector<8xf32> to vector<8x1xf32>
    %177 = vector.broadcast %176 : vector<8x1xf32> to vector<8x8xf32>
    %178 = arith.subf %174, %177 : vector<8x8xf32>
    %179 = math.exp %178 : vector<8x8xf32>
    %cst_59 = arith.constant dense<0.000000e+00> : vector<8xf32>
    %180 = vector.multi_reduction <add>, %179, %cst_59 [1] : vector<8x8xf32> to vector<8xf32>
    %181 = vector.shape_cast %180 : vector<8xf32> to vector<8x1xf32>
    %182 = tpu.reciprocal %181 {approx = true} : vector<8x1xf32> -> vector<8x1xf32>
    %183 = vector.broadcast %182 : vector<8x1xf32> to vector<8x8xf32>
    %184 = arith.mulf %179, %183 : vector<8x8xf32>
    %185 = arith.truncf %184 : vector<8x8xf32> to vector<8x8xbf16>
    %cst_60 = arith.constant dense<0.000000e+00> : vector<8x32xf32>
    %186 = tpu.matmul %185, %171, %cst_60 {dimension_numbers = #tpu.dot_dimension_numbers<[1], [0], [0], [1], [0, 0, 1, 1], [], []>} : vector<8x8xbf16>, vector<8x32xbf16>, vector<8x32xf32> -> vector<8x32xf32>
    %187 = tpu.concatenate %132, %150, %168, %186 in 1 : vector<8x32xf32>, vector<8x32xf32>, vector<8x32xf32>, vector<8x32xf32> -> vector<8x128xf32>
    %188 = tpu.concatenate %114, %187 in 0 : vector<8x128xf32>, vector<8x128xf32> -> vector<16x128xf32>
    %c0_61 = arith.constant 0 : index
    %c0_62 = arith.constant 0 : index
    %c0_63 = arith.constant 0 : index
    %189 = vector.load %arg8[%c0_61, %c0_62, %c0_63] : memref<2x128x128xbf16, #tpu.memory_space<vmem>>, vector<1x128x128xbf16>
    %190 = vector.shape_cast %189 : vector<1x128x128xbf16> to vector<128x128xbf16>
    %c0_64 = arith.constant 0 : index
    %c0_65 = arith.constant 0 : index
    %c0_66 = arith.constant 0 : index
    %191 = vector.load %arg9[%c0_64, %c0_65, %c0_66] : memref<2x1x128xf32, #tpu.memory_space<vmem>>, vector<1x1x128xf32>
    %192 = vector.shape_cast %191 : vector<1x1x128xf32> to vector<1x128xf32>
    %193 = arith.truncf %188 : vector<16x128xf32> to vector<16x128xbf16>
    %cst_67 = arith.constant dense<0.000000e+00> : vector<16x128xf32>
    %194 = tpu.matmul %193, %190, %cst_67 {dimension_numbers = #tpu.dot_dimension_numbers<[1], [0], [0], [1], [0, 0, 1, 1], [], []>} : vector<16x128xbf16>, vector<128x128xbf16>, vector<16x128xf32> -> vector<16x128xf32>
    %195 = vector.broadcast %192 : vector<1x128xf32> to vector<16x128xf32>
    %196 = arith.addf %194, %195 : vector<16x128xf32>
    %197 = arith.addf %32, %196 : vector<16x128xf32>
    %c0_68 = arith.constant 0 : index
    %c0_69 = arith.constant 0 : index
    %c0_70 = arith.constant 0 : index
    %198 = vector.load %arg10[%c0_68, %c0_69, %c0_70] : memref<2x1x128xf32, #tpu.memory_space<vmem>>, vector<1x1x128xf32>
    %199 = vector.shape_cast %198 : vector<1x1x128xf32> to vector<1x128xf32>
    %c0_71 = arith.constant 0 : index
    %c0_72 = arith.constant 0 : index
    %c0_73 = arith.constant 0 : index
    %200 = vector.load %arg11[%c0_71, %c0_72, %c0_73] : memref<2x1x128xf32, #tpu.memory_space<vmem>>, vector<1x1x128xf32>
    %201 = vector.shape_cast %200 : vector<1x1x128xf32> to vector<1x128xf32>
    %cst_74 = arith.constant dense<0.000000e+00> : vector<16xf32>
    %202 = vector.multi_reduction <add>, %197, %cst_74 [1] : vector<16x128xf32> to vector<16xf32>
    %203 = vector.shape_cast %202 : vector<16xf32> to vector<16x1xf32>
    %cst_75 = arith.constant 1.280000e+02 : f32
    %204 = vector.broadcast %cst_75 : f32 to vector<16x1xf32>
    %205 = arith.divf %203, %204 : vector<16x1xf32>
    %206 = vector.broadcast %205 : vector<16x1xf32> to vector<16x128xf32>
    %207 = arith.subf %197, %206 : vector<16x128xf32>
    %208 = arith.mulf %207, %207 : vector<16x128xf32>
    %cst_76 = arith.constant dense<0.000000e+00> : vector<16xf32>
    %209 = vector.multi_reduction <add>, %208, %cst_76 [1] : vector<16x128xf32> to vector<16xf32>
    %210 = vector.shape_cast %209 : vector<16xf32> to vector<16x1xf32>
    %cst_77 = arith.constant 1.280000e+02 : f32
    %211 = vector.broadcast %cst_77 : f32 to vector<16x1xf32>
    %212 = arith.divf %210, %211 : vector<16x1xf32>
    %cst_78 = arith.constant 9.99999996E-13 : f32
    %213 = vector.broadcast %cst_78 : f32 to vector<16x1xf32>
    %214 = arith.addf %212, %213 : vector<16x1xf32>
    %215 = math.rsqrt %214 : vector<16x1xf32>
    %216 = vector.broadcast %215 : vector<16x1xf32> to vector<16x128xf32>
    %217 = arith.mulf %207, %216 : vector<16x128xf32>
    %218 = vector.broadcast %199 : vector<1x128xf32> to vector<16x128xf32>
    %219 = arith.mulf %217, %218 : vector<16x128xf32>
    %220 = vector.broadcast %201 : vector<1x128xf32> to vector<16x128xf32>
    %221 = arith.addf %219, %220 : vector<16x128xf32>
    %c0_79 = arith.constant 0 : index
    %c0_80 = arith.constant 0 : index
    %c0_81 = arith.constant 0 : index
    %222 = vector.load %arg12[%c0_79, %c0_80, %c0_81] : memref<2x128x512xbf16, #tpu.memory_space<vmem>>, vector<1x128x512xbf16>
    %223 = vector.shape_cast %222 : vector<1x128x512xbf16> to vector<128x512xbf16>
    %c0_82 = arith.constant 0 : index
    %c0_83 = arith.constant 0 : index
    %c0_84 = arith.constant 0 : index
    %224 = vector.load %arg13[%c0_82, %c0_83, %c0_84] : memref<2x1x512xf32, #tpu.memory_space<vmem>>, vector<1x1x512xf32>
    %225 = vector.shape_cast %224 : vector<1x1x512xf32> to vector<1x512xf32>
    %226 = arith.truncf %221 : vector<16x128xf32> to vector<16x128xbf16>
    %cst_85 = arith.constant dense<0.000000e+00> : vector<16x512xf32>
    %227 = tpu.matmul %226, %223, %cst_85 {dimension_numbers = #tpu.dot_dimension_numbers<[1], [0], [0], [1], [0, 0, 1, 1], [], []>} : vector<16x128xbf16>, vector<128x512xbf16>, vector<16x512xf32> -> vector<16x512xf32>
    %228 = vector.broadcast %225 : vector<1x512xf32> to vector<16x512xf32>
    %229 = arith.addf %227, %228 : vector<16x512xf32>
    %cst_86 = arith.constant 5.000000e-01 : f32
    %230 = vector.broadcast %cst_86 : f32 to vector<16x512xf32>
    %231 = arith.mulf %230, %229 : vector<16x512xf32>
    %cst_87 = arith.constant 4.471500e-02 : f32
    %232 = vector.broadcast %cst_87 : f32 to vector<16x512xf32>
    %233 = arith.mulf %232, %229 : vector<16x512xf32>
    %234 = arith.mulf %233, %229 : vector<16x512xf32>
    %235 = arith.mulf %234, %229 : vector<16x512xf32>
    %236 = arith.addf %229, %235 : vector<16x512xf32>
    %cst_88 = arith.constant 0.797884583 : f32
    %237 = vector.broadcast %cst_88 : f32 to vector<16x512xf32>
    %238 = arith.mulf %237, %236 : vector<16x512xf32>
    %239 = math.tanh %238 : vector<16x512xf32>
    %cst_89 = arith.constant 1.000000e+00 : f32
    %240 = vector.broadcast %cst_89 : f32 to vector<16x512xf32>
    %241 = arith.addf %240, %239 : vector<16x512xf32>
    %242 = arith.mulf %231, %241 : vector<16x512xf32>
    %c0_90 = arith.constant 0 : index
    %c0_91 = arith.constant 0 : index
    %c0_92 = arith.constant 0 : index
    %243 = vector.load %arg14[%c0_90, %c0_91, %c0_92] : memref<2x512x128xbf16, #tpu.memory_space<vmem>>, vector<1x512x128xbf16>
    %244 = vector.shape_cast %243 : vector<1x512x128xbf16> to vector<512x128xbf16>
    %c0_93 = arith.constant 0 : index
    %c0_94 = arith.constant 0 : index
    %c0_95 = arith.constant 0 : index
    %245 = vector.load %arg15[%c0_93, %c0_94, %c0_95] : memref<2x1x128xf32, #tpu.memory_space<vmem>>, vector<1x1x128xf32>
    %246 = vector.shape_cast %245 : vector<1x1x128xf32> to vector<1x128xf32>
    %247 = arith.truncf %242 : vector<16x512xf32> to vector<16x512xbf16>
    %cst_96 = arith.constant dense<0.000000e+00> : vector<16x128xf32>
    %248 = tpu.matmul %247, %244, %cst_96 {dimension_numbers = #tpu.dot_dimension_numbers<[1], [0], [0], [1], [0, 0, 1, 1], [], []>} : vector<16x512xbf16>, vector<512x128xbf16>, vector<16x128xf32> -> vector<16x128xf32>
    %249 = vector.broadcast %246 : vector<1x128xf32> to vector<16x128xf32>
    %250 = arith.addf %248, %249 : vector<16x128xf32>
    %251 = arith.addf %221, %250 : vector<16x128xf32>
    %c0_97 = arith.constant 0 : index
    %c0_98 = arith.constant 0 : index
    %c0_99 = arith.constant 0 : index
    %252 = vector.load %arg16[%c0_97, %c0_98, %c0_99] : memref<2x1x128xf32, #tpu.memory_space<vmem>>, vector<1x1x128xf32>
    %253 = vector.shape_cast %252 : vector<1x1x128xf32> to vector<1x128xf32>
    %c0_100 = arith.constant 0 : index
    %c0_101 = arith.constant 0 : index
    %c0_102 = arith.constant 0 : index
    %254 = vector.load %arg17[%c0_100, %c0_101, %c0_102] : memref<2x1x128xf32, #tpu.memory_space<vmem>>, vector<1x1x128xf32>
    %255 = vector.shape_cast %254 : vector<1x1x128xf32> to vector<1x128xf32>
    %cst_103 = arith.constant dense<0.000000e+00> : vector<16xf32>
    %256 = vector.multi_reduction <add>, %251, %cst_103 [1] : vector<16x128xf32> to vector<16xf32>
    %257 = vector.shape_cast %256 : vector<16xf32> to vector<16x1xf32>
    %cst_104 = arith.constant 1.280000e+02 : f32
    %258 = vector.broadcast %cst_104 : f32 to vector<16x1xf32>
    %259 = arith.divf %257, %258 : vector<16x1xf32>
    %260 = vector.broadcast %259 : vector<16x1xf32> to vector<16x128xf32>
    %261 = arith.subf %251, %260 : vector<16x128xf32>
    %262 = arith.mulf %261, %261 : vector<16x128xf32>
    %cst_105 = arith.constant dense<0.000000e+00> : vector<16xf32>
    %263 = vector.multi_reduction <add>, %262, %cst_105 [1] : vector<16x128xf32> to vector<16xf32>
    %264 = vector.shape_cast %263 : vector<16xf32> to vector<16x1xf32>
    %cst_106 = arith.constant 1.280000e+02 : f32
    %265 = vector.broadcast %cst_106 : f32 to vector<16x1xf32>
    %266 = arith.divf %264, %265 : vector<16x1xf32>
    %cst_107 = arith.constant 9.99999996E-13 : f32
    %267 = vector.broadcast %cst_107 : f32 to vector<16x1xf32>
    %268 = arith.addf %266, %267 : vector<16x1xf32>
    %269 = math.rsqrt %268 : vector<16x1xf32>
    %270 = vector.broadcast %269 : vector<16x1xf32> to vector<16x128xf32>
    %271 = arith.mulf %261, %270 : vector<16x128xf32>
    %272 = vector.broadcast %253 : vector<1x128xf32> to vector<16x128xf32>
    %273 = arith.mulf %271, %272 : vector<16x128xf32>
    %274 = vector.broadcast %255 : vector<1x128xf32> to vector<16x128xf32>
    %275 = arith.addf %273, %274 : vector<16x128xf32>
    %c1 = arith.constant 1 : index
    %c0_108 = arith.constant 0 : index
    %c0_109 = arith.constant 0 : index
    %276 = vector.load %arg6[%c1, %c0_108, %c0_109] : memref<2x128x384xbf16, #tpu.memory_space<vmem>>, vector<1x128x384xbf16>
    %277 = vector.shape_cast %276 : vector<1x128x384xbf16> to vector<128x384xbf16>
    %c1_110 = arith.constant 1 : index
    %c0_111 = arith.constant 0 : index
    %c0_112 = arith.constant 0 : index
    %278 = vector.load %arg7[%c1_110, %c0_111, %c0_112] : memref<2x1x384xf32, #tpu.memory_space<vmem>>, vector<1x1x384xf32>
    %279 = vector.shape_cast %278 : vector<1x1x384xf32> to vector<1x384xf32>
    %280 = arith.truncf %275 : vector<16x128xf32> to vector<16x128xbf16>
    %cst_113 = arith.constant dense<0.000000e+00> : vector<16x384xf32>
    %281 = tpu.matmul %280, %277, %cst_113 {dimension_numbers = #tpu.dot_dimension_numbers<[1], [0], [0], [1], [0, 0, 1, 1], [], []>} : vector<16x128xbf16>, vector<128x384xbf16>, vector<16x384xf32> -> vector<16x384xf32>
    %282 = vector.broadcast %279 : vector<1x384xf32> to vector<16x384xf32>
    %283 = arith.addf %281, %282 : vector<16x384xf32>
    %284 = arith.truncf %283 : vector<16x384xf32> to vector<16x384xbf16>
    %285 = vector.extract_strided_slice %284 {offsets = [0, 0], sizes = [8, 32], strides = [1, 1]} : vector<16x384xbf16> to vector<8x32xbf16>
    %286 = vector.extract_strided_slice %284 {offsets = [0, 128], sizes = [8, 32], strides = [1, 1]} : vector<16x384xbf16> to vector<8x32xbf16>
    %287 = vector.extract_strided_slice %284 {offsets = [0, 256], sizes = [8, 32], strides = [1, 1]} : vector<16x384xbf16> to vector<8x32xbf16>
    %cst_114 = arith.constant dense<0.000000e+00> : vector<8x8xf32>
    %288 = tpu.matmul %285, %286, %cst_114 {dimension_numbers = #tpu.dot_dimension_numbers<[1], [1], [0], [0], [0, 0, 1, 0], [], []>} : vector<8x32xbf16>, vector<8x32xbf16>, vector<8x8xf32> -> vector<8x8xf32>
    %cst_115 = arith.constant 0.176776692 : f32
    %289 = vector.broadcast %cst_115 : f32 to vector<8x8xf32>
    %290 = arith.mulf %288, %289 : vector<8x8xf32>
    %cst_116 = arith.constant dense<0xFF800000> : vector<8xf32>
    %291 = vector.multi_reduction <maximumf>, %290, %cst_116 [1] : vector<8x8xf32> to vector<8xf32>
    %292 = vector.shape_cast %291 : vector<8xf32> to vector<8x1xf32>
    %293 = vector.broadcast %292 : vector<8x1xf32> to vector<8x8xf32>
    %294 = arith.subf %290, %293 : vector<8x8xf32>
    %295 = math.exp %294 : vector<8x8xf32>
    %cst_117 = arith.constant dense<0.000000e+00> : vector<8xf32>
    %296 = vector.multi_reduction <add>, %295, %cst_117 [1] : vector<8x8xf32> to vector<8xf32>
    %297 = vector.shape_cast %296 : vector<8xf32> to vector<8x1xf32>
    %298 = tpu.reciprocal %297 {approx = true} : vector<8x1xf32> -> vector<8x1xf32>
    %299 = vector.broadcast %298 : vector<8x1xf32> to vector<8x8xf32>
    %300 = arith.mulf %295, %299 : vector<8x8xf32>
    %301 = arith.truncf %300 : vector<8x8xf32> to vector<8x8xbf16>
    %cst_118 = arith.constant dense<0.000000e+00> : vector<8x32xf32>
    %302 = tpu.matmul %301, %287, %cst_118 {dimension_numbers = #tpu.dot_dimension_numbers<[1], [0], [0], [1], [0, 0, 1, 1], [], []>} : vector<8x8xbf16>, vector<8x32xbf16>, vector<8x32xf32> -> vector<8x32xf32>
    %303 = vector.extract_strided_slice %284 {offsets = [0, 32], sizes = [8, 32], strides = [1, 1]} : vector<16x384xbf16> to vector<8x32xbf16>
    %304 = vector.extract_strided_slice %284 {offsets = [0, 160], sizes = [8, 32], strides = [1, 1]} : vector<16x384xbf16> to vector<8x32xbf16>
    %305 = vector.extract_strided_slice %284 {offsets = [0, 288], sizes = [8, 32], strides = [1, 1]} : vector<16x384xbf16> to vector<8x32xbf16>
    %cst_119 = arith.constant dense<0.000000e+00> : vector<8x8xf32>
    %306 = tpu.matmul %303, %304, %cst_119 {dimension_numbers = #tpu.dot_dimension_numbers<[1], [1], [0], [0], [0, 0, 1, 0], [], []>} : vector<8x32xbf16>, vector<8x32xbf16>, vector<8x8xf32> -> vector<8x8xf32>
    %cst_120 = arith.constant 0.176776692 : f32
    %307 = vector.broadcast %cst_120 : f32 to vector<8x8xf32>
    %308 = arith.mulf %306, %307 : vector<8x8xf32>
    %cst_121 = arith.constant dense<0xFF800000> : vector<8xf32>
    %309 = vector.multi_reduction <maximumf>, %308, %cst_121 [1] : vector<8x8xf32> to vector<8xf32>
    %310 = vector.shape_cast %309 : vector<8xf32> to vector<8x1xf32>
    %311 = vector.broadcast %310 : vector<8x1xf32> to vector<8x8xf32>
    %312 = arith.subf %308, %311 : vector<8x8xf32>
    %313 = math.exp %312 : vector<8x8xf32>
    %cst_122 = arith.constant dense<0.000000e+00> : vector<8xf32>
    %314 = vector.multi_reduction <add>, %313, %cst_122 [1] : vector<8x8xf32> to vector<8xf32>
    %315 = vector.shape_cast %314 : vector<8xf32> to vector<8x1xf32>
    %316 = tpu.reciprocal %315 {approx = true} : vector<8x1xf32> -> vector<8x1xf32>
    %317 = vector.broadcast %316 : vector<8x1xf32> to vector<8x8xf32>
    %318 = arith.mulf %313, %317 : vector<8x8xf32>
    %319 = arith.truncf %318 : vector<8x8xf32> to vector<8x8xbf16>
    %cst_123 = arith.constant dense<0.000000e+00> : vector<8x32xf32>
    %320 = tpu.matmul %319, %305, %cst_123 {dimension_numbers = #tpu.dot_dimension_numbers<[1], [0], [0], [1], [0, 0, 1, 1], [], []>} : vector<8x8xbf16>, vector<8x32xbf16>, vector<8x32xf32> -> vector<8x32xf32>
    %321 = vector.extract_strided_slice %284 {offsets = [0, 64], sizes = [8, 32], strides = [1, 1]} : vector<16x384xbf16> to vector<8x32xbf16>
    %322 = vector.extract_strided_slice %284 {offsets = [0, 192], sizes = [8, 32], strides = [1, 1]} : vector<16x384xbf16> to vector<8x32xbf16>
    %323 = vector.extract_strided_slice %284 {offsets = [0, 320], sizes = [8, 32], strides = [1, 1]} : vector<16x384xbf16> to vector<8x32xbf16>
    %cst_124 = arith.constant dense<0.000000e+00> : vector<8x8xf32>
    %324 = tpu.matmul %321, %322, %cst_124 {dimension_numbers = #tpu.dot_dimension_numbers<[1], [1], [0], [0], [0, 0, 1, 0], [], []>} : vector<8x32xbf16>, vector<8x32xbf16>, vector<8x8xf32> -> vector<8x8xf32>
    %cst_125 = arith.constant 0.176776692 : f32
    %325 = vector.broadcast %cst_125 : f32 to vector<8x8xf32>
    %326 = arith.mulf %324, %325 : vector<8x8xf32>
    %cst_126 = arith.constant dense<0xFF800000> : vector<8xf32>
    %327 = vector.multi_reduction <maximumf>, %326, %cst_126 [1] : vector<8x8xf32> to vector<8xf32>
    %328 = vector.shape_cast %327 : vector<8xf32> to vector<8x1xf32>
    %329 = vector.broadcast %328 : vector<8x1xf32> to vector<8x8xf32>
    %330 = arith.subf %326, %329 : vector<8x8xf32>
    %331 = math.exp %330 : vector<8x8xf32>
    %cst_127 = arith.constant dense<0.000000e+00> : vector<8xf32>
    %332 = vector.multi_reduction <add>, %331, %cst_127 [1] : vector<8x8xf32> to vector<8xf32>
    %333 = vector.shape_cast %332 : vector<8xf32> to vector<8x1xf32>
    %334 = tpu.reciprocal %333 {approx = true} : vector<8x1xf32> -> vector<8x1xf32>
    %335 = vector.broadcast %334 : vector<8x1xf32> to vector<8x8xf32>
    %336 = arith.mulf %331, %335 : vector<8x8xf32>
    %337 = arith.truncf %336 : vector<8x8xf32> to vector<8x8xbf16>
    %cst_128 = arith.constant dense<0.000000e+00> : vector<8x32xf32>
    %338 = tpu.matmul %337, %323, %cst_128 {dimension_numbers = #tpu.dot_dimension_numbers<[1], [0], [0], [1], [0, 0, 1, 1], [], []>} : vector<8x8xbf16>, vector<8x32xbf16>, vector<8x32xf32> -> vector<8x32xf32>
    %339 = vector.extract_strided_slice %284 {offsets = [0, 96], sizes = [8, 32], strides = [1, 1]} : vector<16x384xbf16> to vector<8x32xbf16>
    %340 = vector.extract_strided_slice %284 {offsets = [0, 224], sizes = [8, 32], strides = [1, 1]} : vector<16x384xbf16> to vector<8x32xbf16>
    %341 = vector.extract_strided_slice %284 {offsets = [0, 352], sizes = [8, 32], strides = [1, 1]} : vector<16x384xbf16> to vector<8x32xbf16>
    %cst_129 = arith.constant dense<0.000000e+00> : vector<8x8xf32>
    %342 = tpu.matmul %339, %340, %cst_129 {dimension_numbers = #tpu.dot_dimension_numbers<[1], [1], [0], [0], [0, 0, 1, 0], [], []>} : vector<8x32xbf16>, vector<8x32xbf16>, vector<8x8xf32> -> vector<8x8xf32>
    %cst_130 = arith.constant 0.176776692 : f32
    %343 = vector.broadcast %cst_130 : f32 to vector<8x8xf32>
    %344 = arith.mulf %342, %343 : vector<8x8xf32>
    %cst_131 = arith.constant dense<0xFF800000> : vector<8xf32>
    %345 = vector.multi_reduction <maximumf>, %344, %cst_131 [1] : vector<8x8xf32> to vector<8xf32>
    %346 = vector.shape_cast %345 : vector<8xf32> to vector<8x1xf32>
    %347 = vector.broadcast %346 : vector<8x1xf32> to vector<8x8xf32>
    %348 = arith.subf %344, %347 : vector<8x8xf32>
    %349 = math.exp %348 : vector<8x8xf32>
    %cst_132 = arith.constant dense<0.000000e+00> : vector<8xf32>
    %350 = vector.multi_reduction <add>, %349, %cst_132 [1] : vector<8x8xf32> to vector<8xf32>
    %351 = vector.shape_cast %350 : vector<8xf32> to vector<8x1xf32>
    %352 = tpu.reciprocal %351 {approx = true} : vector<8x1xf32> -> vector<8x1xf32>
    %353 = vector.broadcast %352 : vector<8x1xf32> to vector<8x8xf32>
    %354 = arith.mulf %349, %353 : vector<8x8xf32>
    %355 = arith.truncf %354 : vector<8x8xf32> to vector<8x8xbf16>
    %cst_133 = arith.constant dense<0.000000e+00> : vector<8x32xf32>
    %356 = tpu.matmul %355, %341, %cst_133 {dimension_numbers = #tpu.dot_dimension_numbers<[1], [0], [0], [1], [0, 0, 1, 1], [], []>} : vector<8x8xbf16>, vector<8x32xbf16>, vector<8x32xf32> -> vector<8x32xf32>
    %357 = tpu.concatenate %302, %320, %338, %356 in 1 : vector<8x32xf32>, vector<8x32xf32>, vector<8x32xf32>, vector<8x32xf32> -> vector<8x128xf32>
    %358 = vector.extract_strided_slice %284 {offsets = [8, 0], sizes = [8, 32], strides = [1, 1]} : vector<16x384xbf16> to vector<8x32xbf16>
    %359 = vector.extract_strided_slice %284 {offsets = [8, 128], sizes = [8, 32], strides = [1, 1]} : vector<16x384xbf16> to vector<8x32xbf16>
    %360 = vector.extract_strided_slice %284 {offsets = [8, 256], sizes = [8, 32], strides = [1, 1]} : vector<16x384xbf16> to vector<8x32xbf16>
    %cst_134 = arith.constant dense<0.000000e+00> : vector<8x8xf32>
    %361 = tpu.matmul %358, %359, %cst_134 {dimension_numbers = #tpu.dot_dimension_numbers<[1], [1], [0], [0], [0, 0, 1, 0], [], []>} : vector<8x32xbf16>, vector<8x32xbf16>, vector<8x8xf32> -> vector<8x8xf32>
    %cst_135 = arith.constant 0.176776692 : f32
    %362 = vector.broadcast %cst_135 : f32 to vector<8x8xf32>
    %363 = arith.mulf %361, %362 : vector<8x8xf32>
    %cst_136 = arith.constant dense<0xFF800000> : vector<8xf32>
    %364 = vector.multi_reduction <maximumf>, %363, %cst_136 [1] : vector<8x8xf32> to vector<8xf32>
    %365 = vector.shape_cast %364 : vector<8xf32> to vector<8x1xf32>
    %366 = vector.broadcast %365 : vector<8x1xf32> to vector<8x8xf32>
    %367 = arith.subf %363, %366 : vector<8x8xf32>
    %368 = math.exp %367 : vector<8x8xf32>
    %cst_137 = arith.constant dense<0.000000e+00> : vector<8xf32>
    %369 = vector.multi_reduction <add>, %368, %cst_137 [1] : vector<8x8xf32> to vector<8xf32>
    %370 = vector.shape_cast %369 : vector<8xf32> to vector<8x1xf32>
    %371 = tpu.reciprocal %370 {approx = true} : vector<8x1xf32> -> vector<8x1xf32>
    %372 = vector.broadcast %371 : vector<8x1xf32> to vector<8x8xf32>
    %373 = arith.mulf %368, %372 : vector<8x8xf32>
    %374 = arith.truncf %373 : vector<8x8xf32> to vector<8x8xbf16>
    %cst_138 = arith.constant dense<0.000000e+00> : vector<8x32xf32>
    %375 = tpu.matmul %374, %360, %cst_138 {dimension_numbers = #tpu.dot_dimension_numbers<[1], [0], [0], [1], [0, 0, 1, 1], [], []>} : vector<8x8xbf16>, vector<8x32xbf16>, vector<8x32xf32> -> vector<8x32xf32>
    %376 = vector.extract_strided_slice %284 {offsets = [8, 32], sizes = [8, 32], strides = [1, 1]} : vector<16x384xbf16> to vector<8x32xbf16>
    %377 = vector.extract_strided_slice %284 {offsets = [8, 160], sizes = [8, 32], strides = [1, 1]} : vector<16x384xbf16> to vector<8x32xbf16>
    %378 = vector.extract_strided_slice %284 {offsets = [8, 288], sizes = [8, 32], strides = [1, 1]} : vector<16x384xbf16> to vector<8x32xbf16>
    %cst_139 = arith.constant dense<0.000000e+00> : vector<8x8xf32>
    %379 = tpu.matmul %376, %377, %cst_139 {dimension_numbers = #tpu.dot_dimension_numbers<[1], [1], [0], [0], [0, 0, 1, 0], [], []>} : vector<8x32xbf16>, vector<8x32xbf16>, vector<8x8xf32> -> vector<8x8xf32>
    %cst_140 = arith.constant 0.176776692 : f32
    %380 = vector.broadcast %cst_140 : f32 to vector<8x8xf32>
    %381 = arith.mulf %379, %380 : vector<8x8xf32>
    %cst_141 = arith.constant dense<0xFF800000> : vector<8xf32>
    %382 = vector.multi_reduction <maximumf>, %381, %cst_141 [1] : vector<8x8xf32> to vector<8xf32>
    %383 = vector.shape_cast %382 : vector<8xf32> to vector<8x1xf32>
    %384 = vector.broadcast %383 : vector<8x1xf32> to vector<8x8xf32>
    %385 = arith.subf %381, %384 : vector<8x8xf32>
    %386 = math.exp %385 : vector<8x8xf32>
    %cst_142 = arith.constant dense<0.000000e+00> : vector<8xf32>
    %387 = vector.multi_reduction <add>, %386, %cst_142 [1] : vector<8x8xf32> to vector<8xf32>
    %388 = vector.shape_cast %387 : vector<8xf32> to vector<8x1xf32>
    %389 = tpu.reciprocal %388 {approx = true} : vector<8x1xf32> -> vector<8x1xf32>
    %390 = vector.broadcast %389 : vector<8x1xf32> to vector<8x8xf32>
    %391 = arith.mulf %386, %390 : vector<8x8xf32>
    %392 = arith.truncf %391 : vector<8x8xf32> to vector<8x8xbf16>
    %cst_143 = arith.constant dense<0.000000e+00> : vector<8x32xf32>
    %393 = tpu.matmul %392, %378, %cst_143 {dimension_numbers = #tpu.dot_dimension_numbers<[1], [0], [0], [1], [0, 0, 1, 1], [], []>} : vector<8x8xbf16>, vector<8x32xbf16>, vector<8x32xf32> -> vector<8x32xf32>
    %394 = vector.extract_strided_slice %284 {offsets = [8, 64], sizes = [8, 32], strides = [1, 1]} : vector<16x384xbf16> to vector<8x32xbf16>
    %395 = vector.extract_strided_slice %284 {offsets = [8, 192], sizes = [8, 32], strides = [1, 1]} : vector<16x384xbf16> to vector<8x32xbf16>
    %396 = vector.extract_strided_slice %284 {offsets = [8, 320], sizes = [8, 32], strides = [1, 1]} : vector<16x384xbf16> to vector<8x32xbf16>
    %cst_144 = arith.constant dense<0.000000e+00> : vector<8x8xf32>
    %397 = tpu.matmul %394, %395, %cst_144 {dimension_numbers = #tpu.dot_dimension_numbers<[1], [1], [0], [0], [0, 0, 1, 0], [], []>} : vector<8x32xbf16>, vector<8x32xbf16>, vector<8x8xf32> -> vector<8x8xf32>
    %cst_145 = arith.constant 0.176776692 : f32
    %398 = vector.broadcast %cst_145 : f32 to vector<8x8xf32>
    %399 = arith.mulf %397, %398 : vector<8x8xf32>
    %cst_146 = arith.constant dense<0xFF800000> : vector<8xf32>
    %400 = vector.multi_reduction <maximumf>, %399, %cst_146 [1] : vector<8x8xf32> to vector<8xf32>
    %401 = vector.shape_cast %400 : vector<8xf32> to vector<8x1xf32>
    %402 = vector.broadcast %401 : vector<8x1xf32> to vector<8x8xf32>
    %403 = arith.subf %399, %402 : vector<8x8xf32>
    %404 = math.exp %403 : vector<8x8xf32>
    %cst_147 = arith.constant dense<0.000000e+00> : vector<8xf32>
    %405 = vector.multi_reduction <add>, %404, %cst_147 [1] : vector<8x8xf32> to vector<8xf32>
    %406 = vector.shape_cast %405 : vector<8xf32> to vector<8x1xf32>
    %407 = tpu.reciprocal %406 {approx = true} : vector<8x1xf32> -> vector<8x1xf32>
    %408 = vector.broadcast %407 : vector<8x1xf32> to vector<8x8xf32>
    %409 = arith.mulf %404, %408 : vector<8x8xf32>
    %410 = arith.truncf %409 : vector<8x8xf32> to vector<8x8xbf16>
    %cst_148 = arith.constant dense<0.000000e+00> : vector<8x32xf32>
    %411 = tpu.matmul %410, %396, %cst_148 {dimension_numbers = #tpu.dot_dimension_numbers<[1], [0], [0], [1], [0, 0, 1, 1], [], []>} : vector<8x8xbf16>, vector<8x32xbf16>, vector<8x32xf32> -> vector<8x32xf32>
    %412 = vector.extract_strided_slice %284 {offsets = [8, 96], sizes = [8, 32], strides = [1, 1]} : vector<16x384xbf16> to vector<8x32xbf16>
    %413 = vector.extract_strided_slice %284 {offsets = [8, 224], sizes = [8, 32], strides = [1, 1]} : vector<16x384xbf16> to vector<8x32xbf16>
    %414 = vector.extract_strided_slice %284 {offsets = [8, 352], sizes = [8, 32], strides = [1, 1]} : vector<16x384xbf16> to vector<8x32xbf16>
    %cst_149 = arith.constant dense<0.000000e+00> : vector<8x8xf32>
    %415 = tpu.matmul %412, %413, %cst_149 {dimension_numbers = #tpu.dot_dimension_numbers<[1], [1], [0], [0], [0, 0, 1, 0], [], []>} : vector<8x32xbf16>, vector<8x32xbf16>, vector<8x8xf32> -> vector<8x8xf32>
    %cst_150 = arith.constant 0.176776692 : f32
    %416 = vector.broadcast %cst_150 : f32 to vector<8x8xf32>
    %417 = arith.mulf %415, %416 : vector<8x8xf32>
    %cst_151 = arith.constant dense<0xFF800000> : vector<8xf32>
    %418 = vector.multi_reduction <maximumf>, %417, %cst_151 [1] : vector<8x8xf32> to vector<8xf32>
    %419 = vector.shape_cast %418 : vector<8xf32> to vector<8x1xf32>
    %420 = vector.broadcast %419 : vector<8x1xf32> to vector<8x8xf32>
    %421 = arith.subf %417, %420 : vector<8x8xf32>
    %422 = math.exp %421 : vector<8x8xf32>
    %cst_152 = arith.constant dense<0.000000e+00> : vector<8xf32>
    %423 = vector.multi_reduction <add>, %422, %cst_152 [1] : vector<8x8xf32> to vector<8xf32>
    %424 = vector.shape_cast %423 : vector<8xf32> to vector<8x1xf32>
    %425 = tpu.reciprocal %424 {approx = true} : vector<8x1xf32> -> vector<8x1xf32>
    %426 = vector.broadcast %425 : vector<8x1xf32> to vector<8x8xf32>
    %427 = arith.mulf %422, %426 : vector<8x8xf32>
    %428 = arith.truncf %427 : vector<8x8xf32> to vector<8x8xbf16>
    %cst_153 = arith.constant dense<0.000000e+00> : vector<8x32xf32>
    %429 = tpu.matmul %428, %414, %cst_153 {dimension_numbers = #tpu.dot_dimension_numbers<[1], [0], [0], [1], [0, 0, 1, 1], [], []>} : vector<8x8xbf16>, vector<8x32xbf16>, vector<8x32xf32> -> vector<8x32xf32>
    %430 = tpu.concatenate %375, %393, %411, %429 in 1 : vector<8x32xf32>, vector<8x32xf32>, vector<8x32xf32>, vector<8x32xf32> -> vector<8x128xf32>
    %431 = tpu.concatenate %357, %430 in 0 : vector<8x128xf32>, vector<8x128xf32> -> vector<16x128xf32>
    %c1_154 = arith.constant 1 : index
    %c0_155 = arith.constant 0 : index
    %c0_156 = arith.constant 0 : index
    %432 = vector.load %arg8[%c1_154, %c0_155, %c0_156] : memref<2x128x128xbf16, #tpu.memory_space<vmem>>, vector<1x128x128xbf16>
    %433 = vector.shape_cast %432 : vector<1x128x128xbf16> to vector<128x128xbf16>
    %c1_157 = arith.constant 1 : index
    %c0_158 = arith.constant 0 : index
    %c0_159 = arith.constant 0 : index
    %434 = vector.load %arg9[%c1_157, %c0_158, %c0_159] : memref<2x1x128xf32, #tpu.memory_space<vmem>>, vector<1x1x128xf32>
    %435 = vector.shape_cast %434 : vector<1x1x128xf32> to vector<1x128xf32>
    %436 = arith.truncf %431 : vector<16x128xf32> to vector<16x128xbf16>
    %cst_160 = arith.constant dense<0.000000e+00> : vector<16x128xf32>
    %437 = tpu.matmul %436, %433, %cst_160 {dimension_numbers = #tpu.dot_dimension_numbers<[1], [0], [0], [1], [0, 0, 1, 1], [], []>} : vector<16x128xbf16>, vector<128x128xbf16>, vector<16x128xf32> -> vector<16x128xf32>
    %438 = vector.broadcast %435 : vector<1x128xf32> to vector<16x128xf32>
    %439 = arith.addf %437, %438 : vector<16x128xf32>
    %440 = arith.addf %275, %439 : vector<16x128xf32>
    %c1_161 = arith.constant 1 : index
    %c0_162 = arith.constant 0 : index
    %c0_163 = arith.constant 0 : index
    %441 = vector.load %arg10[%c1_161, %c0_162, %c0_163] : memref<2x1x128xf32, #tpu.memory_space<vmem>>, vector<1x1x128xf32>
    %442 = vector.shape_cast %441 : vector<1x1x128xf32> to vector<1x128xf32>
    %c1_164 = arith.constant 1 : index
    %c0_165 = arith.constant 0 : index
    %c0_166 = arith.constant 0 : index
    %443 = vector.load %arg11[%c1_164, %c0_165, %c0_166] : memref<2x1x128xf32, #tpu.memory_space<vmem>>, vector<1x1x128xf32>
    %444 = vector.shape_cast %443 : vector<1x1x128xf32> to vector<1x128xf32>
    %cst_167 = arith.constant dense<0.000000e+00> : vector<16xf32>
    %445 = vector.multi_reduction <add>, %440, %cst_167 [1] : vector<16x128xf32> to vector<16xf32>
    %446 = vector.shape_cast %445 : vector<16xf32> to vector<16x1xf32>
    %cst_168 = arith.constant 1.280000e+02 : f32
    %447 = vector.broadcast %cst_168 : f32 to vector<16x1xf32>
    %448 = arith.divf %446, %447 : vector<16x1xf32>
    %449 = vector.broadcast %448 : vector<16x1xf32> to vector<16x128xf32>
    %450 = arith.subf %440, %449 : vector<16x128xf32>
    %451 = arith.mulf %450, %450 : vector<16x128xf32>
    %cst_169 = arith.constant dense<0.000000e+00> : vector<16xf32>
    %452 = vector.multi_reduction <add>, %451, %cst_169 [1] : vector<16x128xf32> to vector<16xf32>
    %453 = vector.shape_cast %452 : vector<16xf32> to vector<16x1xf32>
    %cst_170 = arith.constant 1.280000e+02 : f32
    %454 = vector.broadcast %cst_170 : f32 to vector<16x1xf32>
    %455 = arith.divf %453, %454 : vector<16x1xf32>
    %cst_171 = arith.constant 9.99999996E-13 : f32
    %456 = vector.broadcast %cst_171 : f32 to vector<16x1xf32>
    %457 = arith.addf %455, %456 : vector<16x1xf32>
    %458 = math.rsqrt %457 : vector<16x1xf32>
    %459 = vector.broadcast %458 : vector<16x1xf32> to vector<16x128xf32>
    %460 = arith.mulf %450, %459 : vector<16x128xf32>
    %461 = vector.broadcast %442 : vector<1x128xf32> to vector<16x128xf32>
    %462 = arith.mulf %460, %461 : vector<16x128xf32>
    %463 = vector.broadcast %444 : vector<1x128xf32> to vector<16x128xf32>
    %464 = arith.addf %462, %463 : vector<16x128xf32>
    %c1_172 = arith.constant 1 : index
    %c0_173 = arith.constant 0 : index
    %c0_174 = arith.constant 0 : index
    %465 = vector.load %arg12[%c1_172, %c0_173, %c0_174] : memref<2x128x512xbf16, #tpu.memory_space<vmem>>, vector<1x128x512xbf16>
    %466 = vector.shape_cast %465 : vector<1x128x512xbf16> to vector<128x512xbf16>
    %c1_175 = arith.constant 1 : index
    %c0_176 = arith.constant 0 : index
    %c0_177 = arith.constant 0 : index
    %467 = vector.load %arg13[%c1_175, %c0_176, %c0_177] : memref<2x1x512xf32, #tpu.memory_space<vmem>>, vector<1x1x512xf32>
    %468 = vector.shape_cast %467 : vector<1x1x512xf32> to vector<1x512xf32>
    %469 = arith.truncf %464 : vector<16x128xf32> to vector<16x128xbf16>
    %cst_178 = arith.constant dense<0.000000e+00> : vector<16x512xf32>
    %470 = tpu.matmul %469, %466, %cst_178 {dimension_numbers = #tpu.dot_dimension_numbers<[1], [0], [0], [1], [0, 0, 1, 1], [], []>} : vector<16x128xbf16>, vector<128x512xbf16>, vector<16x512xf32> -> vector<16x512xf32>
    %471 = vector.broadcast %468 : vector<1x512xf32> to vector<16x512xf32>
    %472 = arith.addf %470, %471 : vector<16x512xf32>
    %cst_179 = arith.constant 5.000000e-01 : f32
    %473 = vector.broadcast %cst_179 : f32 to vector<16x512xf32>
    %474 = arith.mulf %473, %472 : vector<16x512xf32>
    %cst_180 = arith.constant 4.471500e-02 : f32
    %475 = vector.broadcast %cst_180 : f32 to vector<16x512xf32>
    %476 = arith.mulf %475, %472 : vector<16x512xf32>
    %477 = arith.mulf %476, %472 : vector<16x512xf32>
    %478 = arith.mulf %477, %472 : vector<16x512xf32>
    %479 = arith.addf %472, %478 : vector<16x512xf32>
    %cst_181 = arith.constant 0.797884583 : f32
    %480 = vector.broadcast %cst_181 : f32 to vector<16x512xf32>
    %481 = arith.mulf %480, %479 : vector<16x512xf32>
    %482 = math.tanh %481 : vector<16x512xf32>
    %cst_182 = arith.constant 1.000000e+00 : f32
    %483 = vector.broadcast %cst_182 : f32 to vector<16x512xf32>
    %484 = arith.addf %483, %482 : vector<16x512xf32>
    %485 = arith.mulf %474, %484 : vector<16x512xf32>
    %c1_183 = arith.constant 1 : index
    %c0_184 = arith.constant 0 : index
    %c0_185 = arith.constant 0 : index
    %486 = vector.load %arg14[%c1_183, %c0_184, %c0_185] : memref<2x512x128xbf16, #tpu.memory_space<vmem>>, vector<1x512x128xbf16>
    %487 = vector.shape_cast %486 : vector<1x512x128xbf16> to vector<512x128xbf16>
    %c1_186 = arith.constant 1 : index
    %c0_187 = arith.constant 0 : index
    %c0_188 = arith.constant 0 : index
    %488 = vector.load %arg15[%c1_186, %c0_187, %c0_188] : memref<2x1x128xf32, #tpu.memory_space<vmem>>, vector<1x1x128xf32>
    %489 = vector.shape_cast %488 : vector<1x1x128xf32> to vector<1x128xf32>
    %490 = arith.truncf %485 : vector<16x512xf32> to vector<16x512xbf16>
    %cst_189 = arith.constant dense<0.000000e+00> : vector<16x128xf32>
    %491 = tpu.matmul %490, %487, %cst_189 {dimension_numbers = #tpu.dot_dimension_numbers<[1], [0], [0], [1], [0, 0, 1, 1], [], []>} : vector<16x512xbf16>, vector<512x128xbf16>, vector<16x128xf32> -> vector<16x128xf32>
    %492 = vector.broadcast %489 : vector<1x128xf32> to vector<16x128xf32>
    %493 = arith.addf %491, %492 : vector<16x128xf32>
    %494 = arith.addf %464, %493 : vector<16x128xf32>
    %c1_190 = arith.constant 1 : index
    %c0_191 = arith.constant 0 : index
    %c0_192 = arith.constant 0 : index
    %495 = vector.load %arg16[%c1_190, %c0_191, %c0_192] : memref<2x1x128xf32, #tpu.memory_space<vmem>>, vector<1x1x128xf32>
    %496 = vector.shape_cast %495 : vector<1x1x128xf32> to vector<1x128xf32>
    %c1_193 = arith.constant 1 : index
    %c0_194 = arith.constant 0 : index
    %c0_195 = arith.constant 0 : index
    %497 = vector.load %arg17[%c1_193, %c0_194, %c0_195] : memref<2x1x128xf32, #tpu.memory_space<vmem>>, vector<1x1x128xf32>
    %498 = vector.shape_cast %497 : vector<1x1x128xf32> to vector<1x128xf32>
    %cst_196 = arith.constant dense<0.000000e+00> : vector<16xf32>
    %499 = vector.multi_reduction <add>, %494, %cst_196 [1] : vector<16x128xf32> to vector<16xf32>
    %500 = vector.shape_cast %499 : vector<16xf32> to vector<16x1xf32>
    %cst_197 = arith.constant 1.280000e+02 : f32
    %501 = vector.broadcast %cst_197 : f32 to vector<16x1xf32>
    %502 = arith.divf %500, %501 : vector<16x1xf32>
    %503 = vector.broadcast %502 : vector<16x1xf32> to vector<16x128xf32>
    %504 = arith.subf %494, %503 : vector<16x128xf32>
    %505 = arith.mulf %504, %504 : vector<16x128xf32>
    %cst_198 = arith.constant dense<0.000000e+00> : vector<16xf32>
    %506 = vector.multi_reduction <add>, %505, %cst_198 [1] : vector<16x128xf32> to vector<16xf32>
    %507 = vector.shape_cast %506 : vector<16xf32> to vector<16x1xf32>
    %cst_199 = arith.constant 1.280000e+02 : f32
    %508 = vector.broadcast %cst_199 : f32 to vector<16x1xf32>
    %509 = arith.divf %507, %508 : vector<16x1xf32>
    %cst_200 = arith.constant 9.99999996E-13 : f32
    %510 = vector.broadcast %cst_200 : f32 to vector<16x1xf32>
    %511 = arith.addf %509, %510 : vector<16x1xf32>
    %512 = math.rsqrt %511 : vector<16x1xf32>
    %513 = vector.broadcast %512 : vector<16x1xf32> to vector<16x128xf32>
    %514 = arith.mulf %504, %513 : vector<16x128xf32>
    %515 = vector.broadcast %496 : vector<1x128xf32> to vector<16x128xf32>
    %516 = arith.mulf %514, %515 : vector<16x128xf32>
    %517 = vector.broadcast %498 : vector<1x128xf32> to vector<16x128xf32>
    %518 = arith.addf %516, %517 : vector<16x128xf32>
    %c0_201 = arith.constant 0 : index
    %c0_202 = arith.constant 0 : index
    %519 = vector.load %arg18[%c0_201, %c0_202] : memref<128x384xbf16, #tpu.memory_space<vmem>>, vector<128x384xbf16>
    %c0_203 = arith.constant 0 : index
    %c0_204 = arith.constant 0 : index
    %520 = vector.load %arg19[%c0_203, %c0_204] : memref<1x384xf32, #tpu.memory_space<vmem>>, vector<1x384xf32>
    %521 = arith.truncf %518 : vector<16x128xf32> to vector<16x128xbf16>
    %cst_205 = arith.constant dense<0.000000e+00> : vector<16x384xf32>
    %522 = tpu.matmul %521, %519, %cst_205 {dimension_numbers = #tpu.dot_dimension_numbers<[1], [0], [0], [1], [0, 0, 1, 1], [], []>} : vector<16x128xbf16>, vector<128x384xbf16>, vector<16x384xf32> -> vector<16x384xf32>
    %523 = vector.broadcast %520 : vector<1x384xf32> to vector<16x384xf32>
    %524 = arith.addf %522, %523 : vector<16x384xf32>
    %c0_206 = arith.constant 0 : index
    %c0_207 = arith.constant 0 : index
    %525 = vector.load %arg20[%c0_206, %c0_207] : memref<16x384xf32, #tpu.memory_space<vmem>>, vector<16x384xf32>
    tpu.vector_store %arg20[%c0_206, %c0_207], %524 {strides = array<i32>} : memref<16x384xf32, #tpu.memory_space<vmem>>, vector<16x384xf32>,
    return
  }
  func.func @transform_0(%arg0: i32) -> (i32, i32) {
    %c0_i32 = arith.constant 0 : i32
    %c0_i32_0 = arith.constant 0 : i32
    return %arg0, %c0_i32 : i32, i32
  }
  func.func @transform_1(%arg0: i32) -> (i32, i32) {
    %c0_i32 = arith.constant 0 : i32
    %c0_i32_0 = arith.constant 0 : i32
    %c0_i32_1 = arith.constant 0 : i32
    return %c0_i32, %c0_i32_0 : i32, i32
  }
  func.func @transform_2(%arg0: i32) -> (i32, i32) {
    %c0_i32 = arith.constant 0 : i32
    %c0_i32_0 = arith.constant 0 : i32
    %c0_i32_1 = arith.constant 0 : i32
    return %c0_i32, %c0_i32_0 : i32, i32
  }
  func.func @transform_3(%arg0: i32) -> (i32, i32) {
    %c0_i32 = arith.constant 0 : i32
    %c0_i32_0 = arith.constant 0 : i32
    %c0_i32_1 = arith.constant 0 : i32
    return %c0_i32, %c0_i32_0 : i32, i32
  }
  func.func @transform_4(%arg0: i32) -> (i32, i32) {
    %c0_i32 = arith.constant 0 : i32
    %c0_i32_0 = arith.constant 0 : i32
    %c0_i32_1 = arith.constant 0 : i32
    return %c0_i32, %c0_i32_0 : i32, i32
  }
  func.func @transform_5(%arg0: i32) -> (i32, i32, i32) {
    %c0_i32 = arith.constant 0 : i32
    %c0_i32_0 = arith.constant 0 : i32
    %c0_i32_1 = arith.constant 0 : i32
    %c0_i32_2 = arith.constant 0 : i32
    return %c0_i32, %c0_i32_0, %c0_i32_1 : i32, i32, i32
  }
  func.func @transform_6(%arg0: i32) -> (i32, i32, i32) {
    %c0_i32 = arith.constant 0 : i32
    %c0_i32_0 = arith.constant 0 : i32
    %c0_i32_1 = arith.constant 0 : i32
    %c0_i32_2 = arith.constant 0 : i32
    return %c0_i32, %c0_i32_0, %c0_i32_1 : i32, i32, i32
  }
  func.func @transform_7(%arg0: i32) -> (i32, i32, i32) {
    %c0_i32 = arith.constant 0 : i32
    %c0_i32_0 = arith.constant 0 : i32
    %c0_i32_1 = arith.constant 0 : i32
    %c0_i32_2 = arith.constant 0 : i32
    return %c0_i32, %c0_i32_0, %c0_i32_1 : i32, i32, i32
  }
  func.func @transform_8(%arg0: i32) -> (i32, i32, i32) {
    %c0_i32 = arith.constant 0 : i32
    %c0_i32_0 = arith.constant 0 : i32
    %c0_i32_1 = arith.constant 0 : i32
    %c0_i32_2 = arith.constant 0 : i32
    return %c0_i32, %c0_i32_0, %c0_i32_1 : i32, i32, i32
  }
  func.func @transform_9(%arg0: i32) -> (i32, i32, i32) {
    %c0_i32 = arith.constant 0 : i32
    %c0_i32_0 = arith.constant 0 : i32
    %c0_i32_1 = arith.constant 0 : i32
    %c0_i32_2 = arith.constant 0 : i32
    return %c0_i32, %c0_i32_0, %c0_i32_1 : i32, i32, i32
  }
  func.func @transform_10(%arg0: i32) -> (i32, i32, i32) {
    %c0_i32 = arith.constant 0 : i32
    %c0_i32_0 = arith.constant 0 : i32
    %c0_i32_1 = arith.constant 0 : i32
    %c0_i32_2 = arith.constant 0 : i32
    return %c0_i32, %c0_i32_0, %c0_i32_1 : i32, i32, i32
  }
  func.func @transform_11(%arg0: i32) -> (i32, i32, i32) {
    %c0_i32 = arith.constant 0 : i32
    %c0_i32_0 = arith.constant 0 : i32
    %c0_i32_1 = arith.constant 0 : i32
    %c0_i32_2 = arith.constant 0 : i32
    return %c0_i32, %c0_i32_0, %c0_i32_1 : i32, i32, i32
  }
  func.func @transform_12(%arg0: i32) -> (i32, i32, i32) {
    %c0_i32 = arith.constant 0 : i32
    %c0_i32_0 = arith.constant 0 : i32
    %c0_i32_1 = arith.constant 0 : i32
    %c0_i32_2 = arith.constant 0 : i32
    return %c0_i32, %c0_i32_0, %c0_i32_1 : i32, i32, i32
  }
  func.func @transform_13(%arg0: i32) -> (i32, i32, i32) {
    %c0_i32 = arith.constant 0 : i32
    %c0_i32_0 = arith.constant 0 : i32
    %c0_i32_1 = arith.constant 0 : i32
    %c0_i32_2 = arith.constant 0 : i32
    return %c0_i32, %c0_i32_0, %c0_i32_1 : i32, i32, i32
  }
  func.func @transform_14(%arg0: i32) -> (i32, i32, i32) {
    %c0_i32 = arith.constant 0 : i32
    %c0_i32_0 = arith.constant 0 : i32
    %c0_i32_1 = arith.constant 0 : i32
    %c0_i32_2 = arith.constant 0 : i32
    return %c0_i32, %c0_i32_0, %c0_i32_1 : i32, i32, i32
  }
  func.func @transform_15(%arg0: i32) -> (i32, i32, i32) {
    %c0_i32 = arith.constant 0 : i32
    %c0_i32_0 = arith.constant 0 : i32
    %c0_i32_1 = arith.constant 0 : i32
    %c0_i32_2 = arith.constant 0 : i32
    return %c0_i32, %c0_i32_0, %c0_i32_1 : i32, i32, i32
  }
  func.func @transform_16(%arg0: i32) -> (i32, i32, i32) {
    %c0_i32 = arith.constant 0 : i32
    %c0_i32_0 = arith.constant 0 : i32
    %c0_i32_1 = arith.constant 0 : i32
    %c0_i32_2 = arith.constant 0 : i32
    return %c0_i32, %c0_i32_0, %c0_i32_1 : i32, i32, i32
  }
  func.func @transform_17(%arg0: i32) -> (i32, i32) {
    %c0_i32 = arith.constant 0 : i32
    %c0_i32_0 = arith.constant 0 : i32
    %c0_i32_1 = arith.constant 0 : i32
    return %c0_i32, %c0_i32_0 : i32, i32
  }
  func.func @transform_18(%arg0: i32) -> (i32, i32) {
    %c0_i32 = arith.constant 0 : i32
    %c0_i32_0 = arith.constant 0 : i32
    %c0_i32_1 = arith.constant 0 : i32
    return %c0_i32, %c0_i32_0 : i32, i32
  }
  func.func @transform_19(%arg0: i32) -> (i32, i32) {
    %c0_i32 = arith.constant 0 : i32
    %c0_i32_0 = arith.constant 0 : i32
    return %arg0, %c0_i32 : i32, i32
  }
}

</mosaic_0001>

<bundles_post_ra>
// kernel: net_forward.1
= control target key start
LH: loop header
LB: loop body
LE: loop exit
PB: predicated region body
PF: predicated region fallthrough
CT: control target
= control target key end

     0   :  { %s7136_s0 = inlined_call_operand.vmem [shape: s32[16,1], index: 0, kind: input, shape index: {}]   ;;  %s7137_s1 = inlined_call_operand.hbm [shape: f32[384,128], index: 1, kind: input, shape index: {}]   ;;  %s7138_s2 = inlined_call_operand.vmem [shape: f32[8,128], index: 2, kind: input, shape index: {}]   ;;  %s7139_s3 = inlined_call_operand.vmem [shape: f32[1,128], index: 3, kind: input, shape index: {}]   ;;  %s7140_s4 = inlined_call_operand.vmem [shape: f32[1,128], index: 4, kind: input, shape index: {}]   ;;  %s7141_s5 = inlined_call_operand.hbm [shape: bf16[2,128,384], index: 5, kind: input, shape index: {}]   ;;  %s7142_s6 = inlined_call_operand.vmem [shape: f32[2,1,384], index: 6, kind: input, shape index: {}]   ;;  %s7143_s7 = inlined_call_operand.hbm [shape: bf16[2,128,128], index: 7, kind: input, shape index: {}]   ;;  %s7144_s8 = inlined_call_operand.vmem [shape: f32[2,1,128], index: 8, kind: input, shape index: {}]   ;;  %s7145_s9 = inlined_call_operand.vmem [shape: f32[2,1,128], index: 9, kind: input, shape index: {}]   ;;  %s7146_s10 = inlined_call_operand.vmem [shape: f32[2,1,128], index: 10, kind: input, shape index: {}]   ;;  %s7147_s11 = inlined_call_operand.hbm [shape: bf16[2,128,512], index: 11, kind: input, shape index: {}]   ;;  %s7148_s12 = inlined_call_operand.vmem [shape: f32[2,1,512], index: 12, kind: input, shape index: {}]   ;;  %s7149_s13 = inlined_call_operand.hbm [shape: bf16[2,512,128], index: 13, kind: input, shape index: {}]   ;;  %s7150_s14 = inlined_call_operand.vmem [shape: f32[2,1,128], index: 14, kind: input, shape index: {}]   ;;  %s7151_s15 = inlined_call_operand.vmem [shape: f32[2,1,128], index: 15, kind: input, shape index: {}]   ;;  %s7152_s16 = inlined_call_operand.vmem [shape: f32[2,1,128], index: 16, kind: input, shape index: {}]   ;;  %s7153_s17 = inlined_call_operand.hbm [shape: bf16[128,384], index: 17, kind: input, shape index: {}]   ;;  %s7154_s18 = inlined_call_operand.vmem [shape: f32[1,384], index: 18, kind: input, shape index: {}]   ;;  %s7155_s19 = inlined_call_operand.hbm [shape: f32[16,384], index: 19, kind: output, shape index: {}]  }
   0x1   :  { %7158 = sst [smem:[#allocation19_spill]] %s7136_s0 }
   0x2   :  { %7159 = sst [smem:[#allocation20_spill]] %s7137_s1 }
   0x3   :  { %7160 = sst [smem:[#allocation21_spill]] %s7138_s2 }
   0x4   :  { %7161 = sst [smem:[#allocation22_spill]] %s7139_s3 }
   0x5   :  { %24 = vsyncpa [#allocation3], 0 }
   0x6   :  { %25 = vsyncpa [#allocation6], 0 }
   0x7   :  { %26 = vsyncpa [#allocation9], 0 }
   0x8   :  { %27 = vsyncpa [#allocation12], 0 }
   0x9   :  { %28 = vsyncpa [#allocation4], 0  ;;  %s6367_s0 = smov [#allocation5]  }
   0xa   :  { %s54_s30 = sshll.u32 %s6367_s0, 4  ;;  %s55_s30 = int_to_ptr.vmem [resolvable:$true] %s54_s30 }
   0xb   :  { %s6225_s20 = scalar_lea.vmem %s55_s30, 6144  ;;  %p6230_p1 = scmp.lt.s32.totalorder %s55_s30, %s55_s30 }
   0xc   :  { %p6226_p0 = scmp.ne.s32.totalorder %s55_s30, %s6225_s20  ;;  %p6231_p2 = scmp.lt.s32.totalorder %s6225_s20, %s6225_s20 }
   0xe   :  { %p6232_p3 = por %p6231_p2, %p6230_p1 }
  0x10   :  { %p6233_p4 = pnand %p6232_p3, %p6226_p0 }
  0x12   :  { %6236 = shalt.err (!%p6233_p4)
}
  0x13   :  { %s7157_s21 = smov 192   ;;  %s6369_s1 = smov 12  }
  0x14   :  { %60 = dma.hbm_to_vmem [thread:$0]  %s7141_s5, 6144, %s55_s30, [#allocation6], %s7157_s21, %s7157_s21, %s6369_s1  }
  0x15   :  { %s6370_s23 = smov [#allocation8]  }
  0x16   :  { %s86_s24 = sshll.u32 %s6370_s23, 4  ;;  %s87_s24 = int_to_ptr.vmem [resolvable:$true] %s86_s24 }
  0x17   :  { %s6245_s25 = scalar_lea.vmem %s87_s24, 8192  ;;  %p6250_p6 = scmp.lt.s32.totalorder %s87_s24, %s87_s24 }
  0x18   :  { %p6246_p5 = scmp.ne.s32.totalorder %s87_s24, %s6245_s25  ;;  %p6251_p7 = scmp.lt.s32.totalorder %s6245_s25, %s6245_s25 }
  0x1a   :  { %p6252_p8 = por %p6251_p7, %p6250_p6 }
  0x1c   :  { %p6253_p9 = pnand %p6252_p8, %p6246_p5 }
  0x1e   :  { %6256 = shalt.err (!%p6253_p9)
}
  0x1f   :  { %s6371_s3 = smov 256   ;;  %s6372_s26 = smov 16  }
  0x20   :  { %92 = dma.hbm_to_vmem [thread:$0]  %s7147_s11, 8192, %s87_s24, [#allocation9], %s6371_s3, %s6371_s3, %s6372_s26  }
  0x21   :  { %s6373_s29 = smov [#allocation2]  }
  0x22   :  { %s36_s0 = sshll.u32 %s6373_s29, 4  ;;  %s37_s0 = int_to_ptr.vmem [resolvable:$true] %s36_s0 }
  0x23   :  { %s6265_s5 = scalar_lea.vmem %s37_s0, 6144  ;;  %p6270_p11 = scmp.lt.s32.totalorder %s37_s0, %s37_s0 }
  0x24   :  { %p6266_p10 = scmp.ne.s32.totalorder %s37_s0, %s6265_s5  ;;  %p6271_p12 = scmp.lt.s32.totalorder %s6265_s5, %s6265_s5 }
  0x26   :  { %p6272_p13 = por %p6271_p12, %p6270_p11 }
  0x28   :  { %p6273_p0 = pnand %p6272_p13, %p6266_p10 }
  0x2a   :  { %6276 = shalt.err (!%p6273_p0)
}
  0x2b   :  { %s6374_s30 = smov 128   ;;  %s6375_s20 = smov 8  }
  0x2c   :  { %s7162_s23 = sld [smem:[#allocation20_spill]]  ;;  %s6376_s25 = smov [#allocation7]  }
  0x2d   :  { %s68_s21 = sshll.u32 %s6376_s25, 4  ;;  %s69_s21 = int_to_ptr.vmem [resolvable:$true] %s68_s21 }
  0x2e   :  { %s6285_s11 = scalar_lea.vmem %s69_s21, 2048  ;;  %p6290_p2 = scmp.lt.s32.totalorder %s69_s21, %s69_s21 }
  0x2f   :  { %p6286_p1 = scmp.ne.s32.totalorder %s69_s21, %s6285_s11  ;;  %p6291_p3 = scmp.lt.s32.totalorder %s6285_s11, %s6285_s11 }
  0x31   :  { %p6292_p4 = por %p6291_p3, %p6290_p2 }
  0x32   :  { %42 = dma.hbm_to_vmem [thread:$0]  %s7162_s23, 6144, %s37_s0, [#allocation3], %s6374_s30, %s6374_s30, %s6375_s20  }
  0x33   :  { %p6293_p5 = pnand %p6292_p4, %p6286_p1 }
  0x35   :  { %6296 = shalt.err (!%p6293_p5)
}
  0x36   :  { %s6377_s24 = smov 64   ;;  %s6378_s3 = smov 4  }
  0x37   :  { %74 = dma.hbm_to_vmem [thread:$0]  %s7143_s7, 2048, %s69_s21, [#allocation6], %s6377_s24, %s6377_s24, %s6378_s3  }
  0x38   :  { %s6379_s28 = smov [#allocation10]   ;;  %s6380_s0 = smov [#allocation11]  }
  0x39   :  { %s100_s29 = sshll.u32 %s6379_s28, 4  ;;  %s118_s5 = sshll.u32 %s6380_s0, 4  ;;  %s101_s29 = int_to_ptr.vmem [resolvable:$true] %s100_s29  ;;  %s119_s5 = int_to_ptr.vmem [resolvable:$true] %s118_s5 }
  0x3a   :  { %s6305_s30 = scalar_lea.vmem %s101_s29, 8192  ;;  %p6310_p7 = scmp.lt.s32.totalorder %s101_s29, %s101_s29 }
  0x3b   :  { %p6306_p6 = scmp.ne.s32.totalorder %s101_s29, %s6305_s30  ;;  %p6311_p8 = scmp.lt.s32.totalorder %s6305_s30, %s6305_s30 }
  0x3d   :  { %p6312_p9 = por %p6311_p8, %p6310_p7 }
  0x3f   :  { %p6313_p10 = pnand %p6312_p9, %p6306_p6 }
  0x41   :  { %6316 = shalt.err (!%p6313_p10)
}
  0x42   :  { %106 = dma.hbm_to_vmem [thread:$0]  %s7149_s13, 8192, %s101_s29, [#allocation9], %s6377_s24, %s6377_s24, %s6378_s3  }
  0x43   :  { %s6325_s7 = scalar_lea.vmem %s119_s5, 3072  ;;  %p6330_p12 = scmp.lt.s32.totalorder %s119_s5, %s119_s5 }
  0x44   :  { %p6326_p11 = scmp.ne.s32.totalorder %s119_s5, %s6325_s7  ;;  %p6331_p13 = scmp.lt.s32.totalorder %s6325_s7, %s6325_s7 }
  0x46   :  { %p6332_p0 = por %p6331_p13, %p6330_p12 }
  0x48   :  { %p6333_p1 = pnand %p6332_p0, %p6326_p11 }
  0x4a   :  { %6336 = shalt.err (!%p6333_p1)
}
  0x4b   :  { %s7163_s21 = smov 192  }
  0x4c   :  { %124 = dma.hbm_to_vmem [thread:$0]  %s7153_s17, 3072, %s119_s5, [#allocation12], %s7163_s21, %s7163_s21, %s6369_s1  }
  0x4d   :  { %6357 = dma.done.wait [#allocation3], 6144  }
  0x4e   :  { %6358 = vsyncadd [#allocation3], 4294961152 }
  0x4f   :  { %6359 = dma.done.wait [#allocation6], 8192  }
  0x50   :  { %6360 = vsyncadd [#allocation6], 4294959104 }
  0x51   :  { %6361 = dma.done.wait [#allocation9], 16384  }
  0x52   :  { %6362 = vsyncadd [#allocation9], 4294950912 }
  0x53   :  { %6363 = dma.done.wait [#allocation12], 3072  }
  0x54   :  { %6364 = vsyncadd [#allocation12], 4294964224  ;;  %v6381_v0 = vmov 0   ;;  %s7164_s11 = sld [smem:[#allocation19_spill]]  ;;  %v207_v2 = vld [vmem:[#allocation2 + $0xf8] sm:$0xff]  ;;  %v206_v4 = vld [vmem:[#allocation2 + $0xf0] sm:$0xff]  ;;  %v148_v51 = vlaneseq }
  0x55   :  { %5798 = vset.pattern.permute.xlu0 %v6381_v0  ;;  %5195 = vmatprep.subr.mxu0 %v207_v2  ;;  %v191_v3 = vld [vmem:[#allocation2 + $0x78] sm:$0xff]  ;;  %v190_v5 = vld [vmem:[#allocation2 + $0x70] sm:$0xff]  ;;  %v205_v8 = vld [vmem:[#allocation2 + $0xe8] sm:$0xff]  ;;  %v6382_v56 = vmov 1.0   ;;  %s7165_s27 = sld [smem:[#allocation21_spill]]  ;;  %vm6384_vm6 = vmmov 0  }
  0x56   :  { %5196 = vmatpush3.msra.mxu0 %v191_v3  ;;  %v223_v7 = vld [vmem:[#allocation2 + $0x178] sm:$0xff]  ;;  %v189_v9 = vld [vmem:[#allocation2 + $0x68] sm:$0xff]  ;;  %v222_v10 = vld [vmem:[#allocation2 + $0x170] sm:$0xff]  ;;  %v149_v52 = vand.u32 127, %v148_v51  ;;  %s7166_s0 = sld [smem:[#allocation22_spill]]  ;;  %vm681_vm7 = vcmask 261120  }
  0x57   :  { %5197 = vmatprep.subr.mxu0 %v206_v4  ;;  %5448 = vmatprep.subr.mxu1 %v223_v7  ;;  %v204_v11 = vld [vmem:[#allocation2 + $0xe0] sm:$0xff]  ;;  %v221_v13 = vld [vmem:[#allocation2 + $0x168] sm:$0xff]  ;;  %v203_v14 = vld [vmem:[#allocation2 + $0xd8] sm:$0xff]  ;;  %vm745_vm8 = vcmask 1043456   ;;  %s6385_s22 = smov 32   ;;  %vm729_vm9 = vcmask 64512  }
  0x58   :  { %5198 = vmatpush3.msra.mxu0 %v190_v5  ;;  %5449 = vmatpush3.msra.mxu1 %v223_v7  ;;  %v188_v12 = vld [vmem:[#allocation2 + $0x60] sm:$0xff]  ;;  %v187_v15 = vld [vmem:[#allocation2 + $0x58] sm:$0xff]  ;;  %v202_v17 = vld [vmem:[#allocation2 + $0xd0] sm:$0xff]  ;;  %v150_v53 = vadd.s32 128, %v149_v52  ;;  %v151_v54 = vadd.s32 256, %v149_v52  ;;  %s6386_s7 = smov 96  }
  0x59   :  { %5199 = vmatprep.subr.mxu0 %v205_v8  ;;  %5450 = vmatprep.subr.mxu1 %v222_v10  ;;  %v220_v16 = vld [vmem:[#allocation2 + $0x160] sm:$0xff]  ;;  %v186_v18 = vld [vmem:[#allocation2 + $0x50] sm:$0xff]  ;;  %v219_v19 = vld [vmem:[#allocation2 + $0x158] sm:$0xff]  ;;  %vm1138_vm10 = vcmask 523264   ;;  %vm1140_vm11 = vcmask 785408  }
  0x5a   :  { %v146_v1 = vld [vmem:[%s7164_s11] sm:$0xff]  ;;  %v147_v6 = vld [vmem:[%s7164_s11 + $0x8] sm:$0xff]  ;;  %5200 = vmatpush3.msra.mxu0 %v189_v9  ;;  %5451 = vmatpush3.msra.mxu1 %v222_v10  ;;  %v218_v22 = vld [vmem:[#allocation2 + $0x150] sm:$0xff]  ;;  %v6383_v10 = vmov 0.0  }
  0x5b   :  { %153 = vperm.xlu0 %5798, %v146_v1   ;;  %5201 = vmatprep.subr.mxu0 %v204_v11  ;;  %v201_v20 = vld [vmem:[#allocation2 + $0xc8] sm:$0xff]  ;;  %v200_v23 = vld [vmem:[#allocation2 + $0xc0] sm:$0xff]  ;;  %v199_v26 = vld [vmem:[#allocation2 + $0xb8] sm:$0xff] }
  0x5c   :  { %5202 = vmatpush3.msra.mxu0 %v188_v12  ;;  %5452 = vmatprep.subr.mxu1 %v221_v13  ;;  %v185_v21 = vld [vmem:[#allocation2 + $0x48] sm:$0xff]  ;;  %v184_v24 = vld [vmem:[#allocation2 + $0x40] sm:$0xff]  ;;  %v183_v27 = vld [vmem:[#allocation2 + $0x38] sm:$0xff] }
  0x5d   :  { %5203 = vmatprep.subr.mxu0 %v203_v14  ;;  %5453 = vmatpush3.msra.mxu1 %v221_v13  ;;  %v217_v25 = vld [vmem:[#allocation2 + $0x148] sm:$0xff]  ;;  %v216_v28 = vld [vmem:[#allocation2 + $0x140] sm:$0xff]  ;;  %v198_v29 = vld [vmem:[#allocation2 + $0xb0] sm:$0xff] }
  0x5e   :  { %5204 = vmatpush3.msra.mxu0 %v187_v15  ;;  %5454 = vmatprep.subr.mxu1 %v220_v16  ;;  %v182_v30 = vld [vmem:[#allocation2 + $0x30] sm:$0xff]  ;;  %v215_v31 = vld [vmem:[#allocation2 + $0x138] sm:$0xff]  ;;  %v197_v32 = vld [vmem:[#allocation2 + $0xa8] sm:$0xff] }
  0x5f   :  { %156 = vperm.xlu0 %5798, %v147_v6   ;;  %5205 = vmatprep.subr.mxu0 %v202_v17  ;;  %v181_v33 = vld [vmem:[#allocation2 + $0x28] sm:$0xff]  ;;  %v214_v34 = vld [vmem:[#allocation2 + $0x130] sm:$0xff]  ;;  %v196_v35 = vld [vmem:[#allocation2 + $0xa0] sm:$0xff] }
  0x60   :  { %5455 = vmatpush3.msra.mxu1 %v220_v16  ;;  %5206 = vmatpush3.msra.mxu0 %v186_v18  ;;  %v180_v36 = vld [vmem:[#allocation2 + $0x20] sm:$0xff]  ;;  %v213_v37 = vld [vmem:[#allocation2 + $0x128] sm:$0xff]  ;;  %v195_v38 = vld [vmem:[#allocation2 + $0x98] sm:$0xff] }
  0x61   :  { %5456 = vmatprep.subr.mxu1 %v219_v19  ;;  %5207 = vmatprep.subr.mxu0 %v201_v20  ;;  %v179_v39 = vld [vmem:[#allocation2 + $0x18] sm:$0xff]  ;;  %v212_v40 = vld [vmem:[#allocation2 + $0x120] sm:$0xff]  ;;  %v194_v41 = vld [vmem:[#allocation2 + $0x90] sm:$0xff] }
  0x62   :  { %5457 = vmatpush3.msra.mxu1 %v219_v19  ;;  %5208 = vmatpush3.msra.mxu0 %v185_v21  ;;  %v178_v42 = vld [vmem:[#allocation2 + $0x10] sm:$0xff]  ;;  %v211_v43 = vld [vmem:[#allocation2 + $0x118] sm:$0xff]  ;;  %v193_v44 = vld [vmem:[#allocation2 + $0x88] sm:$0xff] }
  0x63   :  { %5458 = vmatprep.subr.mxu1 %v218_v22  ;;  %5209 = vmatprep.subr.mxu0 %v200_v23  ;;  %v177_v45 = vld [vmem:[#allocation2 + $0x8] sm:$0xff]  ;;  %v210_v46 = vld [vmem:[#allocation2 + $0x110] sm:$0xff]  ;;  %v192_v47 = vld [vmem:[#allocation2 + $0x80] sm:$0xff] }
  0x64   :  { %5459 = vmatpush3.msra.mxu1 %v218_v22  ;;  %5210 = vmatpush3.msra.mxu0 %v184_v24  ;;  %v176_v48 = vld [vmem:[#allocation2] sm:$0xff]  ;;  %v209_v49 = vld [vmem:[#allocation2 + $0x108] sm:$0xff]  ;;  %v5832_v11 = vld [vmem:[#allocation5 + $0xb0] ss:$12 sps:$4 sm:$0xff]  }
  0x65   :  { %5460 = vmatprep.subr.mxu1 %v217_v25  ;;  %5211 = vmatprep.subr.mxu0 %v199_v26  ;;  %v208_v50 = vld [vmem:[#allocation2 + $0x100] sm:$0xff]  ;;  %v5829_v8 = vld [vmem:[#allocation5 + $0xa8] ss:$12 sps:$4 sm:$0xff]   ;;  %v5831_v9 = vld [vmem:[#allocation5 + $0xac] ss:$12 sps:$4 sm:$0xff]  }
  0x66   :  { %5461 = vmatpush3.msra.mxu1 %v217_v25  ;;  %5212 = vmatpush3.msra.mxu0 %v183_v27  ;;  %v224_v60 = vld [vmem:[%s7165_s27] sm:$0xff]  ;;  %v5833_v21 = vld [vmem:[#allocation5 + $0x90] ss:$12 sps:$4 sm:$0xff]  }
  0x67   :  { %5462 = vmatprep.subr.mxu1 %v216_v28  ;;  %5213 = vmatprep.subr.mxu0 %v198_v29  ;;  %v5835_v20 = vld [vmem:[#allocation5 + $0x94] ss:$12 sps:$4 sm:$0xff]   ;;  %v5836_v22 = vld [vmem:[#allocation5 + $0x98] ss:$12 sps:$4 sm:$0xff]   ;;  %v5839_v23 = vld [vmem:[#allocation5 + $0x7c] ss:$12 sps:$4 sm:$0xff]  }
  0x68   :  { %5463 = vmatpush3.msra.mxu1 %v216_v28  ;;  %5214 = vmatpush3.msra.mxu0 %v182_v30  ;;  %v5837_v24 = vld [vmem:[#allocation5 + $0x78] ss:$12 sps:$4 sm:$0xff]   ;;  %v5840_v25 = vld [vmem:[#allocation5 + $0x80] ss:$12 sps:$4 sm:$0xff]   ;;  %v5844_v28 = vld [vmem:[#allocation5 + $0x68] ss:$12 sps:$4 sm:$0xff]  }
  0x69   :  { %5464 = vmatprep.subr.mxu1 %v215_v31  ;;  %5215 = vmatprep.subr.mxu0 %v197_v32  ;;  %v5843_v26 = vld [vmem:[#allocation5 + $0x64] ss:$12 sps:$4 sm:$0xff]   ;;  %v5841_v27 = vld [vmem:[#allocation5 + $0x60] ss:$12 sps:$4 sm:$0xff]   ;;  %v5845_v30 = vld [vmem:[#allocation5 + $0x48] ss:$12 sps:$4 sm:$0xff]  }
  0x6a   :  { %5465 = vmatpush3.msra.mxu1 %v215_v31  ;;  %5216 = vmatpush3.msra.mxu0 %v181_v33  ;;  %v5847_v29 = vld [vmem:[#allocation5 + $0x4c] ss:$12 sps:$4 sm:$0xff]   ;;  %v5848_v31 = vld [vmem:[#allocation5 + $0x50] ss:$12 sps:$4 sm:$0xff]   ;;  %v5851_v32 = vld [vmem:[#allocation5 + $0x34] ss:$12 sps:$4 sm:$0xff]  }
  0x6b   :  { %5466 = vmatprep.subr.mxu1 %v214_v34  ;;  %5217 = vmatprep.subr.mxu0 %v196_v35  ;;  %v5849_v33 = vld [vmem:[#allocation5 + $0x30] ss:$12 sps:$4 sm:$0xff]  }
  0x6c   :  { %5467 = vmatpush3.msra.mxu1 %v214_v34  ;;  %5218 = vmatpush3.msra.mxu0 %v180_v36  ;;  %v5852_v34 = vld [vmem:[#allocation5 + $0x38] ss:$12 sps:$4 sm:$0xff]   ;;  %v5855_v35 = vld [vmem:[#allocation5 + $0x1c] ss:$12 sps:$4 sm:$0xff]  }
  0x6d   :  { %5468 = vmatprep.subr.mxu1 %v213_v37  ;;  %5219 = vmatprep.subr.mxu0 %v195_v38  ;;  %v5853_v36 = vld [vmem:[#allocation5 + $0x18] ss:$12 sps:$4 sm:$0xff]  }
  0x6e   :  { %5469 = vmatpush3.msra.mxu1 %v213_v37  ;;  %5220 = vmatpush3.msra.mxu0 %v179_v39  ;;  %v5856_v37 = vld [vmem:[#allocation5 + $0x20] ss:$12 sps:$4 sm:$0xff]   ;;  %v5859_v38 = vld [vmem:[#allocation5 + $0x4] ss:$12 sps:$4 sm:$0xff]  }
  0x6f   :  { %5470 = vmatprep.subr.mxu1 %v212_v40  ;;  %5221 = vmatprep.subr.mxu0 %v194_v41  ;;  %v5857_v39 = vld [vmem:[#allocation5] ss:$12 sps:$4 sm:$0xff]  }
  0x70   :  { %5471 = vmatpush3.msra.mxu1 %v212_v40  ;;  %5222 = vmatpush3.msra.mxu0 %v178_v42  ;;  %v5860_v40 = vld [vmem:[#allocation5 + $0x8] ss:$12 sps:$4 sm:$0xff]  }
  0x71   :  { %5472 = vmatprep.subr.mxu1 %v211_v43  ;;  %5223 = vmatprep.subr.mxu0 %v193_v44 }
  0x72   :  { %5473 = vmatpush3.msra.mxu1 %v211_v43  ;;  %5224 = vmatpush3.msra.mxu0 %v177_v45 }
  0x73   :  { %5474 = vmatprep.subr.mxu1 %v210_v46  ;;  %5225 = vmatprep.subr.mxu0 %v192_v47 }
  0x74   :  { %5475 = vmatpush3.msra.mxu1 %v210_v46  ;;  %5226 = vmatpush3.msra.mxu0 %v176_v48 }
  0x75   :  { %5476 = vmatprep.subr.mxu1 %v209_v49  ;;  %594 = vmatprep.subr.bf16.mxu0 %v5831_v9 }
  0x76   :  { %5477 = vmatpush3.msra.mxu1 %v209_v49  ;;  %v4925_v49 = vld [vmem:[%s7166_s0] ss:$0 sm:$0xff] }
  0x77   :  { %5478 = vmatprep.subr.mxu1 %v208_v50 }
  0x78   :  { %5479 = vmatpush3.msra.mxu1 %v208_v50 }
  0x79   :  { %5483 = vmatprep.subr.bf16.mxu1 %v6383_v10 }
  0xd6   :  { %v154_v55 = vpop.permute.xlu0 %153 }
  0xd7   :  { %vm159_vm0 = vcmp.eq.s32.totalorder %v150_v53, %v154_v55  ;;  %vm160_vm1 = vcmp.eq.s32.totalorder %v151_v54, %v154_v55  ;;  %vm158_vm2 = vcmp.eq.s32.totalorder %v149_v52, %v154_v55 }
  0xd8   :  { %4919 = vmatprep.mubr.msk.f32.mxu0 %vm159_vm0, %v6382_v56  ;;  %5480 = vmatprep.mubr.msk.f32.mxu1 %vm160_vm1, %v6382_v56 }
  0xd9   :  { %4920 = vmatmul.mubr.msk.f32.vlgmr.msra.gmra.mxu0 %vm158_vm2, %v6382_v56 }
  0xda   :  { %v157_v57 = vpop.permute.xlu0 %156  ;;  %595 = vmatpush1.bf16.msra.mxu0 %v5829_v8 }
  0xdb   :  { %vm162_vm3 = vcmp.eq.s32.totalorder %v150_v53, %v157_v57  ;;  %vm163_vm4 = vcmp.eq.s32.totalorder %v151_v54, %v157_v57  ;;  %vm161_vm5 = vcmp.eq.s32.totalorder %v149_v52, %v157_v57  ;;  %596 = vmatprep.subr.bf16.mxu0 %v5835_v20  ;;  %v4926_v54 = vld [vmem:[%s7140_s4] ss:$0 sm:$0xff] }
  0xdc   :  { %4921 = vmatprep.mubr.msk.f32.mxu0 %vm162_vm3, %v6382_v56  ;;  %5481 = vmatmul.mubr.msk.f32.vlgmr.msra.gmra.mxu1 %vm163_vm4, %v6382_v56 }
  0xdd   :  { %4922 = vmatmul.mubr.msk.f32.gmra.mxu0 %vm161_vm5, %v6382_v56  ;;  %5484 = vmatpush3.bf16.msra.mxu1 %v5832_v11 }
  0xde   :  { %626 = vmatprep.mubr.bf16.mxu0 %v6381_v0  ;;  %5485 = vmatprep.subr.bf16.mxu1 %v6383_v10 }
  0xdf   :  { %597 = vmatpush1.bf16.msra.mxu0 %v5833_v21  ;;  %5499 = vmatprep.mubr.msk.bf16.mxu1 %vm6384_vm6, %v6383_v10 }
  0xe0   :  { %598 = vmatprep.subr.bf16.mxu0 %v5839_v23 }
  0xe1   :  { %5486 = vmatpush3.bf16.msra.mxu1 %v5836_v22 }
  0xe2   :  { %5487 = vmatprep.subr.bf16.mxu1 %v6383_v10 }
  0xe3   :  { %599 = vmatpush1.bf16.msra.mxu0 %v5837_v24 }
  0xe4   :  { %600 = vmatprep.subr.bf16.mxu0 %v5843_v26 }
  0xe5   :  { %5488 = vmatpush3.bf16.msra.mxu1 %v5840_v25 }
  0xe6   :  { %5489 = vmatprep.subr.bf16.mxu1 %v6383_v10 }
  0xe7   :  { %601 = vmatpush1.bf16.msra.mxu0 %v5841_v27 }
  0xe8   :  { %602 = vmatprep.subr.bf16.mxu0 %v5847_v29 }
  0xe9   :  { %5490 = vmatpush3.bf16.msra.mxu1 %v5844_v28 }
  0xea   :  { %5491 = vmatprep.subr.bf16.mxu1 %v6383_v10 }
  0xeb   :  { %603 = vmatpush1.bf16.msra.mxu0 %v5845_v30 }
  0xec   :  { %604 = vmatprep.subr.bf16.mxu0 %v5851_v32 }
  0xed   :  { %5492 = vmatpush3.bf16.msra.mxu1 %v5848_v31 }
  0xee   :  { %5493 = vmatprep.subr.bf16.mxu1 %v6383_v10 }
  0xef   :  { %605 = vmatpush1.bf16.msra.mxu0 %v5849_v33 }
  0xf0   :  { %606 = vmatprep.subr.bf16.mxu0 %v5855_v35 }
  0xf1   :  { %5494 = vmatpush3.bf16.msra.mxu1 %v5852_v34 }
  0xf2   :  { %5495 = vmatprep.subr.bf16.mxu1 %v6383_v10 }
  0xf3   :  { %607 = vmatpush1.bf16.msra.mxu0 %v5853_v36 }
  0xf4   :  { %608 = vmatprep.subr.bf16.mxu0 %v5859_v38 }
  0xf5   :  { %5496 = vmatpush3.bf16.msra.mxu1 %v5856_v37 }
  0xf6   :  { %5497 = vmatprep.subr.bf16.mxu1 %v6383_v10 }
  0xf7   :  { %609 = vmatpush1.bf16.msra.mxu0 %v5857_v39 }
  0xf8   :  { %5527 = vmatprep.subr.bf16.mxu0 %v6383_v10 }
  0xf9   :  { %5498 = vmatpush3.bf16.msra.mxu1 %v5860_v40 }
  0xfa   :  { %5503 = vmatprep.subr.bf16.mxu1 %v6383_v10 }
 0x199   :  { %v5227_v58 = vpop.f32.mrf.mxu0 }
 0x19b   :  { %v5228_v59 = vpop.f32.mrf.mxu0 }
 0x19c   :  { %v5229_v61 = vadd.f32 %v5228_v59, %v5227_v58  ;;  %v5482_v62 = vpop.f32.mrf.mxu1  ;;  %v6569_v59 = vshrl.u32 %v148_v51, 7 }
 0x19d   :  { %v5230_v63 = vpop.f32.mrf.mxu0 }
 0x19e   :  { %v292_v1 = vadd.f32 %v5229_v61, %v224_v60  ;;  %v366_v2 = vpop.f32.mrf.mxu1  ;;  %v6582_v8 = vsub.s32 0, %v6569_v59 }
 0x19f   :  { %v5231_v3 = vpop.f32.mrf.mxu0 }
 0x1a0   :  { %v367_v4 = vadd.f32 %v366_v2, %v292_v1  ;;  %v5232_v5 = vadd.f32 %v5231_v3, %v5230_v63  ;;  %v448_v63 = vld [vmem:[%s7142_s6] sm:$0x7] }
 0x1a2   :  { %v297_v6 = vadd.f32 %v5232_v5, %v224_v60  ;;  %377 = vadd.xlane.f32.xlu1 %v367_v4  ;;  %v6572_v60 = vsub.s32 1, %v6569_v59 }
 0x1a4   :  { %v372_v7 = vadd.f32 %v5482_v62, %v297_v6  ;;  %v458_v3 = vrot.slane %v448_v63, %v6572_v60  ;;  %v6579_v6 = vsub.s32 2, %v6569_v59 }
 0x1a6   :  { %379 = vadd.xlane.f32.xlu1 %v372_v7 }
 0x22b   :  { %v378_v12 = vpop.xlane.xlu1 %377 }
 0x22c   :  { %v382_v13 = vmul.f32 0.0078125, %v378_v12  ;;  %v462_v12 = vrot.slane %v448_v63, %v6579_v6 }
 0x22e   :  { %v6532_v14 = vsub.f32 %v367_v4, %v382_v13 }
 0x22f   :  { %v380_v15 = vpop.xlane.xlu1 %379 }
 0x230   :  { %v383_v16 = vmul.f32 0.0078125, %v380_v15  ;;  %v386_v17 = vmul.f32 %v6532_v14, %v6532_v14 }
 0x232   :  { %388 = vadd.xlane.f32.xlu0 %v386_v17  ;;  %v6536_v18 = vsub.f32 %v372_v7, %v383_v16 }
 0x234   :  { %v387_v19 = vmul.f32 %v6536_v18, %v6536_v18 }
 0x236   :  { %390 = vadd.xlane.f32.xlu1 %v387_v19 }
 0x2bb   :  { %v389_v41 = vpop.xlane.xlu0 %388 }
 0x2bc   :  { %v392_v42 = vmul.f32 0.0078125, %v389_v41 }
 0x2be   :  { %v394_v43 = vadd.f32 1e-12, %v392_v42 }
 0x2bf   :  { %v391_v44 = vpop.xlane.xlu1 %390 }
 0x2c0   :  { %6101 = vrsqrt.f32 %v394_v43  ;;  %v393_v45 = vmul.f32 0.0078125, %v391_v44 }
 0x2c2   :  { %v395_v46 = vadd.f32 1e-12, %v393_v45 }
 0x2c4   :  { %6103 = vrsqrt.f32 %v395_v46 }
 0x2cd   :  { %v6102_v47 = vpop.eup %6101 }
 0x2ce   :  { %v398_v48 = vmul.f32 %v6102_v47, %v6532_v14  ;;  %v454_v14 = vrot.slane %v448_v63, %v6582_v8 }
 0x2d0   :  { %v406_v53 = vmul.f32 %v4925_v49, %v398_v48 }
 0x2d1   :  { %v6104_v50 = vpop.eup %6103 }
 0x2d2   :  { %v399_v52 = vmul.f32 %v6104_v50, %v6536_v18  ;;  %v6558_v56 = vadd.f32 %v4926_v54, %v406_v53 }
 0x2d4   :  { %v407_v55 = vmul.f32 %v4925_v49, %v399_v52 }
 0x2d6   :  { %v6560_v57 = vadd.f32 %v4926_v54, %v407_v55 }
 0x2d8   :  { %v449_v58 = vpack.c.bf16 %v6560_v57, %v6558_v56 }
 0x2da   :  { %627 = vmatmul.mubr.bf16.vlgmr.msra.gmra.mxu0 %v449_v58  ;;  %5500 = vmatmul.mubr.bf16.vlgmr.msra.gmra.mxu1 %v449_v58 }
 0x2db   :  { %5505 = vmatprep.mubr.msk.bf16.mxu1 %vm6384_vm6, %v6383_v10  ;;  %5529 = vmatprep.mubr.msk.bf16.mxu0 %vm6384_vm6, %v6383_v10 }
 0x39a   :  { %v628_v61 = vpop.f32.mrf.mxu0  ;;  %v671_v62 = vpop.f32.mrf.mxu1 }
 0x39b   :  { %v672_v17 = vadd.f32 %v671_v62, %v462_v12  ;;  %v629_v20 = vadd.f32 %v628_v61, %v454_v14 }
 0x39c   :  { %v630_v1 = vpop.f32.mrf.mxu0  ;;  %v5501_v2 = vpop.f32.mrf.mxu1 }
 0x39d   :  { %v631_v9 = vadd.f32 %v630_v1, %v458_v3 }
 0x39e   :  { %v632_v4 = vpop.f32.mrf.mxu0  ;;  %v674_v5 = vpop.f32.mrf.mxu1 }
 0x39f   :  { %v675_v15 = vadd.f32 %v674_v5, %v462_v12  ;;  %v633_v18 = vadd.f32 %v632_v4, %v454_v14 }
 0x3a0   :  { %v634_v51 = vpop.f32.mrf.mxu0  ;;  %v5502_v7 = vpop.f32.mrf.mxu1 }
 0x3a1   :  { %v635_v11 = vadd.f32 %v634_v51, %v458_v3  ;;  %v6591_v21 = vpack.c.bf16 %v675_v15, %v672_v17  ;;  %v678_v22 = vpack.c.bf16 %v633_v18, %v629_v20 }
 0x3a3   :  { %v679_v13 = vpack.c.bf16 %v635_v11, %v631_v9  ;;  %v747_v23 = vsel %vm745_vm8, %v6591_v21, 0  ;;  %v1142_v37 = vrot.slane %v678_v22, 4 }
 0x3a5   :  { %905 = vrot.lane.b32.xlu0 %v679_v13, %s6377_s24  ;;  %v686_v16 = vsel %vm681_vm7, %v679_v13, 0  ;;  %v6588_v19 = vrot.slane %v679_v13, 4 }
 0x3a6   :  { %5504 = vmatpush3.bf16.xpose.msra.mxu1 %v686_v16 }
 0x3a7   :  { %5509 = vmatprep.subr.bf16.mxu1 %v6383_v10  ;;  %v1148_v49 = vsel %vm681_vm7, %v6588_v19, 0 }
 0x3a9   :  { %1363 = vrot.lane.b32.xlu0 %v6588_v19, %s6377_s24 }
 0x3ad   :  { %1474 = vrot.lane.b32.xlu0 %v6588_v19, %s6385_s22  ;;  %5506 = vmatmul.mubr.msk.bf16.vlgmr.msra.gmra.mxu1 %vm681_vm7, %v678_v22 }
 0x3ae   :  { %5510 = vmatpush3.bf16.msra.mxu1 %v747_v23  ;;  %5511 = vmatprep.mubr.msk.bf16.mxu1 %vm6384_vm6, %v6383_v10 }
 0x3af   :  { %5515 = vmatprep.subr.bf16.mxu1 %v6383_v10 }
 0x417   :  { %v906_v24 = vpop.permute.xlu0 %905 }
 0x418   :  { %v911_v25 = vsel %vm681_vm7, %v906_v24, 0 }
 0x419   :  { %5528 = vmatpush3.bf16.xpose.msra.mxu0 %v911_v25 }
 0x41a   :  { %5539 = vmatprep.subr.bf16.mxu0 %v6383_v10 }
 0x41b   :  { %v1364_v53 = vpop.permute.xlu0 %1363 }
 0x41c   :  { %v1369_v55 = vsel %vm681_vm7, %v1364_v53, 0 }
 0x41f   :  { %v1475_v58 = vpop.permute.xlu0 %1474 }
 0x420   :  { %v1480_v62 = vsel %vm681_vm7, %v1475_v58, 0 }
 0x46d   :  { %v722_v26 = vpop.f32.mrf.mxu1 }
 0x46e   :  { %v728_v27 = vmul.f32 0.17677669, %v722_v26 }
 0x46f   :  { %v5507_v28 = vpop.f32.mrf.mxu1 }
 0x470   :  { %v730_v29 = vsel %vm729_vm9, %v728_v27, -inf }
 0x471   :  { %731 = vmax.xlane.f32.xlu1 %v730_v29  ;;  %v725_v30 = vpop.f32.mrf.mxu1 }
 0x473   :  { %v5508_v31 = vpop.f32.mrf.mxu1 }
 0x4fa   :  { %v732_v32 = vpop.xlane.xlu1 %731 }
 0x4fb   :  { %v733_v33 = vsub.f32 %v728_v27, %v732_v32 }
 0x4fd   :  { %v734_v34 = vmul.f32 1.442695, %v733_v33 }
 0x4ff   :  { %6105 = vpow2.f32 %v734_v34 }
 0x50c   :  { %v6106_v35 = vpop.eup %6105 }
 0x50d   :  { %v736_v36 = vsel %vm729_vm9, %v6106_v35, 0.0 }
 0x50e   :  { %737 = vadd.xlane.f32.xlu1 %v736_v36 }
 0x51f   :  { %793 = vrot.lane.b32.xlu1 %v679_v13, %s6386_s7 }
 0x523   :  { %790 = vrot.lane.b32.xlu1 %v678_v22, %s6386_s7 }
 0x527   :  { %903 = vrot.lane.b32.xlu1 %v678_v22, %s6377_s24 }
 0x52b   :  { %1016 = vrot.lane.b32.xlu1 %v679_v13, %s6385_s22 }
 0x52f   :  { %1014 = vrot.lane.b32.xlu1 %v678_v22, %s6385_s22 }
 0x533   :  { %1252 = vrot.lane.b32.xlu1 %v6588_v19, %s6386_s7 }
 0x537   :  { %1250 = vrot.lane.b32.xlu1 %v1142_v37, %s6386_s7 }
 0x53b   :  { %1361 = vrot.lane.b32.xlu1 %v1142_v37, %s6377_s24 }
 0x53f   :  { %1472 = vrot.lane.b32.xlu1 %v1142_v37, %s6385_s22 }
 0x597   :  { %v738_v38 = vpop.xlane.xlu1 %737 }
 0x598   :  { %6107 = vrcp.f32 %v738_v38 }
 0x59b   :  { %v794_v39 = vpop.permute.xlu1 %793 }
 0x59c   :  { %v799_v47 = vsel %vm681_vm7, %v794_v39, 0 }
 0x59f   :  { %v791_v40 = vpop.permute.xlu1 %790 }
 0x5a3   :  { %v904_v41 = vpop.permute.xlu1 %903 }
 0x5a4   :  { %5530 = vmatmul.mubr.msk.bf16.vlgmr.msra.gmra.mxu0 %vm681_vm7, %v904_v41 }
 0x5a5   :  { %v6108_v42 = vpop.eup %6107  ;;  %5541 = vmatprep.mubr.msk.bf16.mxu0 %vm6384_vm6, %v6383_v10 }
 0x5a6   :  { %v740_v43 = vmul.f32 %v6108_v42, %v6106_v35 }
 0x5a7   :  { %v1017_v44 = vpop.permute.xlu1 %1016 }
 0x5a8   :  { %v1022_v45 = vsel %vm681_vm7, %v1017_v44, 0  ;;  %v741_v46 = vpack.c.bf16 %v740_v43, %v740_v43 }
 0x5a9   :  { %5540 = vmatpush3.bf16.xpose.msra.mxu0 %v1022_v45 }
 0x5aa   :  { %5512 = vmatmul.mubr.msk.bf16.vlgmr.msra.gmra.mxu1 %vm729_vm9, %v741_v46  ;;  %5551 = vmatprep.subr.bf16.mxu0 %v6383_v10 }
 0x5ab   :  { %5516 = vmatpush3.bf16.xpose.msra.mxu1 %v799_v47  ;;  %5517 = vmatprep.mubr.msk.bf16.mxu1 %vm6384_vm6, %v6383_v10  ;;  %v1015_v48 = vpop.permute.xlu1 %1014 }
 0x5ac   :  { %5521 = vmatprep.subr.bf16.mxu1 %v6383_v10 }
 0x5af   :  { %v1253_v50 = vpop.permute.xlu1 %1252 }
 0x5b0   :  { %5542 = vmatmul.mubr.msk.bf16.vlgmr.msra.gmra.mxu0 %vm681_vm7, %v1015_v48  ;;  %v1258_v52 = vsel %vm681_vm7, %v1253_v50, 0 }
 0x5b1   :  { %5552 = vmatpush3.bf16.xpose.msra.mxu0 %v1148_v49  ;;  %5553 = vmatprep.mubr.msk.bf16.mxu0 %vm6384_vm6, %v6383_v10 }
 0x5b2   :  { %5518 = vmatmul.mubr.msk.bf16.vlgmr.msra.gmra.mxu1 %vm681_vm7, %v791_v40  ;;  %5563 = vmatprep.subr.bf16.mxu0 %v6383_v10 }
 0x5b3   :  { %5523 = vmatprep.mubr.msk.bf16.mxu1 %vm6384_vm6, %v6383_v10  ;;  %v1251_v54 = vpop.permute.xlu1 %1250 }
 0x5b7   :  { %v1362_v61 = vpop.permute.xlu1 %1361 }
 0x5b8   :  { %5554 = vmatmul.mubr.msk.bf16.vlgmr.msra.gmra.mxu0 %vm681_vm7, %v1142_v37 }
 0x5b9   :  { %5564 = vmatpush3.bf16.xpose.msra.mxu0 %v1258_v52  ;;  %5565 = vmatprep.mubr.msk.bf16.mxu0 %vm6384_vm6, %v6383_v10 }
 0x5ba   :  { %5575 = vmatprep.subr.bf16.mxu0 %v6383_v10 }
 0x5bb   :  { %v1473_v63 = vpop.permute.xlu1 %1472 }
 0x5c0   :  { %5566 = vmatmul.mubr.msk.bf16.vlgmr.msra.gmra.mxu0 %vm681_vm7, %v1251_v54 }
 0x5c1   :  { %5576 = vmatpush3.bf16.xpose.msra.mxu0 %v1369_v55  ;;  %5577 = vmatprep.mubr.msk.bf16.mxu0 %vm6384_vm6, %v6383_v10 }
 0x5c2   :  { %5587 = vmatprep.subr.bf16.mxu0 %v6383_v10 }
 0x5c8   :  { %5578 = vmatmul.mubr.msk.bf16.vlgmr.msra.gmra.mxu0 %vm681_vm7, %v1362_v61 }
 0x5c9   :  { %5588 = vmatpush3.bf16.xpose.msra.mxu0 %v1480_v62  ;;  %5589 = vmatprep.mubr.msk.bf16.mxu0 %vm6384_vm6, %v6383_v10 }
 0x5ca   :  { %5599 = vmatprep.subr.bf16.mxu0 %v6383_v10 }
 0x5d0   :  { %5590 = vmatmul.mubr.msk.bf16.vlgmr.msra.gmra.mxu0 %vm681_vm7, %v1473_v63 }
 0x5d1   :  { %5615 = vmatprep.mubr.msk.bf16.mxu0 %vm6384_vm6, %v6383_v10 }
 0x664   :  { %v947_v1 = vpop.f32.mrf.mxu0 }
 0x665   :  { %v953_v2 = vmul.f32 0.17677669, %v947_v1 }
 0x666   :  { %v5531_v3 = vpop.f32.mrf.mxu0 }
 0x667   :  { %v954_v4 = vsel %vm729_vm9, %v953_v2, -inf }
 0x668   :  { %955 = vmax.xlane.f32.xlu1 %v954_v4  ;;  %v950_v5 = vpop.f32.mrf.mxu0 }
 0x66a   :  { %v6655_v51 = vpop.f32.mrf.mxu1  ;;  %v5532_v7 = vpop.f32.mrf.mxu0 }
 0x66c   :  { %v5513_v9 = vpop.f32.mrf.mxu1 }
 0x66e   :  { %v786_v11 = vpop.f32.mrf.mxu1 }
 0x670   :  { %v5514_v12 = vpop.f32.mrf.mxu1  ;;  %v1058_v13 = vpop.f32.mrf.mxu0 }
 0x671   :  { %v1064_v19 = vmul.f32 0.17677669, %v1058_v13 }
 0x672   :  { %v835_v14 = vpop.f32.mrf.mxu1  ;;  %v5543_v15 = vpop.f32.mrf.mxu0 }
 0x673   :  { %v841_v16 = vmul.f32 0.17677669, %v835_v14  ;;  %v1065_v27 = vsel %vm729_vm9, %v1064_v19, -inf }
 0x674   :  { %v5519_v17 = vpop.f32.mrf.mxu1  ;;  %v1061_v18 = vpop.f32.mrf.mxu0 }
 0x675   :  { %v842_v20 = vsel %vm729_vm9, %v841_v16, -inf }
 0x676   :  { %v5544_v22 = vpop.f32.mrf.mxu0  ;;  %843 = vmax.xlane.f32.xlu0 %v842_v20  ;;  %v838_v23 = vpop.f32.mrf.mxu1 }
 0x678   :  { %v5520_v24 = vpop.f32.mrf.mxu1  ;;  %v1184_v25 = vpop.f32.mrf.mxu0 }
 0x679   :  { %v1190_v26 = vmul.f32 0.17677669, %v1184_v25 }
 0x67a   :  { %v5555_v28 = vpop.f32.mrf.mxu0  ;;  %1066 = vmax.xlane.f32.xlu0 %v1065_v27 }
 0x67b   :  { %v1191_v30 = vsel %vm729_vm9, %v1190_v26, -inf }
 0x67c   :  { %v1187_v29 = vpop.f32.mrf.mxu0 }
 0x67e   :  { %v5556_v31 = vpop.f32.mrf.mxu0  ;;  %1192 = vmax.xlane.f32.xlu0 %v1191_v30 }
 0x67f   :  { %v1203_v31 = vrot.slane %v6591_v21, 4 }
 0x680   :  { %v1294_v32 = vpop.f32.mrf.mxu0 }
 0x681   :  { %v1300_v33 = vmul.f32 0.17677669, %v1294_v32 }
 0x682   :  { %v5567_v34 = vpop.f32.mrf.mxu0 }
 0x683   :  { %v1301_v35 = vsel %vm729_vm9, %v1300_v33, -inf }
 0x684   :  { %1302 = vmax.xlane.f32.xlu1 %v1301_v35  ;;  %v1297_v36 = vpop.f32.mrf.mxu0 }
 0x686   :  { %v5568_v37 = vpop.f32.mrf.mxu0 }
 0x688   :  { %v1405_v38 = vpop.f32.mrf.mxu0 }
 0x689   :  { %v1411_v39 = vmul.f32 0.17677669, %v1405_v38 }
 0x68a   :  { %v5579_v40 = vpop.f32.mrf.mxu0 }
 0x68b   :  { %v1412_v41 = vsel %vm729_vm9, %v1411_v39, -inf }
 0x68c   :  { %v1408_v42 = vpop.f32.mrf.mxu0  ;;  %1413 = vmax.xlane.f32.xlu0 %v1412_v41 }
 0x68e   :  { %v5580_v43 = vpop.f32.mrf.mxu0 }
 0x690   :  { %v1516_v44 = vpop.f32.mrf.mxu0 }
 0x691   :  { %v1522_v45 = vmul.f32 0.17677669, %v1516_v44 }
 0x692   :  { %v5591_v46 = vpop.f32.mrf.mxu0 }
 0x693   :  { %v1523_v47 = vsel %vm729_vm9, %v1522_v45, -inf }
 0x694   :  { %1524 = vmax.xlane.f32.xlu1 %v1523_v47  ;;  %v1519_v48 = vpop.f32.mrf.mxu0 }
 0x696   :  { %v5592_v49 = vpop.f32.mrf.mxu0 }
 0x6f1   :  { %v956_v50 = vpop.xlane.xlu1 %955 }
 0x6f2   :  { %v957_v52 = vsub.f32 %v953_v2, %v956_v50 }
 0x6f4   :  { %v958_v53 = vmul.f32 1.442695, %v957_v52 }
 0x6f6   :  { %6109 = vpow2.f32 %v958_v53  ;;  %v1208_v53 = vsel %vm745_vm8, %v1203_v31, 0 }
 0x6ff   :  { %v844_v54 = vpop.xlane.xlu0 %843 }
 0x700   :  { %v845_v55 = vsub.f32 %v841_v16, %v844_v54 }
 0x702   :  { %v846_v1 = vmul.f32 1.442695, %v845_v55 }
 0x703   :  { %v6663_v58 = vpop.eup %6109  ;;  %v1067_v61 = vpop.xlane.xlu0 %1066 }
 0x704   :  { %v1068_v62 = vsub.f32 %v1064_v19, %v1067_v61  ;;  %v960_v63 = vsel %vm729_vm9, %v6663_v58, 0.0 }
 0x705   :  { %961 = vadd.xlane.f32.xlu1 %v960_v63 }
 0x706   :  { %v1069_v3 = vmul.f32 1.442695, %v1068_v62 }
 0x707   :  { %v1193_v4 = vpop.xlane.xlu0 %1192 }
 0x708   :  { %6111 = vpow2.f32 %v1069_v3  ;;  %v1194_v5 = vsub.f32 %v1190_v26, %v1193_v4 }
 0x709   :  { %6113 = vpow2.f32 %v846_v1 }
 0x70a   :  { %v1195_v7 = vmul.f32 1.442695, %v1194_v5 }
 0x70c   :  { %6115 = vpow2.f32 %v1195_v7 }
 0x70d   :  { %v1303_v2 = vpop.xlane.xlu1 %1302 }
 0x70e   :  { %v1304_v9 = vsub.f32 %v1300_v33, %v1303_v2 }
 0x710   :  { %v1305_v11 = vmul.f32 1.442695, %v1304_v9 }
 0x712   :  { %6117 = vpow2.f32 %v1305_v11 }
 0x715   :  { %v6667_v12 = vpop.eup %6111  ;;  %v1414_v20 = vpop.xlane.xlu0 %1413 }
 0x716   :  { %v1071_v13 = vsel %vm729_vm9, %v6667_v12, 0.0  ;;  %v6114_v14 = vpop.eup %6113  ;;  %v1415_v22 = vsub.f32 %v1411_v39, %v1414_v20 }
 0x717   :  { %1072 = vadd.xlane.f32.xlu0 %v1071_v13  ;;  %v848_v16 = vsel %vm729_vm9, %v6114_v14, 0.0 }
 0x718   :  { %v1416_v23 = vmul.f32 1.442695, %v1415_v22 }
 0x719   :  { %v6671_v15 = vpop.eup %6115 }
 0x71a   :  { %v1197_v17 = vsel %vm729_vm9, %v6671_v15, 0.0  ;;  %6119 = vpow2.f32 %v1416_v23 }
 0x71b   :  { %849 = vadd.xlane.f32.xlu0 %v848_v16  ;;  %1198 = vadd.xlane.f32.xlu1 %v1197_v17  ;;  %v5861_v17 = vld [vmem:[#allocation7 + $0x38] sm:$0xff]  }
 0x71c   :  { %5600 = vmatpush3.bf16.msra.mxu0 %v5861_v17  ;;  %v4967_v17 = vld [vmem:[%s7144_s8] ss:$0 sm:$0xff] }
 0x71d   :  { %v1525_v24 = vpop.xlane.xlu1 %1524  ;;  %5601 = vmatprep.subr.bf16.mxu0 %v6383_v10 }
 0x71e   :  { %v1526_v25 = vsub.f32 %v1522_v45, %v1525_v24 }
 0x71f   :  { %v6676_v18 = vpop.eup %6117 }
 0x720   :  { %v1307_v19 = vsel %vm729_vm9, %v6676_v18, 0.0  ;;  %v1527_v26 = vmul.f32 1.442695, %v1526_v25 }
 0x721   :  { %1308 = vadd.xlane.f32.xlu1 %v1307_v19 }
 0x722   :  { %6121 = vpow2.f32 %v1527_v26 }
 0x727   :  { %v6686_v27 = vpop.eup %6119 }
 0x728   :  { %v1418_v28 = vsel %vm729_vm9, %v6686_v27, 0.0 }
 0x72f   :  { %v6690_v29 = vpop.eup %6121 }
 0x730   :  { %v1529_v30 = vsel %vm729_vm9, %v6690_v29, 0.0 }
 0x731   :  { %855 = vrot.lane.b32.xlu0 %v6591_v21, %s6386_s7 }
 0x732   :  { %966 = vrot.lane.b32.xlu1 %v6591_v21, %s6377_s24 }
 0x736   :  { %1077 = vrot.lane.b32.xlu1 %v6591_v21, %s6385_s22 }
 0x750   :  { %1419 = vadd.xlane.f32.xlu0 %v1418_v28 }
 0x75a   :  { %1530 = vadd.xlane.f32.xlu1 %v1529_v30 }
 0x766   :  { %1313 = vrot.lane.b32.xlu0 %v1203_v31, %s6386_s7 }
 0x76a   :  { %1535 = vrot.lane.b32.xlu0 %v1203_v31, %s6385_s22 }
 0x76b   :  { %1424 = vrot.lane.b32.xlu1 %v1203_v31, %s6377_s24 }
 0x78e   :  { %v962_v34 = vpop.xlane.xlu1 %961 }
 0x7a0   :  { %v1073_v32 = vpop.xlane.xlu0 %1072 }
 0x7a4   :  { %v850_v33 = vpop.xlane.xlu0 %849  ;;  %v1199_v37 = vpop.xlane.xlu1 %1198 }
 0x7a5   :  { %6123 = vrcp.f32 %v850_v33 }
 0x7a6   :  { %6125 = vrcp.f32 %v962_v34 }
 0x7a7   :  { %6127 = vrcp.f32 %v1073_v32 }
 0x7a8   :  { %v856_v35 = vpop.permute.xlu0 %855  ;;  %6129 = vrcp.f32 %v1199_v37  ;;  %v5864_v37 = vld [vmem:[#allocation7 + $0x20] sm:$0xff]  }
 0x7a9   :  { %v861_v36 = vsel %vm745_vm8, %v856_v35, 0 }
 0x7aa   :  { %5522 = vmatpush3.bf16.msra.mxu1 %v861_v36  ;;  %v1309_v38 = vpop.xlane.xlu1 %1308  ;;  %v5863_v36 = vld [vmem:[#allocation7 + $0x28] sm:$0xff]  }
 0x7ab   :  { %5533 = vmatprep.subr.bf16.mxu1 %v6383_v10  ;;  %6131 = vrcp.f32 %v1309_v38 }
 0x7ae   :  { %v967_v40 = vpop.permute.xlu1 %966 }
 0x7af   :  { %v972_v43 = vsel %vm745_vm8, %v967_v40, 0 }
 0x7b2   :  { %v6124_v21 = vpop.eup %6123  ;;  %v1078_v45 = vpop.permute.xlu1 %1077 }
 0x7b3   :  { %v852_v39 = vmul.f32 %v6124_v21, %v6114_v14  ;;  %v6126_v42 = vpop.eup %6125  ;;  %v1083_v48 = vsel %vm745_vm8, %v1078_v45, 0  ;;  %v5865_v21 = vld [vmem:[#allocation7 + $0x18] sm:$0xff]  }
 0x7b4   :  { %v964_v44 = vmul.f32 %v6126_v42, %v6663_v58  ;;  %v6128_v47 = vpop.eup %6127 }
 0x7b5   :  { %v853_v41 = vpack.c.bf16 %v852_v39, %v852_v39  ;;  %v1075_v49 = vmul.f32 %v6128_v47, %v6667_v12  ;;  %v6130_v52 = vpop.eup %6129 }
 0x7b6   :  { %v965_v46 = vpack.c.bf16 %v964_v44, %v964_v44  ;;  %v1201_v54 = vmul.f32 %v6130_v52, %v6671_v15  ;;  %v5867_v44 = vld [vmem:[#allocation7 + $0x8] sm:$0xff]  }
 0x7b7   :  { %5524 = vmatmul.mubr.msk.bf16.vlgmr.msra.gmra.mxu1 %vm729_vm9, %v853_v41  ;;  %v1076_v50 = vpack.c.bf16 %v1075_v49, %v1075_v49  ;;  %v5866_v41 = vld [vmem:[#allocation7 + $0x10] sm:$0xff]  }
 0x7b8   :  { %5534 = vmatpush3.bf16.msra.mxu1 %v972_v43  ;;  %5535 = vmatprep.mubr.msk.bf16.mxu1 %vm6384_vm6, %v6383_v10  ;;  %v1202_v55 = vpack.c.bf16 %v1201_v54, %v1201_v54  ;;  %v6132_v58 = vpop.eup %6131 }
 0x7b9   :  { %5545 = vmatprep.subr.bf16.mxu1 %v6383_v10  ;;  %v1311_v62 = vmul.f32 %v6132_v58, %v6676_v18  ;;  %v5862_v18 = vld [vmem:[#allocation7 + $0x30] sm:$0xff]  }
 0x7ba   :  { %5602 = vmatpush3.bf16.msra.mxu0 %v5862_v18 }
 0x7bb   :  { %v1312_v3 = vpack.c.bf16 %v1311_v62, %v1311_v62  ;;  %5603 = vmatprep.subr.bf16.mxu0 %v6383_v10 }
 0x7be   :  { %5604 = vmatpush3.bf16.msra.mxu0 %v5863_v36  ;;  %v5877_v36 = vld [vmem:[#allocation8 + $0xc4] ss:$16 sps:$4 sm:$0xff]  }
 0x7bf   :  { %5536 = vmatmul.mubr.msk.bf16.vlgmr.msra.gmra.mxu1 %vm729_vm9, %v965_v46  ;;  %5605 = vmatprep.subr.bf16.mxu0 %v6383_v10 }
 0x7c0   :  { %5546 = vmatpush3.bf16.msra.mxu1 %v1083_v48  ;;  %5547 = vmatprep.mubr.msk.bf16.mxu1 %vm6384_vm6, %v6383_v10  ;;  %v5868_v48 = vld [vmem:[#allocation7] sm:$0xff]  }
 0x7c1   :  { %5557 = vmatprep.subr.bf16.mxu1 %v6383_v10 }
 0x7c2   :  { %5606 = vmatpush3.bf16.msra.mxu0 %v5864_v37  ;;  %v5880_v37 = vld [vmem:[#allocation8 + $0xcc] ss:$16 sps:$4 sm:$0xff]  }
 0x7c3   :  { %5607 = vmatprep.subr.bf16.mxu0 %v6383_v10 }
 0x7c6   :  { %5608 = vmatpush3.bf16.msra.mxu0 %v5865_v21  ;;  %v5878_v21 = vld [vmem:[#allocation8 + $0xc8] ss:$16 sps:$4 sm:$0xff]  }
 0x7c7   :  { %5548 = vmatmul.mubr.msk.bf16.vlgmr.msra.gmra.mxu1 %vm729_vm9, %v1076_v50  ;;  %5609 = vmatprep.subr.bf16.mxu0 %v6383_v10 }
 0x7c8   :  { %5558 = vmatpush3.bf16.msra.mxu1 %v1208_v53  ;;  %5559 = vmatprep.mubr.msk.bf16.mxu1 %vm6384_vm6, %v6383_v10 }
 0x7c9   :  { %5569 = vmatprep.subr.bf16.mxu1 %v6383_v10 }
 0x7ca   :  { %5610 = vmatpush3.bf16.msra.mxu0 %v5866_v41  ;;  %v5881_v41 = vld [vmem:[#allocation8 + $0xa0] ss:$16 sps:$4 sm:$0xff]  }
 0x7cb   :  { %5611 = vmatprep.subr.bf16.mxu0 %v6383_v10 }
 0x7ce   :  { %5612 = vmatpush3.bf16.msra.mxu0 %v5867_v44  ;;  %v5887_v44 = vld [vmem:[#allocation8 + $0x80] ss:$16 sps:$4 sm:$0xff]  }
 0x7cf   :  { %5560 = vmatmul.mubr.msk.bf16.vlgmr.msra.gmra.mxu1 %vm729_vm9, %v1202_v55  ;;  %5613 = vmatprep.subr.bf16.mxu0 %v6383_v10 }
 0x7d0   :  { %5571 = vmatprep.mubr.msk.bf16.mxu1 %vm6384_vm6, %v6383_v10 }
 0x7d2   :  { %5614 = vmatpush3.bf16.msra.mxu0 %v5868_v48  ;;  %v5898_v48 = vld [vmem:[#allocation8 + $0x6c] ss:$16 sps:$4 sm:$0xff]  }
 0x7d9   :  { %v1420_v61 = vpop.xlane.xlu0 %1419 }
 0x7da   :  { %6133 = vrcp.f32 %v1420_v61 }
 0x7dd   :  { %v1314_v63 = vpop.permute.xlu0 %1313 }
 0x7de   :  { %v1319_v1 = vsel %vm745_vm8, %v1314_v63, 0 }
 0x7df   :  { %5570 = vmatpush3.bf16.msra.mxu1 %v1319_v1 }
 0x7e0   :  { %5581 = vmatprep.subr.bf16.mxu1 %v6383_v10 }
 0x7e1   :  { %v1536_v11 = vpop.permute.xlu0 %1535 }
 0x7e2   :  { %5572 = vmatmul.mubr.msk.bf16.vlgmr.msra.gmra.mxu1 %vm729_vm9, %v1312_v3  ;;  %v1541_v13 = vsel %vm745_vm8, %v1536_v11, 0 }
 0x7e3   :  { %v1531_v4 = vpop.xlane.xlu1 %1530  ;;  %5583 = vmatprep.mubr.msk.bf16.mxu1 %vm6384_vm6, %v6383_v10 }
 0x7e4   :  { %6135 = vrcp.f32 %v1531_v4 }
 0x7e7   :  { %v6134_v5 = vpop.eup %6133  ;;  %v1425_v7 = vpop.permute.xlu1 %1424 }
 0x7e8   :  { %v1430_v2 = vsel %vm745_vm8, %v1425_v7, 0  ;;  %v1422_v9 = vmul.f32 %v6134_v5, %v6686_v27 }
 0x7e9   :  { %5582 = vmatpush3.bf16.msra.mxu1 %v1430_v2 }
 0x7ea   :  { %v1423_v12 = vpack.c.bf16 %v1422_v9, %v1422_v9  ;;  %5593 = vmatprep.subr.bf16.mxu1 %v6383_v10 }
 0x7ec   :  { %5584 = vmatmul.mubr.msk.bf16.vlgmr.msra.gmra.mxu1 %vm729_vm9, %v1423_v12 }
 0x7ed   :  { %5594 = vmatpush3.bf16.msra.mxu1 %v1541_v13  ;;  %5595 = vmatprep.mubr.msk.bf16.mxu1 %vm6384_vm6, %v6383_v10 }
 0x7f1   :  { %v6136_v14 = vpop.eup %6135 }
 0x7f2   :  { %v1533_v15 = vmul.f32 %v6136_v14, %v6690_v29 }
 0x7f4   :  { %v1534_v16 = vpack.c.bf16 %v1533_v15, %v1533_v15 }
 0x7f6   :  { %5596 = vmatmul.mubr.msk.bf16.vlgmr.msra.gmra.mxu1 %vm729_vm9, %v1534_v16 }
 0x7f7   :  { %2000 = vmatprep.mubr.bf16.mxu1 %v6381_v0 }
 0x877   :  { %v897_v19 = vpop.f32.mrf.mxu1 }
 0x879   :  { %v5525_v20 = vpop.f32.mrf.mxu1 }
 0x87b   :  { %v900_v22 = vpop.f32.mrf.mxu1 }
 0x87d   :  { %v5526_v23 = vpop.f32.mrf.mxu1 }
 0x87f   :  { %v1008_v24 = vpop.f32.mrf.mxu1 }
 0x881   :  { %v5537_v25 = vpop.f32.mrf.mxu1 }
 0x883   :  { %v1011_v26 = vpop.f32.mrf.mxu1 }
 0x884   :  { %v5869_v26 = vld [vmem:[#allocation8 + $0xe0] ss:$16 sps:$4 sm:$0xff]  }
 0x885   :  { %v5538_v27 = vpop.f32.mrf.mxu1 }
 0x886   :  { %v5871_v27 = vld [vmem:[#allocation8 + $0xe4] ss:$16 sps:$4 sm:$0xff]  }
 0x887   :  { %v1119_v28 = vpop.f32.mrf.mxu1  ;;  %1968 = vmatprep.subr.bf16.mxu1 %v5871_v27  ;;  %v5919_v27 = vld [vmem:[#allocation10 + $0x38] sm:$0xff]  }
 0x888   :  { %1969 = vmatpush1.bf16.msra.mxu1 %v5869_v26  ;;  %v5918_v26 = vld [vmem:[#allocation10 + $0xf8] sm:$0xff]  }
 0x889   :  { %v5549_v29 = vpop.f32.mrf.mxu1  ;;  %1970 = vmatprep.subr.bf16.mxu1 %v5877_v36  ;;  %v5930_v36 = vld [vmem:[#allocation10 + $0xe0] sm:$0xff]  }
 0x88a   :  { %v5874_v29 = vld [vmem:[#allocation8 + $0xec] ss:$16 sps:$4 sm:$0xff]  }
 0x88b   :  { %v1122_v30 = vpop.f32.mrf.mxu1  ;;  %2011 = vmatprep.subr.bf16.mxu0 %v5874_v29  ;;  %v5921_v29 = vld [vmem:[#allocation10 + $0x70] sm:$0xff]  }
 0x88d   :  { %v5550_v31 = vpop.f32.mrf.mxu1 }
 0x88f   :  { %v1244_v32 = vpop.f32.mrf.mxu1 }
 0x891   :  { %v5561_v33 = vpop.f32.mrf.mxu1 }
 0x893   :  { %v1247_v34 = vpop.f32.mrf.mxu1 }
 0x895   :  { %v5562_v35 = vpop.f32.mrf.mxu1 }
 0x8a2   :  { %v1355_v38 = vpop.f32.mrf.mxu1 }
 0x8a3   :  { %v5799_v39 = vpack.i.bf16 %v1355_v38, %v897_v19  ;;  %v5875_v38 = vld [vmem:[#allocation8 + $0xc0] ss:$16 sps:$4 sm:$0xff]  }
 0x8a4   :  { %v5573_v40 = vpop.f32.mrf.mxu1  ;;  %1971 = vmatpush1.bf16.msra.mxu1 %v5875_v38  ;;  %v5932_v38 = vld [vmem:[#allocation10 + $0xa0] sm:$0xff]  }
 0x8a5   :  { %5800 = vrot.lane.b32.xlu0 %v5799_v39, %s6385_s22  ;;  %v5883_v39 = vld [vmem:[#allocation8 + $0xa4] ss:$16 sps:$4 sm:$0xff]   ;;  %v5886_v40 = vld [vmem:[#allocation8 + $0xac] ss:$16 sps:$4 sm:$0xff]  }
 0x8a6   :  { %v1358_v42 = vpop.f32.mrf.mxu1  ;;  %1972 = vmatprep.subr.bf16.mxu1 %v5883_v39  ;;  %v5934_v39 = vld [vmem:[#allocation10 + $0xd8] sm:$0xff]  }
 0x8a7   :  { %v5884_v42 = vld [vmem:[#allocation8 + $0xa8] ss:$16 sps:$4 sm:$0xff]  }
 0x8a8   :  { %v5574_v43 = vpop.f32.mrf.mxu1  ;;  %1973 = vmatpush1.bf16.msra.mxu1 %v5881_v41  ;;  %v5936_v41 = vld [vmem:[#allocation10 + $0x98] sm:$0xff]  }
 0x8a9   :  { %v5889_v43 = vld [vmem:[#allocation8 + $0x84] ss:$16 sps:$4 sm:$0xff]  }
 0x8aa   :  { %1974 = vmatprep.subr.bf16.mxu1 %v5889_v43  ;;  %v5938_v43 = vld [vmem:[#allocation10 + $0xd0] sm:$0xff]  }
 0x8ac   :  { %v1466_v45 = vpop.f32.mrf.mxu1  ;;  %1975 = vmatpush1.bf16.msra.mxu1 %v5887_v44  ;;  %v5939_v44 = vld [vmem:[#allocation10 + $0x10] sm:$0xff]  }
 0x8ad   :  { %v5804_v46 = vpack.i.bf16 %v1466_v45, %v1008_v24  ;;  %v5890_v45 = vld [vmem:[#allocation8 + $0x88] ss:$16 sps:$4 sm:$0xff]  }
 0x8ae   :  { %v5585_v47 = vpop.f32.mrf.mxu1 }
 0x8af   :  { %5805 = vrot.lane.b32.xlu1 %v5804_v46, %s6377_s24  ;;  %v5892_v46 = vld [vmem:[#allocation8 + $0x8c] ss:$16 sps:$4 sm:$0xff]   ;;  %v5895_v47 = vld [vmem:[#allocation8 + $0x64] ss:$16 sps:$4 sm:$0xff]  }
 0x8b0   :  { %v1469_v49 = vpop.f32.mrf.mxu1  ;;  %1976 = vmatprep.subr.bf16.mxu1 %v5895_v47  ;;  %v5942_v47 = vld [vmem:[#allocation10 + $0xc8] sm:$0xff]  }
 0x8b1   :  { %v5893_v49 = vld [vmem:[#allocation8 + $0x60] ss:$16 sps:$4 sm:$0xff]  }
 0x8b2   :  { %v5586_v50 = vpop.f32.mrf.mxu1  ;;  %1977 = vmatpush1.bf16.msra.mxu1 %v5893_v49  ;;  %v5944_v49 = vld [vmem:[#allocation10 + $0x88] sm:$0xff]  }
 0x8b3   :  { %v5896_v50 = vld [vmem:[#allocation8 + $0x68] ss:$16 sps:$4 sm:$0xff]  }
 0x8b6   :  { %v1577_v52 = vpop.f32.mrf.mxu1 }
 0x8b7   :  { %v5809_v53 = vpack.i.bf16 %v1577_v52, %v1119_v28  ;;  %v5872_v28 = vld [vmem:[#allocation8 + $0xe8] ss:$16 sps:$4 sm:$0xff]   ;;  %v5901_v52 = vld [vmem:[#allocation8 + $0x44] ss:$16 sps:$4 sm:$0xff]  }
 0x8b8   :  { %v5597_v54 = vpop.f32.mrf.mxu1  ;;  %1978 = vmatprep.subr.bf16.mxu1 %v5901_v52  ;;  %v5946_v52 = vld [vmem:[#allocation10 + $0xc0] sm:$0xff]  }
 0x8b9   :  { %5810 = vrot.lane.b32.xlu0 %v5809_v53, %s6386_s7  ;;  %v5904_v53 = vld [vmem:[#allocation8 + $0x4c] ss:$16 sps:$4 sm:$0xff]   ;;  %v5899_v54 = vld [vmem:[#allocation8 + $0x40] ss:$16 sps:$4 sm:$0xff]  }
 0x8ba   :  { %v1580_v55 = vpop.f32.mrf.mxu1  ;;  %1979 = vmatpush1.bf16.msra.mxu1 %v5899_v54  ;;  %v5948_v54 = vld [vmem:[#allocation10 + $0x80] sm:$0xff]  }
 0x8bb   :  { %v5902_v55 = vld [vmem:[#allocation8 + $0x48] ss:$16 sps:$4 sm:$0xff]  }
 0x8bc   :  { %v5598_v58 = vpop.f32.mrf.mxu1 }
 0x8bd   :  { %v5907_v58 = vld [vmem:[#allocation8 + $0x24] ss:$16 sps:$4 sm:$0xff]  }
 0x8be   :  { %1980 = vmatprep.subr.bf16.mxu1 %v5907_v58  ;;  %v1802_v58 = vsub.s32 3, %v6569_v59 }
 0x917   :  { %v5801_v61 = vpop.permute.xlu0 %5800 }
 0x918   :  { %v5803_v63 = vunpack.i.h.bf16 %v5801_v61  ;;  %v5802_v1 = vunpack.i.l.bf16 %v5801_v61  ;;  %v5910_v61 = vld [vmem:[#allocation8 + $0x2c] ss:$16 sps:$4 sm:$0xff]  }
 0x91a   :  { %v1595_v7 = vsel %vm681_vm7, %v1244_v32, %v5803_v63  ;;  %v1137_v2 = vsel %vm681_vm7, %v6655_v51, %v5802_v1  ;;  %v5908_v63 = vld [vmem:[#allocation8 + $0x28] ss:$16 sps:$4 sm:$0xff]   ;;  %v5913_v1 = vld [vmem:[#allocation8 + $0x4] ss:$16 sps:$4 sm:$0xff]  }
 0x921   :  { %v5806_v62 = vpop.permute.xlu1 %5805 }
 0x922   :  { %v5808_v3 = vunpack.i.h.bf16 %v5806_v62  ;;  %v5807_v4 = vunpack.i.l.bf16 %v5806_v62  ;;  %v5905_v62 = vld [vmem:[#allocation8 + $0x20] ss:$16 sps:$4 sm:$0xff]  }
 0x923   :  { %1981 = vmatpush1.bf16.msra.mxu1 %v5905_v62 }
 0x924   :  { %v1596_v12 = vsel %vm1138_vm10, %v1595_v7, %v5808_v3  ;;  %v1139_v13 = vsel %vm1138_vm10, %v1137_v2, %v5807_v4  ;;  %v5916_v3 = vld [vmem:[#allocation8 + $0xc] ss:$16 sps:$4 sm:$0xff]   ;;  %v5911_v4 = vld [vmem:[#allocation8] ss:$16 sps:$4 sm:$0xff]   ;;  %1982 = vmatprep.subr.bf16.mxu1 %v5913_v1 }
 0x927   :  { %1983 = vmatpush1.bf16.msra.mxu1 %v5911_v4 }
 0x92b   :  { %v5811_v5 = vpop.permute.xlu0 %5810 }
 0x92c   :  { %v5813_v9 = vunpack.i.h.bf16 %v5811_v5  ;;  %v5812_v11 = vunpack.i.l.bf16 %v5811_v5  ;;  %v5914_v5 = vld [vmem:[#allocation8 + $0x8] ss:$16 sps:$4 sm:$0xff]  }
 0x92e   :  { %v1597_v14 = vsel %vm1140_vm11, %v1596_v12, %v5813_v9  ;;  %v1141_v15 = vsel %vm1140_vm11, %v1139_v13, %v5812_v11 }
 0x92f   :  { %v1615_v16 = vpack.c.bf16 %v1597_v14, %v1141_v15 }
 0x931   :  { %5616 = vmatmul.mubr.bf16.vlgmr.msra.gmra.mxu0 %v1615_v16  ;;  %v4976_v16 = vld [vmem:[%s7145_s9] ss:$0 sm:$0xff] }
 0x932   :  { %2043 = vmatprep.mubr.bf16.mxu0 %v6381_v0  ;;  %2012 = vmatpush1.bf16.msra.mxu0 %v5872_v28  ;;  %v5920_v28 = vld [vmem:[#allocation10 + $0xb8] sm:$0xff]  }
 0x933   :  { %2013 = vmatprep.subr.bf16.mxu0 %v5880_v37  ;;  %v5931_v37 = vld [vmem:[#allocation10 + $0x20] sm:$0xff]  }
 0x936   :  { %2014 = vmatpush1.bf16.msra.mxu0 %v5878_v21  ;;  %v5933_v21 = vld [vmem:[#allocation10 + $0x58] sm:$0xff]  }
 0x937   :  { %2015 = vmatprep.subr.bf16.mxu0 %v5886_v40  ;;  %v5935_v40 = vld [vmem:[#allocation10 + $0x18] sm:$0xff]  }
 0x93a   :  { %2016 = vmatpush1.bf16.msra.mxu0 %v5884_v42  ;;  %v5937_v42 = vld [vmem:[#allocation10 + $0x50] sm:$0xff]  }
 0x93b   :  { %2017 = vmatprep.subr.bf16.mxu0 %v5892_v46  ;;  %v5941_v46 = vld [vmem:[#allocation10 + $0x48] sm:$0xff]  }
 0x93e   :  { %2018 = vmatpush1.bf16.msra.mxu0 %v5890_v45  ;;  %v5940_v45 = vld [vmem:[#allocation10 + $0x90] sm:$0xff]  }
 0x93f   :  { %2019 = vmatprep.subr.bf16.mxu0 %v5898_v48  ;;  %v5943_v48 = vld [vmem:[#allocation10 + $0x8] sm:$0xff]  }
 0x942   :  { %2020 = vmatpush1.bf16.msra.mxu0 %v5896_v50  ;;  %v5945_v50 = vld [vmem:[#allocation10 + $0x40] sm:$0xff]  }
 0x943   :  { %2021 = vmatprep.subr.bf16.mxu0 %v5904_v53  ;;  %v5947_v53 = vld [vmem:[#allocation10] sm:$0xff]  }
 0x946   :  { %2022 = vmatpush1.bf16.msra.mxu0 %v5902_v55  ;;  %v1785_v55 = vld [vmem:[%s7148_s12] sm:$0xf] }
 0x947   :  { %2023 = vmatprep.subr.bf16.mxu0 %v5910_v61  ;;  %v1791_v61 = vrot.slane %v1785_v55, %v6582_v8  ;;  %v1799_v62 = vrot.slane %v1785_v55, %v6579_v6  ;;  %v1803_v1 = vrot.slane %v1785_v55, %v1802_v58 }
 0x94a   :  { %2024 = vmatpush1.bf16.msra.mxu0 %v5908_v63  ;;  %v1795_v63 = vrot.slane %v1785_v55, %v6572_v60 }
 0x94b   :  { %2025 = vmatprep.subr.bf16.mxu0 %v5916_v3 }
 0x94e   :  { %2026 = vmatpush1.bf16.msra.mxu0 %v5914_v5 }
 0x94f   :  { %5323 = vmatprep.subr.bf16.mxu0 %v5918_v26 }
 0x9f1   :  { %v1704_v18 = vpop.f32.mrf.mxu0 }
 0x9f2   :  { %v1705_v51 = vadd.f32 %v4967_v17, %v1704_v18 }
 0x9f3   :  { %v5617_v19 = vpop.f32.mrf.mxu0 }
 0x9f4   :  { %v1711_v20 = vadd.f32 %v1705_v51, %v6558_v56  ;;  %v4977_v19 = vld [vmem:[%s7146_s10] ss:$0 sm:$0xff] }
 0x9f5   :  { %v1707_v22 = vpop.f32.mrf.mxu0 }
 0x9f6   :  { %v1708_v23 = vadd.f32 %v4967_v17, %v1707_v22  ;;  %1715 = vadd.xlane.f32.xlu1 %v1711_v20 }
 0x9f7   :  { %v5618_v24 = vpop.f32.mrf.mxu0 }
 0x9f8   :  { %v1712_v25 = vadd.f32 %v1708_v23, %v6560_v57 }
 0x9fa   :  { %1717 = vadd.xlane.f32.xlu0 %v1712_v25 }
 0xa7f   :  { %v1716_v30 = vpop.xlane.xlu1 %1715 }
 0xa80   :  { %v1719_v31 = vmul.f32 0.0078125, %v1716_v30  ;;  %v5922_v30 = vld [vmem:[#allocation10 + $0xf0] sm:$0xff]  }
 0xa82   :  { %v6760_v32 = vsub.f32 %v1711_v20, %v1719_v31  ;;  %v5923_v31 = vld [vmem:[#allocation10 + $0x30] sm:$0xff]  }
 0xa83   :  { %v1718_v56 = vpop.xlane.xlu0 %1717 }
 0xa84   :  { %v1720_v33 = vmul.f32 0.0078125, %v1718_v56  ;;  %v1723_v34 = vmul.f32 %v6760_v32, %v6760_v32  ;;  %v5925_v56 = vld [vmem:[#allocation10 + $0x68] sm:$0xff]  }
 0xa86   :  { %v6764_v35 = vsub.f32 %v1712_v25, %v1720_v33  ;;  %1725 = vadd.xlane.f32.xlu0 %v1723_v34  ;;  %v5917_v25 = vld [vmem:[#allocation10 + $0x78] sm:$0xff]   ;;  %v5926_v33 = vld [vmem:[#allocation10 + $0xe8] sm:$0xff]  }
 0xa87   :  { %5301 = vmatprep.subr.bf16.mxu1 %v5917_v25  ;;  %v5927_v34 = vld [vmem:[#allocation10 + $0x28] sm:$0xff]  }
 0xa88   :  { %v1724_v57 = vmul.f32 %v6764_v35, %v6764_v35 }
 0xa8a   :  { %1727 = vadd.xlane.f32.xlu1 %v1724_v57  ;;  %v5929_v57 = vld [vmem:[#allocation10 + $0x60] sm:$0xff]  }
 0xb0f   :  { %v1726_v7 = vpop.xlane.xlu0 %1725 }
 0xb10   :  { %v1729_v2 = vmul.f32 0.0078125, %v1726_v7 }
 0xb12   :  { %v1731_v9 = vadd.f32 1e-12, %v1729_v2 }
 0xb13   :  { %v1728_v11 = vpop.xlane.xlu1 %1727 }
 0xb14   :  { %6137 = vrsqrt.f32 %v1731_v9  ;;  %v1730_v12 = vmul.f32 0.0078125, %v1728_v11 }
 0xb16   :  { %v1732_v13 = vadd.f32 1e-12, %v1730_v12 }
 0xb18   :  { %6139 = vrsqrt.f32 %v1732_v13 }
 0xb21   :  { %v6138_v14 = vpop.eup %6137 }
 0xb22   :  { %v1735_v15 = vmul.f32 %v6138_v14, %v6760_v32  ;;  %v5924_v32 = vld [vmem:[#allocation10 + $0xb0] sm:$0xff]  }
 0xb24   :  { %v1743_v51 = vmul.f32 %v4976_v16, %v1735_v15 }
 0xb25   :  { %v6140_v17 = vpop.eup %6139 }
 0xb26   :  { %v1736_v18 = vmul.f32 %v6140_v17, %v6764_v35  ;;  %v6776_v22 = vadd.f32 %v4977_v19, %v1743_v51  ;;  %v5928_v35 = vld [vmem:[#allocation10 + $0xa8] sm:$0xff]  }
 0xb28   :  { %v1744_v20 = vmul.f32 %v4976_v16, %v1736_v18 }
 0xb2a   :  { %v6778_v23 = vadd.f32 %v4977_v19, %v1744_v20 }
 0xb2c   :  { %v1786_v24 = vpack.c.bf16 %v6778_v23, %v6776_v22 }
 0xb2e   :  { %2001 = vmatmul.mubr.bf16.vlgmr.msra.gmra.mxu1 %v1786_v24  ;;  %2044 = vmatmul.mubr.bf16.vlgmr.msra.gmra.mxu0 %v1786_v24 }
 0xb2f   :  { %5302 = vmatpush3.bf16.msra.mxu1 %v5919_v27  ;;  %5324 = vmatpush3.bf16.msra.mxu0 %v5920_v28 }
 0xb30   :  { %5303 = vmatprep.subr.bf16.mxu1 %v5921_v29  ;;  %5325 = vmatprep.subr.bf16.mxu0 %v5922_v30 }
 0xb33   :  { %5304 = vmatpush3.bf16.msra.mxu1 %v5923_v31  ;;  %5326 = vmatpush3.bf16.msra.mxu0 %v5924_v32 }
 0xb34   :  { %5305 = vmatprep.subr.bf16.mxu1 %v5925_v56  ;;  %5327 = vmatprep.subr.bf16.mxu0 %v5926_v33 }
 0xb37   :  { %5306 = vmatpush3.bf16.msra.mxu1 %v5927_v34  ;;  %5328 = vmatpush3.bf16.msra.mxu0 %v5928_v35 }
 0xb38   :  { %5307 = vmatprep.subr.bf16.mxu1 %v5929_v57  ;;  %5329 = vmatprep.subr.bf16.mxu0 %v5930_v36 }
 0xb3b   :  { %5308 = vmatpush3.bf16.msra.mxu1 %v5931_v37  ;;  %5330 = vmatpush3.bf16.msra.mxu0 %v5932_v38 }
 0xb3c   :  { %5309 = vmatprep.subr.bf16.mxu1 %v5933_v21  ;;  %5331 = vmatprep.subr.bf16.mxu0 %v5934_v39 }
 0xb3f   :  { %5310 = vmatpush3.bf16.msra.mxu1 %v5935_v40  ;;  %5332 = vmatpush3.bf16.msra.mxu0 %v5936_v41 }
 0xb40   :  { %5311 = vmatprep.subr.bf16.mxu1 %v5937_v42  ;;  %5333 = vmatprep.subr.bf16.mxu0 %v5938_v43 }
 0xb43   :  { %5312 = vmatpush3.bf16.msra.mxu1 %v5939_v44  ;;  %5334 = vmatpush3.bf16.msra.mxu0 %v5940_v45 }
 0xb44   :  { %5313 = vmatprep.subr.bf16.mxu1 %v5941_v46  ;;  %5335 = vmatprep.subr.bf16.mxu0 %v5942_v47 }
 0xb47   :  { %5314 = vmatpush3.bf16.msra.mxu1 %v5943_v48  ;;  %5336 = vmatpush3.bf16.msra.mxu0 %v5944_v49 }
 0xb48   :  { %5315 = vmatprep.subr.bf16.mxu1 %v5945_v50  ;;  %5337 = vmatprep.subr.bf16.mxu0 %v5946_v52 }
 0xb4b   :  { %5316 = vmatpush3.bf16.msra.mxu1 %v5947_v53  ;;  %5338 = vmatpush3.bf16.msra.mxu0 %v5948_v54 }
 0xb4c   :  { %5619 = vmatprep.subr.bf16.mxu0 %v6383_v10 }
 0xbee   :  { %v2002_v3 = vpop.f32.mrf.mxu1  ;;  %v2045_v4 = vpop.f32.mrf.mxu0 }
 0xbef   :  { %v6792_v5 = vadd.f32 %v2002_v3, %v1791_v61  ;;  %v6794_v7 = vadd.f32 %v2045_v4, %v1799_v62 }
 0xbf0   :  { %v2004_v2 = vpop.f32.mrf.mxu1  ;;  %v2047_v9 = vpop.f32.mrf.mxu0 }
 0xbf1   :  { %v2062_v11 = vmul.f32 0.044715, %v6792_v5  ;;  %v2064_v12 = vmul.f32 0.044715, %v6794_v7  ;;  %v2005_v13 = vadd.f32 %v2004_v2, %v1795_v63  ;;  %v6798_v14 = vadd.f32 %v2047_v9, %v1803_v1 }
 0xbf2   :  { %v2006_v15 = vpop.f32.mrf.mxu1  ;;  %v2049_v16 = vpop.f32.mrf.mxu0 }
 0xbf3   :  { %v2070_v17 = vmul.f32 %v2062_v11, %v6792_v5  ;;  %v2072_v18 = vmul.f32 %v2064_v12, %v6794_v7  ;;  %v2063_v51 = vmul.f32 0.044715, %v2005_v13  ;;  %v2065_v19 = vmul.f32 0.044715, %v6798_v14 }
 0xbf4   :  { %v2007_v20 = vadd.f32 %v2006_v15, %v1791_v61  ;;  %v6803_v24 = vadd.f32 %v2049_v16, %v1799_v62  ;;  %v2008_v25 = vpop.f32.mrf.mxu1  ;;  %v2051_v26 = vpop.f32.mrf.mxu0  ;;  %v2055_v16 = vmul.f32 0.5, %v2005_v13 }
 0xbf5   :  { %v2078_v27 = vmul.f32 %v2070_v17, %v6792_v5  ;;  %v2080_v28 = vmul.f32 %v2072_v18, %v6794_v7  ;;  %v2071_v29 = vmul.f32 %v2063_v51, %v2005_v13  ;;  %v2073_v30 = vmul.f32 %v2065_v19, %v6798_v14 }
 0xbf6   :  { %v2066_v31 = vmul.f32 0.044715, %v2007_v20  ;;  %v2068_v32 = vmul.f32 0.044715, %v6803_v24  ;;  %v2009_v56 = vadd.f32 %v2008_v25, %v1795_v63  ;;  %v2052_v33 = vadd.f32 %v2051_v26, %v1803_v1 }
 0xbf7   :  { %v2086_v34 = vadd.f32 %v2078_v27, %v6792_v5  ;;  %v2088_v35 = vadd.f32 %v2080_v28, %v6794_v7  ;;  %v2079_v57 = vmul.f32 %v2071_v29, %v2005_v13  ;;  %v2081_v36 = vmul.f32 %v2073_v30, %v6798_v14 }
 0xbf8   :  { %v2074_v37 = vmul.f32 %v2066_v31, %v2007_v20  ;;  %v2076_v38 = vmul.f32 %v2068_v32, %v6803_v24  ;;  %v2067_v21 = vmul.f32 0.044715, %v2009_v56  ;;  %v2069_v39 = vmul.f32 0.044715, %v2052_v33 }
 0xbf9   :  { %v2094_v40 = vmul.f32 0.7978846, %v2086_v34  ;;  %v2096_v41 = vmul.f32 0.7978846, %v2088_v35  ;;  %v2087_v42 = vadd.f32 %v2079_v57, %v2005_v13  ;;  %v2089_v48 = vadd.f32 %v2081_v36, %v6798_v14 }
 0xbfa   :  { %v2082_v43 = vmul.f32 %v2074_v37, %v2007_v20  ;;  %v2084_v44 = vmul.f32 %v2076_v38, %v6803_v24  ;;  %v2075_v45 = vmul.f32 %v2067_v21, %v2009_v56  ;;  %v2077_v46 = vmul.f32 %v2069_v39, %v2052_v33 }
 0xbfb   :  { %v2095_v47 = vmul.f32 0.7978846, %v2087_v42  ;;  %6141 = vtanh.f32 %v2094_v40  ;;  %v2097_v54 = vmul.f32 0.7978846, %v2089_v48  ;;  %v2054_v18 = vmul.f32 0.5, %v6792_v5 }
 0xbfc   :  { %v2090_v49 = vadd.f32 %v2082_v43, %v2007_v20  ;;  %v2092_v50 = vadd.f32 %v2084_v44, %v6803_v24  ;;  %v2083_v52 = vmul.f32 %v2075_v45, %v2009_v56  ;;  %6143 = vtanh.f32 %v2096_v41 }
 0xbfd   :  { %v2085_v53 = vmul.f32 %v2077_v46, %v2052_v33  ;;  %6145 = vtanh.f32 %v2095_v47  ;;  %v2058_v26 = vmul.f32 0.5, %v2007_v20  ;;  %v2059_v30 = vmul.f32 0.5, %v2009_v56 }
 0xbfe   :  { %v2098_v55 = vmul.f32 0.7978846, %v2090_v49  ;;  %v2100_v61 = vmul.f32 0.7978846, %v2092_v50  ;;  %v2091_v62 = vadd.f32 %v2083_v52, %v2009_v56  ;;  %6147 = vtanh.f32 %v2097_v54 }
 0xbff   :  { %v2093_v63 = vadd.f32 %v2085_v53, %v2052_v33  ;;  %v2060_v32 = vmul.f32 0.5, %v6803_v24  ;;  %v2057_v35 = vmul.f32 0.5, %v6798_v14  ;;  %v2061_v57 = vmul.f32 0.5, %v2052_v33  ;;  %v5010_v33 = vld [vmem:[%s7150_s14] ss:$0 sm:$0xff] }
 0xc00   :  { %6149 = vtanh.f32 %v2098_v55  ;;  %v2099_v1 = vmul.f32 0.7978846, %v2091_v62  ;;  %v2056_v5 = vmul.f32 0.5, %v6794_v7 }
 0xc01   :  { %6151 = vtanh.f32 %v2100_v61  ;;  %v2101_v3 = vmul.f32 0.7978846, %v2093_v63 }
 0xc02   :  { %6153 = vtanh.f32 %v2099_v1 }
 0xc03   :  { %6155 = vtanh.f32 %v2101_v3 }
 0xc08   :  { %v6142_v4 = vpop.eup %6141 }
 0xc09   :  { %v6144_v2 = vpop.eup %6143  ;;  %v2110_v27 = vadd.f32 1.0, %v6142_v4  ;;  %v5949_v4 = vld [vmem:[#allocation5 + $0x168] ss:$12 sps:$4 sm:$0xff]  }
 0xc0a   :  { %v6146_v9 = vpop.eup %6145  ;;  %v2112_v34 = vadd.f32 1.0, %v6144_v2  ;;  %v5951_v2 = vld [vmem:[#allocation5 + $0x16c] ss:$12 sps:$4 sm:$0xff]  }
 0xc0b   :  { %v6148_v11 = vpop.eup %6147  ;;  %v2111_v17 = vadd.f32 1.0, %v6146_v9  ;;  %v2118_v40 = vmul.f32 %v2110_v27, %v2054_v18  ;;  %v5952_v9 = vld [vmem:[#allocation5 + $0x170] ss:$12 sps:$4 sm:$0xff]   ;;  %2697 = vmatprep.subr.bf16.mxu1 %v5951_v2 }
 0xc0c   :  { %v2113_v25 = vadd.f32 1.0, %v6148_v11  ;;  %v2120_v42 = vmul.f32 %v2112_v34, %v2056_v5  ;;  %v5959_v27 = vld [vmem:[#allocation5 + $0x13c] ss:$12 sps:$4 sm:$0xff]   ;;  %v5973_v5 = vld [vmem:[#allocation5 + $0xd8] ss:$12 sps:$4 sm:$0xff]  }
 0xc0d   :  { %v6150_v12 = vpop.eup %6149  ;;  %v2119_v37 = vmul.f32 %v2111_v17, %v2055_v16  ;;  %v5968_v34 = vld [vmem:[#allocation5 + $0x110] ss:$12 sps:$4 sm:$0xff]  }
 0xc0e   :  { %v6152_v15 = vpop.eup %6151  ;;  %v2114_v51 = vadd.f32 1.0, %v6150_v12  ;;  %v2121_v39 = vmul.f32 %v2113_v25, %v2057_v35  ;;  %v5956_v25 = vld [vmem:[#allocation5 + $0x158] ss:$12 sps:$4 sm:$0xff]   ;;  %v5965_v35 = vld [vmem:[#allocation5 + $0x108] ss:$12 sps:$4 sm:$0xff]  }
 0xc0f   :  { %v6154_v19 = vpop.eup %6153  ;;  %v2116_v28 = vadd.f32 1.0, %v6152_v15 }
 0xc10   :  { %v6156_v29 = vpop.eup %6155  ;;  %v2115_v31 = vadd.f32 1.0, %v6154_v19  ;;  %v2122_v13 = vmul.f32 %v2114_v51, %v2058_v26  ;;  %v5953_v51 = vld [vmem:[#allocation5 + $0x150] ss:$12 sps:$4 sm:$0xff]   ;;  %v5955_v19 = vld [vmem:[#allocation5 + $0x154] ss:$12 sps:$4 sm:$0xff]  }
 0xc11   :  { %v2117_v36 = vadd.f32 1.0, %v6156_v29  ;;  %v2124_v21 = vmul.f32 %v2116_v28, %v2060_v32  ;;  %v5957_v26 = vld [vmem:[#allocation5 + $0x138] ss:$12 sps:$4 sm:$0xff]   ;;  %v5960_v28 = vld [vmem:[#allocation5 + $0x140] ss:$12 sps:$4 sm:$0xff]  }
 0xc12   :  { %v2123_v38 = vmul.f32 %v2115_v31, %v2059_v30  ;;  %v2191_v43 = vpack.c.bf16 %v2122_v13, %v2118_v40  ;;  %v5963_v29 = vld [vmem:[#allocation5 + $0x124] ss:$12 sps:$4 sm:$0xff]   ;;  %v5964_v30 = vld [vmem:[#allocation5 + $0x128] ss:$12 sps:$4 sm:$0xff]   ;;  %v5961_v31 = vld [vmem:[#allocation5 + $0x120] ss:$12 sps:$4 sm:$0xff]  }
 0xc13   :  { %v2125_v20 = vmul.f32 %v2117_v36, %v2061_v57  ;;  %v2193_v24 = vpack.c.bf16 %v2124_v21, %v2120_v42  ;;  %v5967_v32 = vld [vmem:[#allocation5 + $0x10c] ss:$12 sps:$4 sm:$0xff]   ;;  %v5971_v57 = vld [vmem:[#allocation5 + $0xf4] ss:$12 sps:$4 sm:$0xff]   ;;  %v5969_v13 = vld [vmem:[#allocation5 + $0xf0] ss:$12 sps:$4 sm:$0xff]  }
 0xc14   :  { %v2192_v41 = vpack.c.bf16 %v2123_v38, %v2119_v37  ;;  %v5972_v36 = vld [vmem:[#allocation5 + $0xf8] ss:$12 sps:$4 sm:$0xff]   ;;  %v5975_v37 = vld [vmem:[#allocation5 + $0xdc] ss:$12 sps:$4 sm:$0xff]   ;;  %v5976_v38 = vld [vmem:[#allocation5 + $0xe0] ss:$12 sps:$4 sm:$0xff]  }
 0xc15   :  { %v2194_v56 = vpack.c.bf16 %v2125_v20, %v2121_v39  ;;  %v5979_v21 = vld [vmem:[#allocation5 + $0xc4] ss:$12 sps:$4 sm:$0xff]   ;;  %v5980_v39 = vld [vmem:[#allocation5 + $0xc8] ss:$12 sps:$4 sm:$0xff]   ;;  %v5977_v20 = vld [vmem:[#allocation5 + $0xc0] ss:$12 sps:$4 sm:$0xff]  }
 0xc16   :  { %2425 = vmatprep.mubr.bf16.mxu1 %v2192_v41 }
 0xc17   :  { %2466 = vmatprep.mubr.bf16.mxu0 %v2194_v56  ;;  %2426 = vmatmul.mubr.bf16.vlgmr.msra.gmra.mxu1 %v2191_v43 }
 0xc18   :  { %2467 = vmatmul.mubr.bf16.vlgmr.msra.gmra.mxu0 %v2193_v24  ;;  %2729 = vmatprep.mubr.bf16.mxu1 %v6381_v0 }
 0xc19   :  { %5635 = vmatprep.mubr.msk.bf16.mxu0 %vm6384_vm6, %v6383_v10  ;;  %5620 = vmatpush3.bf16.msra.mxu0 %v5952_v9 }
 0xc1a   :  { %2698 = vmatpush1.bf16.msra.mxu1 %v5949_v4  ;;  %5621 = vmatprep.subr.bf16.mxu0 %v6383_v10 }
 0xc1b   :  { %2699 = vmatprep.subr.bf16.mxu1 %v5955_v19 }
 0xc1d   :  { %5622 = vmatpush3.bf16.msra.mxu0 %v5956_v25 }
 0xc1e   :  { %2700 = vmatpush1.bf16.msra.mxu1 %v5953_v51  ;;  %5623 = vmatprep.subr.bf16.mxu0 %v6383_v10 }
 0xc1f   :  { %2701 = vmatprep.subr.bf16.mxu1 %v5959_v27 }
 0xc21   :  { %5624 = vmatpush3.bf16.msra.mxu0 %v5960_v28 }
 0xc22   :  { %2702 = vmatpush1.bf16.msra.mxu1 %v5957_v26  ;;  %5625 = vmatprep.subr.bf16.mxu0 %v6383_v10 }
 0xc23   :  { %2703 = vmatprep.subr.bf16.mxu1 %v5963_v29 }
 0xc25   :  { %5626 = vmatpush3.bf16.msra.mxu0 %v5964_v30 }
 0xc26   :  { %2704 = vmatpush1.bf16.msra.mxu1 %v5961_v31  ;;  %5627 = vmatprep.subr.bf16.mxu0 %v6383_v10 }
 0xc27   :  { %2705 = vmatprep.subr.bf16.mxu1 %v5967_v32 }
 0xc29   :  { %5628 = vmatpush3.bf16.msra.mxu0 %v5968_v34 }
 0xc2a   :  { %2706 = vmatpush1.bf16.msra.mxu1 %v5965_v35  ;;  %5629 = vmatprep.subr.bf16.mxu0 %v6383_v10 }
 0xc2b   :  { %2707 = vmatprep.subr.bf16.mxu1 %v5971_v57 }
 0xc2d   :  { %5630 = vmatpush3.bf16.msra.mxu0 %v5972_v36 }
 0xc2e   :  { %2708 = vmatpush1.bf16.msra.mxu1 %v5969_v13  ;;  %5631 = vmatprep.subr.bf16.mxu0 %v6383_v10 }
 0xc2f   :  { %2709 = vmatprep.subr.bf16.mxu1 %v5975_v37 }
 0xc31   :  { %5632 = vmatpush3.bf16.msra.mxu0 %v5976_v38 }
 0xc32   :  { %2710 = vmatpush1.bf16.msra.mxu1 %v5973_v5  ;;  %5633 = vmatprep.subr.bf16.mxu0 %v6383_v10 }
 0xc33   :  { %2711 = vmatprep.subr.bf16.mxu1 %v5979_v21 }
 0xc35   :  { %5634 = vmatpush3.bf16.msra.mxu0 %v5980_v39 }
 0xc36   :  { %2712 = vmatpush1.bf16.msra.mxu1 %v5977_v20  ;;  %5663 = vmatprep.subr.bf16.mxu0 %v6383_v10 }
 0xc37   :  { %5639 = vmatprep.subr.bf16.mxu1 %v6383_v10 }
 0xcd7   :  { %v5317_v14 = vpop.f32.mrf.mxu1 }
 0xcd8   :  { %v5339_v7 = vpop.f32.mrf.mxu0 }
 0xcd9   :  { %v5318_v44 = vpop.f32.mrf.mxu1 }
 0xcda   :  { %v5319_v45 = vadd.f32 %v5318_v44, %v5317_v14  ;;  %v5340_v46 = vpop.f32.mrf.mxu0 }
 0xcdb   :  { %v5320_v47 = vpop.f32.mrf.mxu1  ;;  %v5341_v49 = vadd.f32 %v5340_v46, %v5339_v7 }
 0xcdc   :  { %v2428_v48 = vadd.f32 %v5319_v45, %v5010_v33  ;;  %v5342_v50 = vpop.f32.mrf.mxu0 }
 0xcdd   :  { %v5321_v52 = vpop.f32.mrf.mxu1 }
 0xcde   :  { %v2469_v53 = vadd.f32 %v5341_v49, %v2428_v48  ;;  %v5322_v54 = vadd.f32 %v5321_v52, %v5320_v47  ;;  %v5343_v55 = vpop.f32.mrf.mxu0  ;;  %v5044_v47 = vld [vmem:[%s7152_s16] ss:$0 sm:$0xff] }
 0xcdf   :  { %v5344_v62 = vadd.f32 %v5343_v55, %v5342_v50  ;;  %v5045_v55 = vld [vmem:[%s7142_s6 + $0x3] sm:$0x7] }
 0xce0   :  { %v2431_v61 = vadd.f32 %v5322_v54, %v5010_v33  ;;  %v2475_v63 = vadd.f32 %v2469_v53, %v6776_v22  ;;  %v5043_v33 = vld [vmem:[%s7151_s15] ss:$0 sm:$0xff] }
 0xce2   :  { %v2472_v1 = vadd.f32 %v5344_v62, %v2431_v61  ;;  %2479 = vadd.xlane.f32.xlu0 %v2475_v63 }
 0xce4   :  { %v2476_v3 = vadd.f32 %v2472_v1, %v6778_v23 }
 0xce6   :  { %2481 = vadd.xlane.f32.xlu1 %v2476_v3 }
 0xd6b   :  { %v2480_v11 = vpop.xlane.xlu0 %2479 }
 0xd6c   :  { %v2483_v12 = vmul.f32 0.0078125, %v2480_v11 }
 0xd6e   :  { %v6829_v15 = vsub.f32 %v2475_v63, %v2483_v12  ;;  %v2561_v63 = vrot.slane %v5045_v55, %v6572_v60  ;;  %v2565_v12 = vrot.slane %v5045_v55, %v6579_v6 }
 0xd6f   :  { %v2482_v16 = vpop.xlane.xlu1 %2481 }
 0xd70   :  { %v2484_v17 = vmul.f32 0.0078125, %v2482_v16  ;;  %v2487_v22 = vmul.f32 %v6829_v15, %v6829_v15  ;;  %v2557_v16 = vrot.slane %v5045_v55, %v6582_v8 }
 0xd72   :  { %v6833_v18 = vsub.f32 %v2476_v3, %v2484_v17  ;;  %2489 = vadd.xlane.f32.xlu0 %v2487_v22 }
 0xd74   :  { %v2488_v23 = vmul.f32 %v6833_v18, %v6833_v18 }
 0xd76   :  { %2491 = vadd.xlane.f32.xlu1 %v2488_v23 }
 0xdfb   :  { %v2490_v40 = vpop.xlane.xlu0 %2489 }
 0xdfc   :  { %v2493_v41 = vmul.f32 0.0078125, %v2490_v40 }
 0xdfe   :  { %v2495_v42 = vadd.f32 1e-12, %v2493_v41 }
 0xdff   :  { %v2492_v56 = vpop.xlane.xlu1 %2491 }
 0xe00   :  { %6157 = vrsqrt.f32 %v2495_v42  ;;  %v2494_v43 = vmul.f32 0.0078125, %v2492_v56 }
 0xe02   :  { %v2496_v24 = vadd.f32 1e-12, %v2494_v43 }
 0xe04   :  { %6159 = vrsqrt.f32 %v2496_v24 }
 0xe0d   :  { %v6158_v14 = vpop.eup %6157 }
 0xe0e   :  { %v2499_v7 = vmul.f32 %v6158_v14, %v6829_v15 }
 0xe10   :  { %v2507_v46 = vmul.f32 %v5043_v33, %v2499_v7 }
 0xe11   :  { %v6160_v44 = vpop.eup %6159 }
 0xe12   :  { %v2500_v45 = vmul.f32 %v6160_v44, %v6833_v18  ;;  %v6853_v49 = vadd.f32 %v5044_v47, %v2507_v46 }
 0xe14   :  { %v2508_v48 = vmul.f32 %v5043_v33, %v2500_v45 }
 0xe16   :  { %v6855_v50 = vadd.f32 %v5044_v47, %v2508_v48 }
 0xe18   :  { %v2552_v52 = vpack.c.bf16 %v6855_v50, %v6853_v49 }
 0xe1a   :  { %2730 = vmatmul.mubr.bf16.vlgmr.msra.gmra.mxu1 %v2552_v52  ;;  %5636 = vmatmul.mubr.bf16.vlgmr.msra.gmra.mxu0 %v2552_v52 }
 0xe1b   :  { %5641 = vmatprep.mubr.msk.bf16.mxu1 %vm6384_vm6, %v6383_v10  ;;  %5665 = vmatprep.mubr.msk.bf16.mxu0 %vm6384_vm6, %v6383_v10 }
 0xeda   :  { %v2731_v53 = vpop.f32.mrf.mxu1  ;;  %v2774_v54 = vpop.f32.mrf.mxu0 }
 0xedb   :  { %v2775_v18 = vadd.f32 %v2774_v54, %v2565_v12  ;;  %v2732_v51 = vadd.f32 %v2731_v53, %v2557_v16 }
 0xedc   :  { %v2733_v61 = vpop.f32.mrf.mxu1  ;;  %v5637_v62 = vpop.f32.mrf.mxu0 }
 0xedd   :  { %v2734_v9 = vadd.f32 %v2733_v61, %v2561_v63 }
 0xede   :  { %v2735_v1 = vpop.f32.mrf.mxu1  ;;  %v2777_v3 = vpop.f32.mrf.mxu0 }
 0xedf   :  { %v2778_v17 = vadd.f32 %v2777_v3, %v2565_v12  ;;  %v2736_v23 = vadd.f32 %v2735_v1, %v2557_v16 }
 0xee0   :  { %v2737_v4 = vpop.f32.mrf.mxu1  ;;  %v5638_v2 = vpop.f32.mrf.mxu0 }
 0xee1   :  { %v2738_v11 = vadd.f32 %v2737_v4, %v2561_v63  ;;  %v6871_v19 = vpack.c.bf16 %v2778_v17, %v2775_v18  ;;  %v2781_v25 = vpack.c.bf16 %v2736_v23, %v2732_v51 }
 0xee3   :  { %v2782_v15 = vpack.c.bf16 %v2738_v11, %v2734_v9  ;;  %v2847_v26 = vsel %vm745_vm8, %v6871_v19, 0  ;;  %v3240_v34 = vrot.slane %v2781_v25, 4 }
 0xee5   :  { %v2788_v22 = vsel %vm681_vm7, %v2782_v15, 0  ;;  %v3241_v38 = vrot.slane %v2782_v15, 4 }
 0xee6   :  { %5640 = vmatpush3.bf16.xpose.msra.mxu1 %v2788_v22 }
 0xee7   :  { %5645 = vmatprep.subr.bf16.mxu1 %v6383_v10  ;;  %v3246_v44 = vsel %vm681_vm7, %v3241_v38, 0 }
 0xeed   :  { %5642 = vmatmul.mubr.msk.bf16.vlgmr.msra.gmra.mxu1 %vm681_vm7, %v2781_v25 }
 0xeee   :  { %5646 = vmatpush3.bf16.msra.mxu1 %v2847_v26  ;;  %5647 = vmatprep.mubr.msk.bf16.mxu1 %vm6384_vm6, %v6383_v10 }
 0xeef   :  { %5651 = vmatprep.subr.bf16.mxu1 %v6383_v10 }
 0xfad   :  { %v2824_v27 = vpop.f32.mrf.mxu1 }
 0xfae   :  { %v2830_v28 = vmul.f32 0.17677669, %v2824_v27 }
 0xfaf   :  { %v5643_v29 = vpop.f32.mrf.mxu1 }
 0xfb0   :  { %v2831_v30 = vsel %vm729_vm9, %v2830_v28, -inf }
 0xfb1   :  { %2832 = vmax.xlane.f32.xlu0 %v2831_v30  ;;  %v2827_v31 = vpop.f32.mrf.mxu1 }
 0xfb3   :  { %v5644_v32 = vpop.f32.mrf.mxu1 }
 0xfc7   :  { %2893 = vrot.lane.b32.xlu0 %v2782_v15, %s6386_s7 }
 0xfcb   :  { %3003 = vrot.lane.b32.xlu0 %v2781_v25, %s6377_s24 }
 0xfcf   :  { %3114 = vrot.lane.b32.xlu0 %v2781_v25, %s6385_s22 }
 0xfd3   :  { %3348 = vrot.lane.b32.xlu0 %v3240_v34, %s6386_s7 }
 0xfd7   :  { %3459 = vrot.lane.b32.xlu0 %v3240_v34, %s6377_s24 }
 0xfdb   :  { %3570 = vrot.lane.b32.xlu0 %v3240_v34, %s6385_s22 }
0x103a   :  { %v2833_v35 = vpop.xlane.xlu0 %2832 }
0x103b   :  { %v2834_v57 = vsub.f32 %v2830_v28, %v2833_v35 }
0x103d   :  { %v2835_v36 = vmul.f32 1.442695, %v2834_v57 }
0x103e   :  { %v2894_v40 = vpop.permute.xlu0 %2893 }
0x103f   :  { %6161 = vpow2.f32 %v2835_v36  ;;  %v2899_v7 = vsel %vm681_vm7, %v2894_v40, 0 }
0x1042   :  { %v3004_v43 = vpop.permute.xlu0 %3003 }
0x1046   :  { %v3115_v33 = vpop.permute.xlu0 %3114 }
0x104a   :  { %v3349_v48 = vpop.permute.xlu0 %3348 }
0x104c   :  { %v6162_v13 = vpop.eup %6161 }
0x104d   :  { %v2837_v37 = vsel %vm729_vm9, %v6162_v13, 0.0 }
0x104e   :  { %2838 = vadd.xlane.f32.xlu1 %v2837_v37  ;;  %v3460_v54 = vpop.permute.xlu0 %3459 }
0x1052   :  { %v3571_v61 = vpop.permute.xlu0 %3570 }
0x105f   :  { %2890 = vrot.lane.b32.xlu1 %v2781_v25, %s6386_s7 }
0x1063   :  { %3005 = vrot.lane.b32.xlu1 %v2782_v15, %s6377_s24 }
0x1067   :  { %3116 = vrot.lane.b32.xlu1 %v2782_v15, %s6385_s22 }
0x106b   :  { %3350 = vrot.lane.b32.xlu1 %v3241_v38, %s6386_s7 }
0x106f   :  { %3461 = vrot.lane.b32.xlu1 %v3241_v38, %s6377_s24 }
0x1073   :  { %3572 = vrot.lane.b32.xlu1 %v3241_v38, %s6385_s22 }
0x10d7   :  { %v2839_v5 = vpop.xlane.xlu1 %2838 }
0x10d8   :  { %6163 = vrcp.f32 %v2839_v5 }
0x10db   :  { %v2891_v21 = vpop.permute.xlu1 %2890 }
0x10df   :  { %v3006_v39 = vpop.permute.xlu1 %3005 }
0x10e0   :  { %v3011_v20 = vsel %vm681_vm7, %v3006_v39, 0 }
0x10e1   :  { %5664 = vmatpush3.bf16.xpose.msra.mxu0 %v3011_v20 }
0x10e2   :  { %5675 = vmatprep.subr.bf16.mxu0 %v6383_v10 }
0x10e3   :  { %v3117_v42 = vpop.permute.xlu1 %3116 }
0x10e4   :  { %v3122_v24 = vsel %vm681_vm7, %v3117_v42, 0 }
0x10e5   :  { %v6164_v41 = vpop.eup %6163 }
0x10e6   :  { %v2841_v56 = vmul.f32 %v6164_v41, %v6162_v13 }
0x10e7   :  { %v3351_v45 = vpop.permute.xlu1 %3350 }
0x10e8   :  { %5666 = vmatmul.mubr.msk.bf16.vlgmr.msra.gmra.mxu0 %vm681_vm7, %v3004_v43  ;;  %v2842_v14 = vpack.c.bf16 %v2841_v56, %v2841_v56  ;;  %v3356_v46 = vsel %vm681_vm7, %v3351_v45, 0 }
0x10e9   :  { %5676 = vmatpush3.bf16.xpose.msra.mxu0 %v3122_v24  ;;  %5677 = vmatprep.mubr.msk.bf16.mxu0 %vm6384_vm6, %v6383_v10 }
0x10ea   :  { %5648 = vmatmul.mubr.msk.bf16.vlgmr.msra.gmra.mxu1 %vm729_vm9, %v2842_v14  ;;  %5687 = vmatprep.subr.bf16.mxu0 %v6383_v10 }
0x10eb   :  { %5652 = vmatpush3.bf16.xpose.msra.mxu1 %v2899_v7  ;;  %5653 = vmatprep.mubr.msk.bf16.mxu1 %vm6384_vm6, %v6383_v10  ;;  %v3462_v47 = vpop.permute.xlu1 %3461 }
0x10ec   :  { %5657 = vmatprep.subr.bf16.mxu1 %v6383_v10  ;;  %v3467_v52 = vsel %vm681_vm7, %v3462_v47, 0 }
0x10ef   :  { %v3573_v53 = vpop.permute.xlu1 %3572 }
0x10f0   :  { %5678 = vmatmul.mubr.msk.bf16.vlgmr.msra.gmra.mxu0 %vm681_vm7, %v3115_v33  ;;  %v3578_v55 = vsel %vm681_vm7, %v3573_v53, 0 }
0x10f1   :  { %5688 = vmatpush3.bf16.xpose.msra.mxu0 %v3246_v44  ;;  %5689 = vmatprep.mubr.msk.bf16.mxu0 %vm6384_vm6, %v6383_v10 }
0x10f2   :  { %5654 = vmatmul.mubr.msk.bf16.vlgmr.msra.gmra.mxu1 %vm681_vm7, %v2891_v21  ;;  %5699 = vmatprep.subr.bf16.mxu0 %v6383_v10 }
0x10f3   :  { %5659 = vmatprep.mubr.msk.bf16.mxu1 %vm6384_vm6, %v6383_v10 }
0x10f8   :  { %5690 = vmatmul.mubr.msk.bf16.vlgmr.msra.gmra.mxu0 %vm681_vm7, %v3240_v34 }
0x10f9   :  { %5700 = vmatpush3.bf16.xpose.msra.mxu0 %v3356_v46  ;;  %5701 = vmatprep.mubr.msk.bf16.mxu0 %vm6384_vm6, %v6383_v10 }
0x10fa   :  { %5711 = vmatprep.subr.bf16.mxu0 %v6383_v10 }
0x1100   :  { %5702 = vmatmul.mubr.msk.bf16.vlgmr.msra.gmra.mxu0 %vm681_vm7, %v3349_v48 }
0x1101   :  { %5712 = vmatpush3.bf16.xpose.msra.mxu0 %v3467_v52  ;;  %5713 = vmatprep.mubr.msk.bf16.mxu0 %vm6384_vm6, %v6383_v10 }
0x1102   :  { %5723 = vmatprep.subr.bf16.mxu0 %v6383_v10 }
0x1108   :  { %5714 = vmatmul.mubr.msk.bf16.vlgmr.msra.gmra.mxu0 %vm681_vm7, %v3460_v54 }
0x1109   :  { %5724 = vmatpush3.bf16.xpose.msra.mxu0 %v3578_v55  ;;  %5725 = vmatprep.mubr.msk.bf16.mxu0 %vm6384_vm6, %v6383_v10 }
0x110a   :  { %5735 = vmatprep.subr.bf16.mxu0 %v6383_v10 }
0x1110   :  { %5726 = vmatmul.mubr.msk.bf16.vlgmr.msra.gmra.mxu0 %vm681_vm7, %v3571_v61 }
0x1111   :  { %5751 = vmatprep.mubr.msk.bf16.mxu0 %vm6384_vm6, %v6383_v10 }
0x11a8   :  { %v3047_v62 = vpop.f32.mrf.mxu0 }
0x11a9   :  { %v3053_v63 = vmul.f32 0.17677669, %v3047_v62 }
0x11aa   :  { %v6931_v1 = vpop.f32.mrf.mxu1  ;;  %v5667_v3 = vpop.f32.mrf.mxu0 }
0x11ab   :  { %v3054_v4 = vsel %vm729_vm9, %v3053_v63, -inf }
0x11ac   :  { %3055 = vmax.xlane.f32.xlu0 %v3054_v4  ;;  %v5649_v2 = vpop.f32.mrf.mxu1  ;;  %v3050_v9 = vpop.f32.mrf.mxu0 }
0x11ae   :  { %v2886_v11 = vpop.f32.mrf.mxu1  ;;  %v5668_v12 = vpop.f32.mrf.mxu0 }
0x11b0   :  { %v5650_v15 = vpop.f32.mrf.mxu1  ;;  %v3158_v16 = vpop.f32.mrf.mxu0 }
0x11b1   :  { %v3164_v17 = vmul.f32 0.17677669, %v3158_v16 }
0x11b2   :  { %v2935_v22 = vpop.f32.mrf.mxu1  ;;  %v5679_v18 = vpop.f32.mrf.mxu0 }
0x11b3   :  { %v2941_v23 = vmul.f32 0.17677669, %v2935_v22  ;;  %v3165_v51 = vsel %vm729_vm9, %v3164_v17, -inf }
0x11b4   :  { %3166 = vmax.xlane.f32.xlu0 %v3165_v51  ;;  %v5655_v25 = vpop.f32.mrf.mxu1  ;;  %v3161_v26 = vpop.f32.mrf.mxu0 }
0x11b5   :  { %v2942_v27 = vsel %vm729_vm9, %v2941_v23, -inf }
0x11b6   :  { %v5680_v28 = vpop.f32.mrf.mxu0  ;;  %2943 = vmax.xlane.f32.xlu1 %v2942_v27  ;;  %v2938_v29 = vpop.f32.mrf.mxu1 }
0x11b8   :  { %v5656_v30 = vpop.f32.mrf.mxu1  ;;  %v3282_v31 = vpop.f32.mrf.mxu0 }
0x11b9   :  { %v3288_v32 = vmul.f32 0.17677669, %v3282_v31 }
0x11ba   :  { %v5691_v34 = vpop.f32.mrf.mxu0 }
0x11bb   :  { %v3289_v35 = vsel %vm729_vm9, %v3288_v32, -inf }
0x11bc   :  { %v3285_v57 = vpop.f32.mrf.mxu0  ;;  %3290 = vmax.xlane.f32.xlu1 %v3289_v35 }
0x11be   :  { %v5692_v36 = vpop.f32.mrf.mxu0 }
0x11c0   :  { %v3392_v13 = vpop.f32.mrf.mxu0 }
0x11c1   :  { %v3398_v37 = vmul.f32 0.17677669, %v3392_v13  ;;  %v3301_v13 = vrot.slane %v6871_v19, 4 }
0x11c2   :  { %v5703_v38 = vpop.f32.mrf.mxu0 }
0x11c3   :  { %v3399_v5 = vsel %vm729_vm9, %v3398_v37, -inf }
0x11c4   :  { %3400 = vmax.xlane.f32.xlu0 %v3399_v5  ;;  %v3395_v21 = vpop.f32.mrf.mxu0 }
0x11c6   :  { %v5704_v39 = vpop.f32.mrf.mxu0 }
0x11c8   :  { %v3503_v20 = vpop.f32.mrf.mxu0 }
0x11c9   :  { %v3509_v40 = vmul.f32 0.17677669, %v3503_v20 }
0x11ca   :  { %v5715_v41 = vpop.f32.mrf.mxu0 }
0x11cb   :  { %v3510_v42 = vsel %vm729_vm9, %v3509_v40, -inf }
0x11cc   :  { %v3506_v56 = vpop.f32.mrf.mxu0  ;;  %3511 = vmax.xlane.f32.xlu1 %v3510_v42 }
0x11ce   :  { %v5716_v43 = vpop.f32.mrf.mxu0 }
0x11d0   :  { %v3614_v24 = vpop.f32.mrf.mxu0 }
0x11d1   :  { %v3620_v14 = vmul.f32 0.17677669, %v3614_v24 }
0x11d2   :  { %v5727_v7 = vpop.f32.mrf.mxu0 }
0x11d3   :  { %v3621_v33 = vsel %vm729_vm9, %v3620_v14, -inf }
0x11d4   :  { %3622 = vmax.xlane.f32.xlu0 %v3621_v33  ;;  %v3617_v44 = vpop.f32.mrf.mxu0 }
0x11d6   :  { %v5728_v45 = vpop.f32.mrf.mxu0 }
0x1235   :  { %v3056_v46 = vpop.xlane.xlu0 %3055 }
0x1236   :  { %v3057_v47 = vsub.f32 %v3053_v63, %v3056_v46 }
0x1238   :  { %v3058_v48 = vmul.f32 1.442695, %v3057_v47 }
0x123a   :  { %6165 = vpow2.f32 %v3058_v48 }
0x123d   :  { %v3167_v52 = vpop.xlane.xlu0 %3166 }
0x123e   :  { %v3168_v53 = vsub.f32 %v3164_v17, %v3167_v52  ;;  %v3306_v52 = vsel %vm745_vm8, %v3301_v13, 0 }
0x123f   :  { %v2944_v54 = vpop.xlane.xlu1 %2943 }
0x1240   :  { %v3169_v55 = vmul.f32 1.442695, %v3168_v53  ;;  %v2945_v61 = vsub.f32 %v2941_v23, %v2944_v54 }
0x1242   :  { %6167 = vpow2.f32 %v3169_v55  ;;  %v2946_v62 = vmul.f32 1.442695, %v2945_v61 }
0x1244   :  { %6169 = vpow2.f32 %v2946_v62 }
0x1245   :  { %v3291_v3 = vpop.xlane.xlu1 %3290 }
0x1246   :  { %v3292_v4 = vsub.f32 %v3288_v32, %v3291_v3 }
0x1247   :  { %v6940_v2 = vpop.eup %6165 }
0x1248   :  { %v3293_v9 = vmul.f32 1.442695, %v3292_v4  ;;  %v3060_v11 = vsel %vm729_vm9, %v6940_v2, 0.0 }
0x1249   :  { %3061 = vadd.xlane.f32.xlu0 %v3060_v11 }
0x124a   :  { %6171 = vpow2.f32 %v3293_v9 }
0x124d   :  { %v3401_v63 = vpop.xlane.xlu0 %3400 }
0x124e   :  { %v3402_v12 = vsub.f32 %v3398_v37, %v3401_v63 }
0x124f   :  { %v6944_v15 = vpop.eup %6167 }
0x1250   :  { %v3403_v16 = vmul.f32 1.442695, %v3402_v12  ;;  %v3171_v17 = vsel %vm729_vm9, %v6944_v15, 0.0 }
0x1251   :  { %v6170_v22 = vpop.eup %6169  ;;  %3172 = vadd.xlane.f32.xlu1 %v3171_v17 }
0x1252   :  { %6173 = vpow2.f32 %v3403_v16  ;;  %v2948_v18 = vsel %vm729_vm9, %v6170_v22, 0.0 }
0x1255   :  { %2949 = vadd.xlane.f32.xlu1 %v2948_v18  ;;  %v3512_v27 = vpop.xlane.xlu1 %3511 }
0x1256   :  { %v3513_v28 = vsub.f32 %v3509_v40, %v3512_v27 }
0x1257   :  { %v6949_v23 = vpop.eup %6171 }
0x1258   :  { %v3295_v51 = vsel %vm729_vm9, %v6949_v23, 0.0  ;;  %v3514_v29 = vmul.f32 1.442695, %v3513_v28 }
0x1259   :  { %3296 = vadd.xlane.f32.xlu0 %v3295_v51 }
0x125a   :  { %6175 = vpow2.f32 %v3514_v29 }
0x125d   :  { %v3623_v30 = vpop.xlane.xlu0 %3622 }
0x125e   :  { %v3624_v31 = vsub.f32 %v3620_v14, %v3623_v30 }
0x125f   :  { %v6953_v25 = vpop.eup %6173 }
0x1260   :  { %v3405_v26 = vsel %vm729_vm9, %v6953_v25, 0.0  ;;  %v3625_v32 = vmul.f32 1.442695, %v3624_v31 }
0x1261   :  { %3406 = vadd.xlane.f32.xlu0 %v3405_v26 }
0x1262   :  { %6177 = vpow2.f32 %v3625_v32 }
0x1266   :  { %2955 = vrot.lane.b32.xlu1 %v6871_v19, %s6386_s7 }
0x1267   :  { %v6963_v34 = vpop.eup %6175 }
0x1268   :  { %v3516_v35 = vsel %vm729_vm9, %v6963_v34, 0.0 }
0x126f   :  { %v6967_v57 = vpop.eup %6177 }
0x1270   :  { %v3627_v36 = vsel %vm729_vm9, %v6967_v57, 0.0 }
0x1277   :  { %3066 = vrot.lane.b32.xlu0 %v6871_v19, %s6377_s24 }
0x127b   :  { %3177 = vrot.lane.b32.xlu0 %v6871_v19, %s6385_s22 }
0x128a   :  { %3517 = vadd.xlane.f32.xlu1 %v3516_v35 }
0x129a   :  { %3628 = vadd.xlane.f32.xlu0 %v3627_v36 }
0x129b   :  { %3411 = vrot.lane.b32.xlu1 %v3301_v13, %s6386_s7 }
0x129f   :  { %3633 = vrot.lane.b32.xlu1 %v3301_v13, %s6385_s22 }
0x12b0   :  { %3522 = vrot.lane.b32.xlu0 %v3301_v13, %s6377_s24 }
0x12d2   :  { %v3062_v5 = vpop.xlane.xlu0 %3061 }
0x12da   :  { %v3173_v37 = vpop.xlane.xlu1 %3172 }
0x12de   :  { %v2950_v38 = vpop.xlane.xlu1 %2949 }
0x12df   :  { %6179 = vrcp.f32 %v2950_v38 }
0x12e0   :  { %6181 = vrcp.f32 %v3062_v5 }
0x12e1   :  { %6183 = vrcp.f32 %v3173_v37 }
0x12e2   :  { %v2956_v21 = vpop.permute.xlu1 %2955  ;;  %v3297_v20 = vpop.xlane.xlu0 %3296 }
0x12e3   :  { %v2961_v39 = vsel %vm745_vm8, %v2956_v21, 0  ;;  %6185 = vrcp.f32 %v3297_v20  ;;  %v5981_v21 = vld [vmem:[#allocation7 + $0x78] sm:$0xff]   ;;  %v5983_v20 = vld [vmem:[#allocation7 + $0x68] sm:$0xff]  }
0x12e4   :  { %5658 = vmatpush3.bf16.msra.mxu1 %v2961_v39  ;;  %5736 = vmatpush3.bf16.msra.mxu0 %v5981_v21  ;;  %v5982_v39 = vld [vmem:[#allocation7 + $0x70] sm:$0xff]  }
0x12e5   :  { %5669 = vmatprep.subr.bf16.mxu1 %v6383_v10  ;;  %5737 = vmatprep.subr.bf16.mxu0 %v6383_v10 }
0x12e8   :  { %5738 = vmatpush3.bf16.msra.mxu0 %v5982_v39 }
0x12e9   :  { %5739 = vmatprep.subr.bf16.mxu0 %v6383_v10 }
0x12ea   :  { %v3407_v19 = vpop.xlane.xlu0 %3406 }
0x12eb   :  { %6187 = vrcp.f32 %v3407_v19 }
0x12ec   :  { %v6180_v40 = vpop.eup %6179  ;;  %5740 = vmatpush3.bf16.msra.mxu0 %v5983_v20 }
0x12ed   :  { %v2952_v41 = vmul.f32 %v6180_v40, %v6170_v22  ;;  %v6182_v24 = vpop.eup %6181  ;;  %5741 = vmatprep.subr.bf16.mxu0 %v6383_v10 }
0x12ee   :  { %v3067_v42 = vpop.permute.xlu0 %3066  ;;  %v3064_v14 = vmul.f32 %v6182_v24, %v6940_v2  ;;  %v6184_v44 = vpop.eup %6183  ;;  %v5985_v24 = vld [vmem:[#allocation7 + $0x58] sm:$0xff]  }
0x12ef   :  { %v3072_v56 = vsel %vm745_vm8, %v3067_v42, 0  ;;  %v2953_v43 = vpack.c.bf16 %v2952_v41, %v2952_v41  ;;  %v3175_v46 = vmul.f32 %v6184_v44, %v6944_v15  ;;  %v5984_v42 = vld [vmem:[#allocation7 + $0x60] sm:$0xff]  }
0x12f0   :  { %v3065_v33 = vpack.c.bf16 %v3064_v14, %v3064_v14  ;;  %v6186_v48 = vpop.eup %6185  ;;  %5742 = vmatpush3.bf16.msra.mxu0 %v5984_v42  ;;  %v5986_v14 = vld [vmem:[#allocation7 + $0x50] sm:$0xff]   ;;  %v6000_v42 = vld [vmem:[#allocation8 + $0x1cc] ss:$16 sps:$4 sm:$0xff]  }
0x12f1   :  { %5660 = vmatmul.mubr.msk.bf16.vlgmr.msra.gmra.mxu1 %vm729_vm9, %v2953_v43  ;;  %v3176_v47 = vpack.c.bf16 %v3175_v46, %v3175_v46  ;;  %v3299_v53 = vmul.f32 %v6186_v48, %v6949_v23  ;;  %5743 = vmatprep.subr.bf16.mxu0 %v6383_v10  ;;  %v5988_v46 = vld [vmem:[#allocation7 + $0x40] sm:$0xff]  }
0x12f2   :  { %5670 = vmatpush3.bf16.msra.mxu1 %v3072_v56  ;;  %5671 = vmatprep.mubr.msk.bf16.mxu1 %vm6384_vm6, %v6383_v10  ;;  %v3178_v7 = vpop.permute.xlu0 %3177 }
0x12f3   :  { %5681 = vmatprep.subr.bf16.mxu1 %v6383_v10  ;;  %v3183_v45 = vsel %vm745_vm8, %v3178_v7, 0  ;;  %v3300_v54 = vpack.c.bf16 %v3299_v53, %v3299_v53  ;;  %v5987_v7 = vld [vmem:[#allocation7 + $0x48] sm:$0xff]  }
0x12f4   :  { %5744 = vmatpush3.bf16.msra.mxu0 %v5985_v24  ;;  %v6004_v24 = vld [vmem:[#allocation8 + $0x1a8] ss:$16 sps:$4 sm:$0xff]  }
0x12f5   :  { %5745 = vmatprep.subr.bf16.mxu0 %v6383_v10 }
0x12f8   :  { %v6188_v55 = vpop.eup %6187  ;;  %5746 = vmatpush3.bf16.msra.mxu0 %v5986_v14  ;;  %v6006_v14 = vld [vmem:[#allocation8 + $0x1ac] ss:$16 sps:$4 sm:$0xff]  }
0x12f9   :  { %5672 = vmatmul.mubr.msk.bf16.vlgmr.msra.gmra.mxu1 %vm729_vm9, %v3065_v33  ;;  %v3409_v62 = vmul.f32 %v6188_v55, %v6953_v25  ;;  %5747 = vmatprep.subr.bf16.mxu0 %v6383_v10 }
0x12fa   :  { %5682 = vmatpush3.bf16.msra.mxu1 %v3183_v45  ;;  %5683 = vmatprep.mubr.msk.bf16.mxu1 %vm6384_vm6, %v6383_v10 }
0x12fb   :  { %5693 = vmatprep.subr.bf16.mxu1 %v6383_v10  ;;  %v3410_v2 = vpack.c.bf16 %v3409_v62, %v3409_v62 }
0x12fc   :  { %5748 = vmatpush3.bf16.msra.mxu0 %v5987_v7  ;;  %v6009_v7 = vld [vmem:[#allocation8 + $0x184] ss:$16 sps:$4 sm:$0xff]  }
0x12fd   :  { %5749 = vmatprep.subr.bf16.mxu0 %v6383_v10 }
0x1300   :  { %5750 = vmatpush3.bf16.msra.mxu0 %v5988_v46  ;;  %v6015_v46 = vld [vmem:[#allocation8 + $0x164] ss:$16 sps:$4 sm:$0xff]  }
0x1301   :  { %5684 = vmatmul.mubr.msk.bf16.vlgmr.msra.gmra.mxu1 %vm729_vm9, %v3176_v47 }
0x1302   :  { %5694 = vmatpush3.bf16.msra.mxu1 %v3306_v52  ;;  %5695 = vmatprep.mubr.msk.bf16.mxu1 %vm6384_vm6, %v6383_v10 }
0x1303   :  { %5705 = vmatprep.subr.bf16.mxu1 %v6383_v10 }
0x1309   :  { %5696 = vmatmul.mubr.msk.bf16.vlgmr.msra.gmra.mxu1 %vm729_vm9, %v3300_v54 }
0x130a   :  { %5707 = vmatprep.mubr.msk.bf16.mxu1 %vm6384_vm6, %v6383_v10 }
0x1313   :  { %v3518_v61 = vpop.xlane.xlu1 %3517 }
0x1314   :  { %6189 = vrcp.f32 %v3518_v61 }
0x1317   :  { %v3412_v3 = vpop.permute.xlu1 %3411 }
0x1318   :  { %v3417_v4 = vsel %vm745_vm8, %v3412_v3, 0 }
0x1319   :  { %5706 = vmatpush3.bf16.msra.mxu1 %v3417_v4 }
0x131a   :  { %5717 = vmatprep.subr.bf16.mxu1 %v6383_v10 }
0x131b   :  { %v3634_v16 = vpop.permute.xlu1 %3633 }
0x131c   :  { %5708 = vmatmul.mubr.msk.bf16.vlgmr.msra.gmra.mxu1 %vm729_vm9, %v3410_v2  ;;  %v3639_v22 = vsel %vm745_vm8, %v3634_v16, 0 }
0x131d   :  { %5719 = vmatprep.mubr.msk.bf16.mxu1 %vm6384_vm6, %v6383_v10 }
0x1321   :  { %v6190_v9 = vpop.eup %6189 }
0x1322   :  { %v3520_v63 = vmul.f32 %v6190_v9, %v6963_v34 }
0x1323   :  { %v3629_v11 = vpop.xlane.xlu0 %3628 }
0x1324   :  { %6191 = vrcp.f32 %v3629_v11  ;;  %v3521_v17 = vpack.c.bf16 %v3520_v63, %v3520_v63 }
0x1327   :  { %v3523_v12 = vpop.permute.xlu0 %3522 }
0x1328   :  { %v3528_v15 = vsel %vm745_vm8, %v3523_v12, 0 }
0x1329   :  { %5718 = vmatpush3.bf16.msra.mxu1 %v3528_v15 }
0x132a   :  { %5729 = vmatprep.subr.bf16.mxu1 %v6383_v10 }
0x132c   :  { %5720 = vmatmul.mubr.msk.bf16.vlgmr.msra.gmra.mxu1 %vm729_vm9, %v3521_v17 }
0x132d   :  { %5730 = vmatpush3.bf16.msra.mxu1 %v3639_v22  ;;  %5731 = vmatprep.mubr.msk.bf16.mxu1 %vm6384_vm6, %v6383_v10 }
0x1331   :  { %v6192_v18 = vpop.eup %6191 }
0x1332   :  { %v3631_v23 = vmul.f32 %v6192_v18, %v6967_v57 }
0x1334   :  { %v3632_v51 = vpack.c.bf16 %v3631_v23, %v3631_v23 }
0x1336   :  { %5732 = vmatmul.mubr.msk.bf16.vlgmr.msra.gmra.mxu1 %vm729_vm9, %v3632_v51 }
0x1337   :  { %4104 = vmatprep.mubr.bf16.mxu1 %v6381_v0 }
0x13b1   :  { %v2997_v25 = vpop.f32.mrf.mxu1 }
0x13b3   :  { %v5661_v26 = vpop.f32.mrf.mxu1 }
0x13b4   :  { %v5087_v26 = vld [vmem:[%s7144_s8 + $0x1] ss:$0 sm:$0xff] }
0x13b5   :  { %v3000_v27 = vpop.f32.mrf.mxu1 }
0x13b7   :  { %v5662_v28 = vpop.f32.mrf.mxu1 }
0x13b9   :  { %v3108_v29 = vpop.f32.mrf.mxu1 }
0x13bb   :  { %v5673_v30 = vpop.f32.mrf.mxu1 }
0x13bd   :  { %v3111_v31 = vpop.f32.mrf.mxu1 }
0x13bf   :  { %v5674_v32 = vpop.f32.mrf.mxu1 }
0x13c1   :  { %v3219_v34 = vpop.f32.mrf.mxu1 }
0x13c3   :  { %v5685_v35 = vpop.f32.mrf.mxu1 }
0x13c4   :  { %v5989_v35 = vld [vmem:[#allocation8 + $0x1e0] ss:$16 sps:$4 sm:$0xff]  }
0x13c5   :  { %v3222_v36 = vpop.f32.mrf.mxu1 }
0x13c6   :  { %v5991_v36 = vld [vmem:[#allocation8 + $0x1e4] ss:$16 sps:$4 sm:$0xff]  }
0x13c7   :  { %v5686_v13 = vpop.f32.mrf.mxu1  ;;  %4072 = vmatprep.subr.bf16.mxu1 %v5991_v36  ;;  %v6038_v36 = vld [vmem:[#allocation10 + $0x1f8] sm:$0xff]  }
0x13c8   :  { %v5992_v13 = vld [vmem:[#allocation8 + $0x1e8] ss:$16 sps:$4 sm:$0xff]   ;;  %4073 = vmatpush1.bf16.msra.mxu1 %v5989_v35 }
0x13c9   :  { %v3342_v37 = vpop.f32.mrf.mxu1  ;;  %v6037_v35 = vld [vmem:[#allocation10 + $0x178] sm:$0xff]  }
0x13cb   :  { %v5697_v38 = vpop.f32.mrf.mxu1 }
0x13cd   :  { %v3345_v57 = vpop.f32.mrf.mxu1 }
0x13cf   :  { %v5698_v5 = vpop.f32.mrf.mxu1 }
0x13dc   :  { %v3453_v19 = vpop.f32.mrf.mxu1 }
0x13dd   :  { %v5814_v40 = vpack.i.bf16 %v3453_v19, %v2997_v25  ;;  %v5995_v19 = vld [vmem:[#allocation8 + $0x1c0] ss:$16 sps:$4 sm:$0xff]  }
0x13de   :  { %v5709_v41 = vpop.f32.mrf.mxu1 }
0x13df   :  { %5815 = vrot.lane.b32.xlu1 %v5814_v40, %s6385_s22  ;;  %v5997_v40 = vld [vmem:[#allocation8 + $0x1c4] ss:$16 sps:$4 sm:$0xff]   ;;  %v5998_v41 = vld [vmem:[#allocation8 + $0x1c8] ss:$16 sps:$4 sm:$0xff]  }
0x13e0   :  { %v3456_v56 = vpop.f32.mrf.mxu1  ;;  %4074 = vmatprep.subr.bf16.mxu1 %v5997_v40  ;;  %v6050_v40 = vld [vmem:[#allocation10 + $0x1e0] sm:$0xff]  }
0x13e1   :  { %4075 = vmatpush1.bf16.msra.mxu1 %v5995_v19  ;;  %v6001_v56 = vld [vmem:[#allocation8 + $0x1a0] ss:$16 sps:$4 sm:$0xff]  }
0x13e2   :  { %v5710_v43 = vpop.f32.mrf.mxu1  ;;  %v6049_v19 = vld [vmem:[#allocation10 + $0x160] sm:$0xff]  }
0x13e3   :  { %v6003_v43 = vld [vmem:[#allocation8 + $0x1a4] ss:$16 sps:$4 sm:$0xff]  }
0x13e4   :  { %4076 = vmatprep.subr.bf16.mxu1 %v6003_v43  ;;  %v6054_v43 = vld [vmem:[#allocation10 + $0x1d8] sm:$0xff]  }
0x13e5   :  { %4077 = vmatpush1.bf16.msra.mxu1 %v6001_v56  ;;  %v6053_v56 = vld [vmem:[#allocation10 + $0x158] sm:$0xff]  }
0x13e6   :  { %4078 = vmatprep.subr.bf16.mxu1 %v6009_v7  ;;  %v6057_v7 = vld [vmem:[#allocation10 + $0x150] sm:$0xff]  }
0x13ec   :  { %v3564_v33 = vpop.f32.mrf.mxu1 }
0x13ed   :  { %v5819_v44 = vpack.i.bf16 %v3564_v33, %v3108_v29  ;;  %v6012_v33 = vld [vmem:[#allocation8 + $0x18c] ss:$16 sps:$4 sm:$0xff]  }
0x13ee   :  { %v5721_v45 = vpop.f32.mrf.mxu1 }
0x13ef   :  { %5820 = vrot.lane.b32.xlu1 %v5819_v44, %s6377_s24  ;;  %v6007_v44 = vld [vmem:[#allocation8 + $0x180] ss:$16 sps:$4 sm:$0xff]   ;;  %v6010_v45 = vld [vmem:[#allocation8 + $0x188] ss:$16 sps:$4 sm:$0xff]  }
0x13f0   :  { %v3567_v47 = vpop.f32.mrf.mxu1  ;;  %4079 = vmatpush1.bf16.msra.mxu1 %v6007_v44  ;;  %v6059_v44 = vld [vmem:[#allocation10 + $0x110] sm:$0xff]  }
0x13f1   :  { %v6018_v47 = vld [vmem:[#allocation8 + $0x16c] ss:$16 sps:$4 sm:$0xff]   ;;  %4080 = vmatprep.subr.bf16.mxu1 %v6015_v46 }
0x13f2   :  { %v5722_v48 = vpop.f32.mrf.mxu1  ;;  %v6061_v46 = vld [vmem:[#allocation10 + $0x148] sm:$0xff]  }
0x13f3   :  { %v6013_v48 = vld [vmem:[#allocation8 + $0x160] ss:$16 sps:$4 sm:$0xff]  }
0x13f4   :  { %4081 = vmatpush1.bf16.msra.mxu1 %v6013_v48  ;;  %v6063_v48 = vld [vmem:[#allocation10 + $0x108] sm:$0xff]  }
0x13f6   :  { %v3675_v52 = vpop.f32.mrf.mxu1 }
0x13f7   :  { %v5824_v53 = vpack.i.bf16 %v3675_v52, %v3219_v34  ;;  %v6016_v52 = vld [vmem:[#allocation8 + $0x168] ss:$16 sps:$4 sm:$0xff]  }
0x13f8   :  { %v5733_v54 = vpop.f32.mrf.mxu1 }
0x13f9   :  { %5825 = vrot.lane.b32.xlu1 %v5824_v53, %s6386_s7  ;;  %v6021_v53 = vld [vmem:[#allocation8 + $0x144] ss:$16 sps:$4 sm:$0xff]   ;;  %v6024_v54 = vld [vmem:[#allocation8 + $0x14c] ss:$16 sps:$4 sm:$0xff]  }
0x13fa   :  { %v3678_v55 = vpop.f32.mrf.mxu1  ;;  %4082 = vmatprep.subr.bf16.mxu1 %v6021_v53  ;;  %v6065_v53 = vld [vmem:[#allocation10 + $0x140] sm:$0xff]  }
0x13fb   :  { %v6019_v55 = vld [vmem:[#allocation8 + $0x140] ss:$16 sps:$4 sm:$0xff]  }
0x13fc   :  { %v5734_v61 = vpop.f32.mrf.mxu1  ;;  %4083 = vmatpush1.bf16.msra.mxu1 %v6019_v55  ;;  %v6067_v55 = vld [vmem:[#allocation10 + $0x100] sm:$0xff]  }
0x13fd   :  { %v6022_v61 = vld [vmem:[#allocation8 + $0x148] ss:$16 sps:$4 sm:$0xff]  }
0x1451   :  { %v5816_v62 = vpop.permute.xlu1 %5815 }
0x1452   :  { %v5818_v4 = vunpack.i.h.bf16 %v5816_v62  ;;  %v5817_v2 = vunpack.i.l.bf16 %v5816_v62  ;;  %v6027_v62 = vld [vmem:[#allocation8 + $0x124] ss:$16 sps:$4 sm:$0xff]  }
0x1453   :  { %4084 = vmatprep.subr.bf16.mxu1 %v6027_v62  ;;  %v5100_v62 = vld [vmem:[%s7148_s12 + $0x4] sm:$0xf] }
0x1454   :  { %v3693_v12 = vsel %vm681_vm7, %v3342_v37, %v5818_v4  ;;  %v3237_v15 = vsel %vm681_vm7, %v6931_v1, %v5817_v2  ;;  %v5994_v37 = vld [vmem:[#allocation8 + $0x1ec] ss:$16 sps:$4 sm:$0xff]   ;;  %v6025_v4 = vld [vmem:[#allocation8 + $0x120] ss:$16 sps:$4 sm:$0xff]   ;;  %v6028_v2 = vld [vmem:[#allocation8 + $0x128] ss:$16 sps:$4 sm:$0xff]  }
0x1455   :  { %4115 = vmatprep.subr.bf16.mxu0 %v5994_v37  ;;  %4085 = vmatpush1.bf16.msra.mxu1 %v6025_v4  ;;  %v6040_v37 = vld [vmem:[#allocation10 + $0x1b8] sm:$0xff]   ;;  %v3903_v4 = vrot.slane %v5100_v62, %v6579_v6 }
0x1461   :  { %v5821_v3 = vpop.permute.xlu1 %5820 }
0x1462   :  { %v5823_v9 = vunpack.i.h.bf16 %v5821_v3  ;;  %v5822_v11 = vunpack.i.l.bf16 %v5821_v3  ;;  %v6030_v3 = vld [vmem:[#allocation8 + $0x12c] ss:$16 sps:$4 sm:$0xff]  }
0x1464   :  { %v3694_v22 = vsel %vm1138_vm10, %v3693_v12, %v5823_v9  ;;  %v3238_v18 = vsel %vm1138_vm10, %v3237_v15, %v5822_v11  ;;  %v6033_v9 = vld [vmem:[#allocation8 + $0x104] ss:$16 sps:$4 sm:$0xff]   ;;  %v6036_v11 = vld [vmem:[#allocation8 + $0x10c] ss:$16 sps:$4 sm:$0xff]   ;;  %v6034_v12 = vld [vmem:[#allocation8 + $0x108] ss:$16 sps:$4 sm:$0xff]  }
0x1465   :  { %4086 = vmatprep.subr.bf16.mxu1 %v6033_v9  ;;  %v3907_v9 = vrot.slane %v5100_v62, %v1802_v58 }
0x146b   :  { %v5826_v63 = vpop.permute.xlu1 %5825 }
0x146c   :  { %v5828_v16 = vunpack.i.h.bf16 %v5826_v63  ;;  %v5827_v17 = vunpack.i.l.bf16 %v5826_v63  ;;  %v6031_v63 = vld [vmem:[#allocation8 + $0x100] ss:$16 sps:$4 sm:$0xff]  }
0x146d   :  { %4087 = vmatpush1.bf16.msra.mxu1 %v6031_v63 }
0x146e   :  { %v3695_v23 = vsel %vm1140_vm11, %v3694_v22, %v5828_v16  ;;  %v3239_v51 = vsel %vm1140_vm11, %v3238_v18, %v5827_v17  ;;  %5395 = vmatprep.subr.bf16.mxu1 %v6037_v35 }
0x146f   :  { %v3715_v25 = vpack.c.bf16 %v3695_v23, %v3239_v51 }
0x1471   :  { %5752 = vmatmul.mubr.bf16.vlgmr.msra.gmra.mxu0 %v3715_v25 }
0x1472   :  { %4147 = vmatprep.mubr.bf16.mxu0 %v6381_v0  ;;  %4116 = vmatpush1.bf16.msra.mxu0 %v5992_v13  ;;  %v6039_v13 = vld [vmem:[#allocation10 + $0x138] sm:$0xff]  }
0x1473   :  { %4117 = vmatprep.subr.bf16.mxu0 %v6000_v42  ;;  %v6052_v42 = vld [vmem:[#allocation10 + $0x1a0] sm:$0xff]  }
0x1476   :  { %4118 = vmatpush1.bf16.msra.mxu0 %v5998_v41  ;;  %v6051_v41 = vld [vmem:[#allocation10 + $0x120] sm:$0xff]  }
0x1477   :  { %4119 = vmatprep.subr.bf16.mxu0 %v6006_v14  ;;  %v6056_v14 = vld [vmem:[#allocation10 + $0x198] sm:$0xff]  }
0x147a   :  { %4120 = vmatpush1.bf16.msra.mxu0 %v6004_v24  ;;  %v6055_v24 = vld [vmem:[#allocation10 + $0x118] sm:$0xff]  }
0x147b   :  { %4121 = vmatprep.subr.bf16.mxu0 %v6012_v33  ;;  %v6058_v33 = vld [vmem:[#allocation10 + $0x1d0] sm:$0xff]  }
0x147e   :  { %4122 = vmatpush1.bf16.msra.mxu0 %v6010_v45  ;;  %v6060_v45 = vld [vmem:[#allocation10 + $0x190] sm:$0xff]  }
0x147f   :  { %4123 = vmatprep.subr.bf16.mxu0 %v6018_v47  ;;  %v6062_v47 = vld [vmem:[#allocation10 + $0x1c8] sm:$0xff]  }
0x1482   :  { %4124 = vmatpush1.bf16.msra.mxu0 %v6016_v52  ;;  %v6064_v52 = vld [vmem:[#allocation10 + $0x188] sm:$0xff]  }
0x1483   :  { %4125 = vmatprep.subr.bf16.mxu0 %v6024_v54  ;;  %v6066_v54 = vld [vmem:[#allocation10 + $0x1c0] sm:$0xff]  }
0x1486   :  { %4126 = vmatpush1.bf16.msra.mxu0 %v6022_v61  ;;  %v6068_v61 = vld [vmem:[#allocation10 + $0x180] sm:$0xff]  }
0x1487   :  { %4127 = vmatprep.subr.bf16.mxu0 %v6030_v3  ;;  %v3895_v3 = vrot.slane %v5100_v62, %v6582_v8 }
0x148a   :  { %4128 = vmatpush1.bf16.msra.mxu0 %v6028_v2  ;;  %v3899_v2 = vrot.slane %v5100_v62, %v6572_v60 }
0x148b   :  { %4129 = vmatprep.subr.bf16.mxu0 %v6036_v11 }
0x148e   :  { %4130 = vmatpush1.bf16.msra.mxu0 %v6034_v12 }
0x148f   :  { %5417 = vmatprep.subr.bf16.mxu0 %v6038_v36 }
0x1531   :  { %v3804_v27 = vpop.f32.mrf.mxu0 }
0x1532   :  { %v3805_v1 = vadd.f32 %v5087_v26, %v3804_v27 }
0x1533   :  { %v5753_v28 = vpop.f32.mrf.mxu0 }
0x1534   :  { %v3811_v29 = vadd.f32 %v3805_v1, %v6853_v49 }
0x1535   :  { %v3807_v30 = vpop.f32.mrf.mxu0 }
0x1536   :  { %v3808_v31 = vadd.f32 %v5087_v26, %v3807_v30  ;;  %3817 = vadd.xlane.f32.xlu0 %v3811_v29  ;;  %v5098_v26 = vld [vmem:[%s7145_s9 + $0x1] ss:$0 sm:$0xff] }
0x1537   :  { %v5754_v32 = vpop.f32.mrf.mxu0 }
0x1538   :  { %v3812_v34 = vadd.f32 %v3808_v31, %v6855_v50 }
0x153a   :  { %3819 = vadd.xlane.f32.xlu1 %v3812_v34 }
0x15bf   :  { %v3818_v38 = vpop.xlane.xlu0 %3817 }
0x15c0   :  { %v3821_v57 = vmul.f32 0.0078125, %v3818_v38  ;;  %v6041_v38 = vld [vmem:[#allocation10 + $0x170] sm:$0xff]  }
0x15c2   :  { %v7037_v5 = vsub.f32 %v3811_v29, %v3821_v57  ;;  %v5099_v29 = vld [vmem:[%s7146_s10 + $0x1] ss:$0 sm:$0xff]  ;;  %v6042_v57 = vld [vmem:[#allocation10 + $0x1f0] sm:$0xff]  }
0x15c3   :  { %v3820_v49 = vpop.xlane.xlu1 %3819 }
0x15c4   :  { %v3822_v21 = vmul.f32 0.0078125, %v3820_v49  ;;  %v3825_v39 = vmul.f32 %v7037_v5, %v7037_v5  ;;  %v6044_v49 = vld [vmem:[#allocation10 + $0x1b0] sm:$0xff]  }
0x15c6   :  { %v7041_v20 = vsub.f32 %v3812_v34, %v3822_v21  ;;  %3827 = vadd.xlane.f32.xlu0 %v3825_v39  ;;  %v6045_v21 = vld [vmem:[#allocation10 + $0x168] sm:$0xff]  }
0x15c7   :  { %v6046_v39 = vld [vmem:[#allocation10 + $0x1e8] sm:$0xff]  }
0x15c8   :  { %v3826_v50 = vmul.f32 %v7041_v20, %v7041_v20 }
0x15ca   :  { %3829 = vadd.xlane.f32.xlu0 %v3826_v50  ;;  %v6048_v50 = vld [vmem:[#allocation10 + $0x1a8] sm:$0xff]  }
0x164f   :  { %v3828_v15 = vpop.xlane.xlu0 %3827 }
0x1650   :  { %v3831_v16 = vmul.f32 0.0078125, %v3828_v15 }
0x1652   :  { %v3833_v17 = vadd.f32 1e-12, %v3831_v16 }
0x1653   :  { %v3830_v22 = vpop.xlane.xlu0 %3829 }
0x1654   :  { %6193 = vrsqrt.f32 %v3833_v17  ;;  %v3832_v18 = vmul.f32 0.0078125, %v3830_v22 }
0x1656   :  { %v3834_v23 = vadd.f32 1e-12, %v3832_v18 }
0x1658   :  { %6195 = vrsqrt.f32 %v3834_v23 }
0x1661   :  { %v6194_v51 = vpop.eup %6193 }
0x1662   :  { %v3837_v25 = vmul.f32 %v6194_v51, %v7037_v5  ;;  %v6043_v5 = vld [vmem:[#allocation10 + $0x130] sm:$0xff]  }
0x1664   :  { %v3845_v28 = vmul.f32 %v5098_v26, %v3837_v25 }
0x1665   :  { %v6196_v27 = vpop.eup %6195 }
0x1666   :  { %v3838_v1 = vmul.f32 %v6196_v27, %v7041_v20  ;;  %v7053_v31 = vadd.f32 %v5099_v29, %v3845_v28  ;;  %v6047_v20 = vld [vmem:[#allocation10 + $0x128] sm:$0xff]  }
0x1668   :  { %v3846_v30 = vmul.f32 %v5098_v26, %v3838_v1 }
0x166a   :  { %v7055_v32 = vadd.f32 %v5099_v29, %v3846_v30 }
0x166c   :  { %v3890_v34 = vpack.c.bf16 %v7055_v32, %v7053_v31 }
0x166e   :  { %4105 = vmatmul.mubr.bf16.vlgmr.msra.gmra.mxu1 %v3890_v34  ;;  %4148 = vmatmul.mubr.bf16.vlgmr.msra.gmra.mxu0 %v3890_v34 }
0x166f   :  { %5396 = vmatpush3.bf16.msra.mxu1 %v6039_v13  ;;  %5418 = vmatpush3.bf16.msra.mxu0 %v6040_v37 }
0x1670   :  { %5397 = vmatprep.subr.bf16.mxu1 %v6041_v38  ;;  %5419 = vmatprep.subr.bf16.mxu0 %v6042_v57 }
0x1673   :  { %5398 = vmatpush3.bf16.msra.mxu1 %v6043_v5  ;;  %5420 = vmatpush3.bf16.msra.mxu0 %v6044_v49 }
0x1674   :  { %5399 = vmatprep.subr.bf16.mxu1 %v6045_v21  ;;  %5421 = vmatprep.subr.bf16.mxu0 %v6046_v39 }
0x1677   :  { %5400 = vmatpush3.bf16.msra.mxu1 %v6047_v20  ;;  %5422 = vmatpush3.bf16.msra.mxu0 %v6048_v50 }
0x1678   :  { %5401 = vmatprep.subr.bf16.mxu1 %v6049_v19  ;;  %5423 = vmatprep.subr.bf16.mxu0 %v6050_v40 }
0x167b   :  { %5402 = vmatpush3.bf16.msra.mxu1 %v6051_v41  ;;  %5424 = vmatpush3.bf16.msra.mxu0 %v6052_v42 }
0x167c   :  { %5403 = vmatprep.subr.bf16.mxu1 %v6053_v56  ;;  %5425 = vmatprep.subr.bf16.mxu0 %v6054_v43 }
0x167f   :  { %5404 = vmatpush3.bf16.msra.mxu1 %v6055_v24  ;;  %5426 = vmatpush3.bf16.msra.mxu0 %v6056_v14 }
0x1680   :  { %5405 = vmatprep.subr.bf16.mxu1 %v6057_v7  ;;  %5427 = vmatprep.subr.bf16.mxu0 %v6058_v33 }
0x1683   :  { %5406 = vmatpush3.bf16.msra.mxu1 %v6059_v44  ;;  %5428 = vmatpush3.bf16.msra.mxu0 %v6060_v45 }
0x1684   :  { %5407 = vmatprep.subr.bf16.mxu1 %v6061_v46  ;;  %5429 = vmatprep.subr.bf16.mxu0 %v6062_v47 }
0x1687   :  { %5408 = vmatpush3.bf16.msra.mxu1 %v6063_v48  ;;  %5430 = vmatpush3.bf16.msra.mxu0 %v6064_v52 }
0x1688   :  { %5409 = vmatprep.subr.bf16.mxu1 %v6065_v53  ;;  %5431 = vmatprep.subr.bf16.mxu0 %v6066_v54 }
0x168b   :  { %5410 = vmatpush3.bf16.msra.mxu1 %v6067_v55  ;;  %5432 = vmatpush3.bf16.msra.mxu0 %v6068_v61 }
0x168c   :  { %5755 = vmatprep.subr.bf16.mxu0 %v6383_v10 }
0x172e   :  { %v4106_v11 = vpop.f32.mrf.mxu1  ;;  %v4149_v63 = vpop.f32.mrf.mxu0 }
0x172f   :  { %v7068_v12 = vadd.f32 %v4106_v11, %v3895_v3  ;;  %v7070_v15 = vadd.f32 %v4149_v63, %v3903_v4 }
0x1730   :  { %v4108_v16 = vpop.f32.mrf.mxu1  ;;  %v4151_v17 = vpop.f32.mrf.mxu0 }
0x1731   :  { %v4166_v22 = vmul.f32 0.044715, %v7068_v12  ;;  %v4168_v18 = vmul.f32 0.044715, %v7070_v15  ;;  %v4109_v23 = vadd.f32 %v4108_v16, %v3899_v2  ;;  %v7074_v51 = vadd.f32 %v4151_v17, %v3907_v9 }
0x1732   :  { %v4110_v25 = vpop.f32.mrf.mxu1  ;;  %v4153_v26 = vpop.f32.mrf.mxu0 }
0x1733   :  { %v4174_v59 = vmul.f32 %v4166_v22, %v7068_v12  ;;  %v4176_v58 = vmul.f32 %v4168_v18, %v7070_v15  ;;  %v4167_v27 = vmul.f32 0.044715, %v4109_v23  ;;  %v4169_v1 = vmul.f32 0.044715, %v7074_v51 }
0x1734   :  { %v4111_v28 = vadd.f32 %v4110_v25, %v3895_v3  ;;  %v7079_v29 = vadd.f32 %v4153_v26, %v3903_v4  ;;  %v4112_v30 = vpop.f32.mrf.mxu1  ;;  %v4155_v34 = vpop.f32.mrf.mxu0  ;;  %v4159_v18 = vmul.f32 0.5, %v4109_v23  ;;  %v4158_v26 = vmul.f32 0.5, %v7068_v12 }
0x1735   :  { %v4182_v35 = vmul.f32 %v4174_v59, %v7068_v12  ;;  %v4184_v36 = vmul.f32 %v4176_v58, %v7070_v15  ;;  %v4175_v13 = vmul.f32 %v4167_v27, %v4109_v23  ;;  %v4177_v37 = vmul.f32 %v4169_v1, %v7074_v51 }
0x1736   :  { %v4170_v38 = vmul.f32 0.044715, %v4111_v28  ;;  %v4172_v57 = vmul.f32 0.044715, %v7079_v29  ;;  %v4113_v5 = vadd.f32 %v4112_v30, %v3899_v2  ;;  %v4156_v49 = vadd.f32 %v4155_v34, %v3907_v9 }
0x1737   :  { %v4190_v21 = vadd.f32 %v4182_v35, %v7068_v12  ;;  %v4192_v39 = vadd.f32 %v4184_v36, %v7070_v15  ;;  %v4183_v20 = vmul.f32 %v4175_v13, %v4109_v23  ;;  %v4185_v50 = vmul.f32 %v4177_v37, %v7074_v51 }
0x1738   :  { %v4178_v19 = vmul.f32 %v4170_v38, %v4111_v28  ;;  %v4180_v40 = vmul.f32 %v4172_v57, %v7079_v29  ;;  %v4171_v41 = vmul.f32 0.044715, %v4113_v5  ;;  %v4173_v42 = vmul.f32 0.044715, %v4156_v49 }
0x1739   :  { %v4198_v56 = vmul.f32 0.7978846, %v4190_v21  ;;  %v4200_v43 = vmul.f32 0.7978846, %v4192_v39  ;;  %v4191_v24 = vadd.f32 %v4183_v20, %v4109_v23  ;;  %v4193_v46 = vadd.f32 %v4185_v50, %v7074_v51 }
0x173a   :  { %v4186_v14 = vmul.f32 %v4178_v19, %v4111_v28  ;;  %v4188_v7 = vmul.f32 %v4180_v40, %v7079_v29  ;;  %v4179_v33 = vmul.f32 %v4171_v41, %v4113_v5  ;;  %v4181_v44 = vmul.f32 %v4173_v42, %v4156_v49 }
0x173b   :  { %v4199_v45 = vmul.f32 0.7978846, %v4191_v24  ;;  %6197 = vtanh.f32 %v4198_v56  ;;  %v4201_v54 = vmul.f32 0.7978846, %v4193_v46  ;;  %v4162_v1 = vmul.f32 0.5, %v4111_v28 }
0x173c   :  { %v4194_v47 = vadd.f32 %v4186_v14, %v4111_v28  ;;  %v4196_v48 = vadd.f32 %v4188_v7, %v7079_v29  ;;  %v4187_v52 = vmul.f32 %v4179_v33, %v4113_v5  ;;  %6199 = vtanh.f32 %v4200_v43 }
0x173d   :  { %v4189_v53 = vmul.f32 %v4181_v44, %v4156_v49  ;;  %6201 = vtanh.f32 %v4199_v45  ;;  %v4163_v36 = vmul.f32 0.5, %v4113_v5  ;;  %v4164_v37 = vmul.f32 0.5, %v7079_v29 }
0x173e   :  { %v4202_v55 = vmul.f32 0.7978846, %v4194_v47  ;;  %v4204_v61 = vmul.f32 0.7978846, %v4196_v48  ;;  %v4195_v62 = vadd.f32 %v4187_v52, %v4113_v5  ;;  %6203 = vtanh.f32 %v4201_v54 }
0x173f   :  { %v4197_v3 = vadd.f32 %v4189_v53, %v4156_v49  ;;  %v4161_v57 = vmul.f32 0.5, %v7074_v51  ;;  %v4165_v21 = vmul.f32 0.5, %v4156_v49  ;;  %v4160_v12 = vmul.f32 0.5, %v7070_v15  ;;  %v5134_v49 = vld [vmem:[%s7150_s14 + $0x1] ss:$0 sm:$0xff] }
0x1740   :  { %6205 = vtanh.f32 %v4202_v55  ;;  %v4203_v4 = vmul.f32 0.7978846, %v4195_v62 }
0x1741   :  { %6207 = vtanh.f32 %v4204_v61  ;;  %v4205_v2 = vmul.f32 0.7978846, %v4197_v3  ;;  %v6069_v3 = vld [vmem:[#allocation11 + $0xa8] ss:$12 sps:$4 sm:$0xff]  }
0x1742   :  { %6209 = vtanh.f32 %v4203_v4  ;;  %v6071_v4 = vld [vmem:[#allocation11 + $0xac] ss:$12 sps:$4 sm:$0xff]  }
0x1743   :  { %6211 = vtanh.f32 %v4205_v2  ;;  %v6072_v2 = vld [vmem:[#allocation11 + $0xb0] ss:$12 sps:$4 sm:$0xff]   ;;  %4803 = vmatprep.subr.bf16.mxu1 %v6071_v4 }
0x1748   :  { %v6198_v9 = vpop.eup %6197 }
0x1749   :  { %v6200_v11 = vpop.eup %6199  ;;  %v4214_v30 = vadd.f32 1.0, %v6198_v9 }
0x174a   :  { %v6202_v63 = vpop.eup %6201  ;;  %v4216_v38 = vadd.f32 1.0, %v6200_v11 }
0x174b   :  { %v6204_v16 = vpop.eup %6203  ;;  %v4215_v25 = vadd.f32 1.0, %v6202_v63  ;;  %v4222_v41 = vmul.f32 %v4214_v30, %v4158_v26  ;;  %v6076_v26 = vld [vmem:[#allocation11 + $0x98] ss:$12 sps:$4 sm:$0xff]   ;;  %v6084_v30 = vld [vmem:[#allocation11 + $0x68] ss:$12 sps:$4 sm:$0xff]  }
0x174c   :  { %v4217_v27 = vadd.f32 1.0, %v6204_v16  ;;  %v4224_v56 = vmul.f32 %v4216_v38, %v4160_v12  ;;  %v6092_v38 = vld [vmem:[#allocation11 + $0x38] ss:$12 sps:$4 sm:$0xff]   ;;  %v6097_v12 = vld [vmem:[#allocation11] ss:$12 sps:$4 sm:$0xff]  }
0x174d   :  { %v6206_v17 = vpop.eup %6205  ;;  %v4223_v20 = vmul.f32 %v4215_v25, %v4159_v18  ;;  %v6073_v18 = vld [vmem:[#allocation11 + $0x90] ss:$12 sps:$4 sm:$0xff]   ;;  %v6075_v25 = vld [vmem:[#allocation11 + $0x94] ss:$12 sps:$4 sm:$0xff]  }
0x174e   :  { %v6208_v22 = vpop.eup %6207  ;;  %v4218_v59 = vadd.f32 1.0, %v6206_v17  ;;  %v4225_v40 = vmul.f32 %v4217_v27, %v4161_v57  ;;  %v6080_v27 = vld [vmem:[#allocation11 + $0x80] ss:$12 sps:$4 sm:$0xff]   ;;  %v6089_v57 = vld [vmem:[#allocation11 + $0x30] ss:$12 sps:$4 sm:$0xff]  }
0x174f   :  { %v6210_v58 = vpop.eup %6209  ;;  %v4220_v34 = vadd.f32 1.0, %v6208_v22 }
0x1750   :  { %v6212_v35 = vpop.eup %6211  ;;  %v4219_v13 = vadd.f32 1.0, %v6210_v58  ;;  %v4226_v23 = vmul.f32 %v4218_v59, %v4162_v1  ;;  %v6077_v59 = vld [vmem:[#allocation11 + $0x78] ss:$12 sps:$4 sm:$0xff]   ;;  %v6079_v58 = vld [vmem:[#allocation11 + $0x7c] ss:$12 sps:$4 sm:$0xff]  }
0x1751   :  { %v4221_v39 = vadd.f32 1.0, %v6212_v35  ;;  %v4228_v19 = vmul.f32 %v4220_v34, %v4164_v37  ;;  %v6083_v1 = vld [vmem:[#allocation11 + $0x64] ss:$12 sps:$4 sm:$0xff]   ;;  %v6081_v34 = vld [vmem:[#allocation11 + $0x60] ss:$12 sps:$4 sm:$0xff]  }
0x1752   :  { %v4227_v50 = vmul.f32 %v4219_v13, %v4163_v36  ;;  %v4297_v43 = vpack.c.bf16 %v4226_v23, %v4222_v41  ;;  %v6087_v35 = vld [vmem:[#allocation11 + $0x4c] ss:$12 sps:$4 sm:$0xff]   ;;  %v6088_v36 = vld [vmem:[#allocation11 + $0x50] ss:$12 sps:$4 sm:$0xff]   ;;  %v6085_v13 = vld [vmem:[#allocation11 + $0x48] ss:$12 sps:$4 sm:$0xff]  }
0x1753   :  { %v4229_v28 = vmul.f32 %v4221_v39, %v4165_v21  ;;  %v4299_v29 = vpack.c.bf16 %v4228_v19, %v4224_v56  ;;  %v6091_v37 = vld [vmem:[#allocation11 + $0x34] ss:$12 sps:$4 sm:$0xff]   ;;  %v6095_v21 = vld [vmem:[#allocation11 + $0x1c] ss:$12 sps:$4 sm:$0xff]   ;;  %v6093_v23 = vld [vmem:[#allocation11 + $0x18] ss:$12 sps:$4 sm:$0xff]  }
0x1754   :  { %v4298_v42 = vpack.c.bf16 %v4227_v50, %v4223_v20  ;;  %v6096_v39 = vld [vmem:[#allocation11 + $0x20] ss:$12 sps:$4 sm:$0xff]   ;;  %v6099_v20 = vld [vmem:[#allocation11 + $0x4] ss:$12 sps:$4 sm:$0xff]   ;;  %v6100_v50 = vld [vmem:[#allocation11 + $0x8] ss:$12 sps:$4 sm:$0xff]  }
0x1755   :  { %v4300_v5 = vpack.c.bf16 %v4229_v28, %v4225_v40 }
0x1756   :  { %4531 = vmatprep.mubr.bf16.mxu1 %v4298_v42 }
0x1757   :  { %4572 = vmatprep.mubr.bf16.mxu0 %v4300_v5  ;;  %4532 = vmatmul.mubr.bf16.vlgmr.msra.gmra.mxu1 %v4297_v43 }
0x1758   :  { %4573 = vmatmul.mubr.bf16.vlgmr.msra.gmra.mxu0 %v4299_v29  ;;  %4835 = vmatprep.mubr.bf16.mxu1 %v6381_v0  ;;  %v5169_v29 = vld [vmem:[%s7151_s15 + $0x1] ss:$0 sm:$0xff]  ;;  %s6387_s15 = smov [#allocation13]  }
0x1759   :  { %5771 = vmatprep.mubr.msk.bf16.mxu0 %vm6384_vm6, %v6383_v10  ;;  %5756 = vmatpush3.bf16.msra.mxu0 %v6072_v2 }
0x175a   :  { %4804 = vmatpush1.bf16.msra.mxu1 %v6069_v3  ;;  %5757 = vmatprep.subr.bf16.mxu0 %v6383_v10 }
0x175b   :  { %4805 = vmatprep.subr.bf16.mxu1 %v6075_v25 }
0x175d   :  { %5758 = vmatpush3.bf16.msra.mxu0 %v6076_v26 }
0x175e   :  { %4806 = vmatpush1.bf16.msra.mxu1 %v6073_v18  ;;  %5759 = vmatprep.subr.bf16.mxu0 %v6383_v10 }
0x175f   :  { %4807 = vmatprep.subr.bf16.mxu1 %v6079_v58 }
0x1761   :  { %5760 = vmatpush3.bf16.msra.mxu0 %v6080_v27 }
0x1762   :  { %4808 = vmatpush1.bf16.msra.mxu1 %v6077_v59  ;;  %5761 = vmatprep.subr.bf16.mxu0 %v6383_v10 }
0x1763   :  { %4809 = vmatprep.subr.bf16.mxu1 %v6083_v1 }
0x1765   :  { %5762 = vmatpush3.bf16.msra.mxu0 %v6084_v30 }
0x1766   :  { %4810 = vmatpush1.bf16.msra.mxu1 %v6081_v34  ;;  %5763 = vmatprep.subr.bf16.mxu0 %v6383_v10 }
0x1767   :  { %4811 = vmatprep.subr.bf16.mxu1 %v6087_v35 }
0x1769   :  { %5764 = vmatpush3.bf16.msra.mxu0 %v6088_v36 }
0x176a   :  { %4812 = vmatpush1.bf16.msra.mxu1 %v6085_v13  ;;  %5765 = vmatprep.subr.bf16.mxu0 %v6383_v10 }
0x176b   :  { %4813 = vmatprep.subr.bf16.mxu1 %v6091_v37 }
0x176d   :  { %5766 = vmatpush3.bf16.msra.mxu0 %v6092_v38 }
0x176e   :  { %4814 = vmatpush1.bf16.msra.mxu1 %v6089_v57  ;;  %5767 = vmatprep.subr.bf16.mxu0 %v6383_v10 }
0x176f   :  { %4815 = vmatprep.subr.bf16.mxu1 %v6095_v21 }
0x1771   :  { %5768 = vmatpush3.bf16.msra.mxu0 %v6096_v39 }
0x1772   :  { %4816 = vmatpush1.bf16.msra.mxu1 %v6093_v23  ;;  %5769 = vmatprep.subr.bf16.mxu0 %v6383_v10 }
0x1773   :  { %4817 = vmatprep.subr.bf16.mxu1 %v6099_v20 }
0x1775   :  { %5770 = vmatpush3.bf16.msra.mxu0 %v6100_v50 }
0x1776   :  { %4818 = vmatpush1.bf16.msra.mxu1 %v6097_v12 }
0x1817   :  { %v5411_v51 = vpop.f32.mrf.mxu1 }
0x1818   :  { %v5433_v15 = vpop.f32.mrf.mxu0 }
0x1819   :  { %v5412_v24 = vpop.f32.mrf.mxu1 }
0x181a   :  { %v5413_v14 = vadd.f32 %v5412_v24, %v5411_v51  ;;  %v5434_v7 = vpop.f32.mrf.mxu0 }
0x181b   :  { %v5414_v33 = vpop.f32.mrf.mxu1  ;;  %v5435_v45 = vadd.f32 %v5434_v7, %v5433_v15 }
0x181c   :  { %v4534_v44 = vadd.f32 %v5413_v14, %v5134_v49  ;;  %v5436_v46 = vpop.f32.mrf.mxu0 }
0x181d   :  { %v5415_v47 = vpop.f32.mrf.mxu1 }
0x181e   :  { %v4575_v48 = vadd.f32 %v5435_v45, %v4534_v44  ;;  %v5416_v52 = vadd.f32 %v5415_v47, %v5414_v33  ;;  %v5437_v0 = vpop.f32.mrf.mxu0  ;;  %v4657_v44 = vld [vmem:[%s7154_s18] sm:$0x7] }
0x181f   :  { %v5438_v54 = vadd.f32 %v5437_v0, %v5436_v46  ;;  %v4663_v45 = vrot.slane %v4657_v44, %v6582_v8  ;;  %v4671_v46 = vrot.slane %v4657_v44, %v6579_v6  ;;  %v4667_v47 = vrot.slane %v4657_v44, %v6572_v60 }
0x1820   :  { %v4537_v53 = vadd.f32 %v5416_v52, %v5134_v49  ;;  %v4581_v55 = vadd.f32 %v4575_v48, %v7053_v31  ;;  %v5170_v49 = vld [vmem:[%s7152_s16 + $0x1] ss:$0 sm:$0xff]  ;;  %s4898_s16 = sshll.u32 %s6387_s15, 4  ;;  %s4899_s16 = int_to_ptr.vmem [resolvable:$true] %s4898_s16 }
0x1821   :  { %s6337_s18 = scalar_lea.vmem %s4899_s16, 768  ;;  %p6342_p3 = scmp.lt.s32.totalorder %s4899_s16, %s4899_s16 }
0x1822   :  { %v4578_v61 = vadd.f32 %v5438_v54, %v4537_v53  ;;  %4587 = vadd.xlane.f32.xlu1 %v4581_v55  ;;  %p6338_p2 = scmp.ne.s32.totalorder %s4899_s16, %s6337_s18  ;;  %p6343_p4 = scmp.lt.s32.totalorder %s6337_s18, %s6337_s18 }
0x1824   :  { %v4582_v62 = vadd.f32 %v4578_v61, %v7055_v32  ;;  %p6344_p5 = por %p6343_p4, %p6342_p3 }
0x1826   :  { %4589 = vadd.xlane.f32.xlu0 %v4582_v62  ;;  %p6345_p6 = pnand %p6344_p5, %p6338_p2 }
0x18ab   :  { %v4588_v9 = vpop.xlane.xlu1 %4587 }
0x18ac   :  { %v4591_v11 = vmul.f32 0.0078125, %v4588_v9 }
0x18ae   :  { %v7105_v63 = vsub.f32 %v4581_v55, %v4591_v11 }
0x18af   :  { %v4590_v16 = vpop.xlane.xlu0 %4589 }
0x18b0   :  { %v4592_v17 = vmul.f32 0.0078125, %v4590_v16  ;;  %v4595_v31 = vmul.f32 %v7105_v63, %v7105_v63 }
0x18b2   :  { %v7109_v22 = vsub.f32 %v4582_v62, %v4592_v17  ;;  %4597 = vadd.xlane.f32.xlu1 %v4595_v31 }
0x18b4   :  { %v4596_v32 = vmul.f32 %v7109_v22, %v7109_v22 }
0x18b6   :  { %4599 = vadd.xlane.f32.xlu0 %v4596_v32 }
0x193b   :  { %v4598_v19 = vpop.xlane.xlu1 %4597 }
0x193c   :  { %v4601_v40 = vmul.f32 0.0078125, %v4598_v19 }
0x193e   :  { %v4603_v28 = vadd.f32 1e-12, %v4601_v40 }
0x193f   :  { %v4600_v41 = vpop.xlane.xlu0 %4599 }
0x1940   :  { %6213 = vrsqrt.f32 %v4603_v28  ;;  %v4602_v42 = vmul.f32 0.0078125, %v4600_v41 }
0x1942   :  { %v4604_v56 = vadd.f32 1e-12, %v4602_v42 }
0x1944   :  { %6215 = vrsqrt.f32 %v4604_v56 }
0x194d   :  { %v6214_v5 = vpop.eup %6213 }
0x194e   :  { %v4607_v43 = vmul.f32 %v6214_v5, %v7105_v63 }
0x1950   :  { %v4615_v15 = vmul.f32 %v5169_v29, %v4607_v43 }
0x1951   :  { %v6216_v51 = vpop.eup %6215 }
0x1952   :  { %v4608_v10 = vmul.f32 %v6216_v51, %v7109_v22  ;;  %v4623_v14 = vadd.f32 %v5170_v49, %v4615_v15 }
0x1954   :  { %v4616_v24 = vmul.f32 %v5169_v29, %v4608_v10 }
0x1956   :  { %v4624_v7 = vadd.f32 %v5170_v49, %v4616_v24 }
0x1958   :  { %v4658_v33 = vpack.c.bf16 %v4624_v7, %v4623_v14 }
0x195a   :  { %4836 = vmatmul.mubr.bf16.vlgmr.msra.gmra.mxu1 %v4658_v33  ;;  %5772 = vmatmul.mubr.bf16.vlgmr.msra.gmra.mxu0 %v4658_v33 }
0x1a1a   :  { %v4837_v48 = vpop.f32.mrf.mxu1  ;;  %v4880_v52 = vpop.f32.mrf.mxu0 }
0x1a1b   :  { %v4838_v0 = vadd.f32 %v4837_v48, %v4663_v45  ;;  %v4881_v53 = vadd.f32 %v4880_v52, %v4671_v46 }
0x1a1c   :  { %v4839_v54 = vpop.f32.mrf.mxu1  ;;  %v5773_v55 = vpop.f32.mrf.mxu0 }
0x1a1d   :  { %4887 = vst [vmem:[#allocation13] sm:$0xff] %v4838_v0  ;;  %4889 = vst [vmem:[#allocation13 + $0x10] sm:$0xff] %v4881_v53  ;;  %v4840_v61 = vadd.f32 %v4839_v54, %v4667_v47 }
0x1a1e   :  { %v4841_v62 = vpop.f32.mrf.mxu1  ;;  %v4883_v3 = vpop.f32.mrf.mxu0 }
0x1a1f   :  { %4888 = vst [vmem:[#allocation13 + $0x8] sm:$0xff] %v4840_v61  ;;  %v4842_v4 = vadd.f32 %v4841_v62, %v4663_v45  ;;  %v4884_v8 = vadd.f32 %v4883_v3, %v4671_v46 }
0x1a20   :  { %v4843_v2 = vpop.f32.mrf.mxu1  ;;  %v5774_v6 = vpop.f32.mrf.mxu0 }
0x1a21   :  { %4890 = vst [vmem:[#allocation13 + $0x18] sm:$0xff] %v4842_v4  ;;  %4892 = vst [vmem:[#allocation13 + $0x28] sm:$0xff] %v4884_v8  ;;  %v4844_v60 = vadd.f32 %v4843_v2, %v4667_v47 }
0x1a23   :  { %4891 = vst [vmem:[#allocation13 + $0x20] sm:$0xff] %v4844_v60 }
0x1a24   :  { %6348 = shalt.err (!%p6345_p6)
}
0x1a25   :  { %s6388_s11 = smov 384   ;;  %s6389_s17 = smov 24  }
0x1a26   :  { %4904 = dma.vmem_to_hbm [thread:$0]  %s4899_s16, 768, %s7155_s19, [#allocation4], %s6388_s11, %s6388_s11, %s6389_s17  }
0x1a27   :  { %6365 = dma.done.wait [#allocation4], 768  }
0x1a28   :  { %6366 = vsyncadd [#allocation4], 4294966528 }
0x1a29   :  { %4908 = vsyncpa [#allocation3], 1 }
0x1a2a   :  { %4909 = vsyncpa [#allocation6], 1 }
0x1a2b   :  { %4910 = vsyncpa [#allocation9], 1 }
0x1a2c   :  { %4911 = vsyncpa [#allocation12], 1 }
0x1a2d   :  { %4912 = vsyncpa [#allocation4], 1 }

</bundles_post_ra>
